<compile_context>
chip_gen: v7x
topology: tpu7x:2x2x1
jax: 0.10.0
libtpu: 0.0.40
codegen_flags: <defaults>
</compile_context>

<pallas_src>
import math
from functools import partial

import numpy as np
import jax
import jax.numpy as jnp
from jax.experimental import pallas as pl
from jax.experimental.pallas import tpu as pltpu

D_MODEL = 32
N_HEAD = 2
HEAD_DIM = D_MODEL // N_HEAD
FF_DIM = 2048          # PyTorch TransformerEncoderLayer default dim_feedforward
LN_EPS = 1e-5          # PyTorch default layer_norm_eps


def _layer_norm(z, w, b):
    # z: (N, D); w, b: (1, D). Biased variance over last dim (PyTorch semantics).
    mean = jnp.mean(z, axis=-1, keepdims=True)
    zc = z - mean
    var = jnp.mean(zc * zc, axis=-1, keepdims=True)
    return zc * jax.lax.rsqrt(var + LN_EPS) * w + b


def _model_kernel(x_ref, pe_ref, pp_ref, wqkv_ref, wo_ref, w1_ref, b1_ref, w2_ref,
                  out_ref, *, tb, seq, seq_pad):
    """One grid step == TB sequences, flattened to a (TB*seq_pad, D) row block."""
    D = D_MODEL
    rows = tb * seq_pad

    # ---- unpack the small-parameter slab (static row/col slices, zero DMA cost) ----
    P = pp_ref[...]                                      # (16, 128)
    we   = P[0:1, :D]                                    # embed weight row (1, D)
    bqkv = P[1:2, :3 * D]                                # fused QKV bias   (1, 3D)
    bo   = P[2:3, :D]
    ln1w = P[3:4, :D]
    ln1b = P[4:5, :D]
    b2   = P[5:6, :D]
    ln2w = P[6:7, :D]
    ln2b = P[7:8, :D]
    wfc  = P[8:9, :D]                                    # final fc weight row (1, D)
    bfc  = P[9:10, 0:1]                                  # final fc bias (1, 1)

    # ---- embedding Linear(1, D) + positional encoding (embed bias folded into pe) ----
    h = x_ref[...] * we + pe_ref[...]                    # (rows, D)

    # ---- fused QKV projection: one (rows, D) @ (D, 3D) matmul ----
    qkv = jnp.dot(h, wqkv_ref[...], preferred_element_type=jnp.float32) + bqkv
    qkv3 = qkv.reshape(tb, seq_pad, 3 * D)               # layout-preserving sublane split

    # ---- multi-head self attention, TB-batched per head; head concat folded into wo ----
    scale = 1.0 / math.sqrt(HEAD_DIM)
    wo = wo_ref[...]                                     # (D, D)
    if seq_pad != seq:
        col = jax.lax.broadcasted_iota(jnp.int32, (seq_pad, seq_pad), 1)
        key_mask = jnp.where(col < seq, 0.0, -1e30).astype(jnp.float32)
    attn = None
    for hd in range(N_HEAD):                             # tiny static loop (2 heads)
        c0 = hd * HEAD_DIM
        q3 = qkv3[:, :, c0:c0 + HEAD_DIM]                # (TB, Sp, HD)
        k3 = qkv3[:, :, D + c0:D + c0 + HEAD_DIM]
        v3 = qkv3[:, :, 2 * D + c0:2 * D + c0 + HEAD_DIM]
        s = jnp.einsum('bqd,bkd->bqk', q3, k3,
                       preferred_element_type=jnp.float32) * scale   # (TB, Sp, Sp)
        if seq_pad != seq:
            s = s + key_mask                             # mask padded key columns
        s = s - jnp.max(s, axis=-1, keepdims=True)
        p = jnp.exp(s)
        p = p / jnp.sum(p, axis=-1, keepdims=True)       # exact divide (no approx recip)
        oh = jnp.einsum('bqk,bkd->bqd', p, v3,
                        preferred_element_type=jnp.float32)          # (TB, Sp, HD)
        contrib = jnp.dot(oh.reshape(rows, HEAD_DIM), wo[c0:c0 + HEAD_DIM, :],
                          preferred_element_type=jnp.float32)        # (rows, D)
        attn = contrib if attn is None else attn + contrib
    attn = attn + bo

    # residual + norm1 (dropout = identity in eval mode)
    h = _layer_norm(h + attn, ln1w, ln1b)

    # ---- feed forward on the full (rows, D) block ----
    f = jnp.dot(h, w1_ref[...], preferred_element_type=jnp.float32) + b1_ref[...]
    f = jnp.maximum(f, 0.0)
    f = jnp.dot(f, w2_ref[...], preferred_element_type=jnp.float32) + b2
    h = _layer_norm(h + f, ln2w, ln2b)

    # ---- last real token of each sequence + Linear(D, 1), emitted as one (1, TB) row ----
    last = h.reshape(tb, seq_pad, D)[:, seq - 1, :]       # (TB, D)
    out = jax.lax.dot_general(wfc, last, (((1,), (1,)), ((), ())),
                              preferred_element_type=jnp.float32) + bfc   # (1, TB)
    out_ref[0] = out                                      # lane-dense store


def make_positional_encoding(seq_len, d_model):
    position = np.arange(seq_len, dtype=np.float32)[:, None]
    div_term = np.exp(np.arange(0, d_model, 2, dtype=np.float32)
                      * (-np.log(10000.0) / d_model))
    pe = np.zeros((seq_len, d_model), dtype=np.float32)
    pe[:, 0::2] = np.sin(position * div_term)
    pe[:, 1::2] = np.cos(position * div_term)
    return jnp.asarray(pe)


def init_params(key):
    ks = jax.random.split(key, 8)

    def w(k, shape, fan_in):
        return jax.random.normal(k, shape, jnp.float32) / math.sqrt(fan_in)

    return {
        # embed Linear(1, D) -> stored as (1, D)
        "we": w(ks[0], (1, D_MODEL), 1), "be": jnp.zeros((1, D_MODEL), jnp.float32),
        # attention in/out projections, stored transposed: y = x @ W + b
        "wq": w(ks[1], (D_MODEL, D_MODEL), D_MODEL), "bq": jnp.zeros((1, D_MODEL), jnp.float32),
        "wk": w(ks[2], (D_MODEL, D_MODEL), D_MODEL), "bk": jnp.zeros((1, D_MODEL), jnp.float32),
        "wv": w(ks[3], (D_MODEL, D_MODEL), D_MODEL), "bv": jnp.zeros((1, D_MODEL), jnp.float32),
        "wo": w(ks[4], (D_MODEL, D_MODEL), D_MODEL), "bo": jnp.zeros((1, D_MODEL), jnp.float32),
        # layer norms
        "ln1w": jnp.ones((1, D_MODEL), jnp.float32), "ln1b": jnp.zeros((1, D_MODEL), jnp.float32),
        "ln2w": jnp.ones((1, D_MODEL), jnp.float32), "ln2b": jnp.zeros((1, D_MODEL), jnp.float32),
        # feed-forward
        "w1": w(ks[5], (D_MODEL, FF_DIM), D_MODEL), "b1": jnp.zeros((1, FF_DIM), jnp.float32),
        "w2": w(ks[6], (FF_DIM, D_MODEL), FF_DIM),  "b2": jnp.zeros((1, D_MODEL), jnp.float32),
        # final fc Linear(D, 1) stored as a (1, D) row
        "wfc": w(ks[7], (1, D_MODEL), D_MODEL), "bfc": jnp.zeros((1, 1), jnp.float32),
    }


def transformer_encoder_model(x, params, tb=None):
    """x: (B, S) float32 -> (B, 1) float32"""
    B, S = x.shape
    Sp = ((S + 7) // 8) * 8                               # pad seq to sublane multiple
    if tb is None:
        # TB sequences per grid step; keep >=2 grid steps when B >= 2 (v7x: 2 TCs).
        tb = max(1, min(8, B // 2))
    nsteps = pl.cdiv(B, tb)
    Bp = nsteps * tb

    # Pad batch / sequence wrapper-side (padded keys are masked in-kernel, padded
    # batch rows are stripped below). Flatten to a (Bp*Sp, 1) column for the embed.
    xp = jnp.zeros((Bp, Sp), jnp.float32).at[:B, :S].set(x.astype(jnp.float32))
    xcol = xp.reshape(Bp * Sp, 1)

    # Positional encoding tiled once per TB block (constant across the grid), with
    # the embed bias folded in.
    pe = make_positional_encoding(Sp, D_MODEL)            # (Sp, D)
    pe_plus = jnp.tile(pe, (tb, 1)) + params["be"]        # (TB*Sp, D)

    # Wrapper-side QKV weight fusion (zero kernel cost).
    wqkv = jnp.concatenate([params["wq"], params["wk"], params["wv"]], axis=1)  # (D, 3D)
    bqkv = jnp.concatenate([params["bq"], params["bk"], params["bv"]], axis=1)  # (1, 3D)

    # Pack all tiny (1, D)/(1, 1) parameter rows into one (16, 128) f32 slab.
    def row(v):
        r = jnp.zeros((1, 128), jnp.float32)
        return r.at[:, :v.shape[-1]].set(v.reshape(1, -1).astype(jnp.float32))

    packed = jnp.concatenate(
        [row(params["we"]), row(bqkv), row(params["bo"]),
         row(params["ln1w"]), row(params["ln1b"]), row(params["b2"]),
         row(params["ln2w"]), row(params["ln2b"]),
         row(params["wfc"]), row(params["bfc"]),
         jnp.zeros((6, 128), jnp.float32)], axis=0)       # (16, 128)

    call_args = (xcol, pe_plus, packed, wqkv,
                 params["wo"], params["w1"], params["b1"], params["w2"])

    def build(single_buffer_resident):
        def resident(a):
            n = a.ndim
            idx = lambda b: (0,) * n                      # block index never changes
            if single_buffer_resident:
                return pl.BlockSpec(a.shape, idx, pipeline_mode=pl.Buffered(1))
            return pl.BlockSpec(a.shape, idx)

        in_specs = ([pl.BlockSpec((tb * Sp, 1), lambda b: (b, 0))]   # per-step sequences
                    + [resident(a) for a in call_args[1:]])          # resident weights
        return pl.pallas_call(
            partial(_model_kernel, tb=tb, seq=S, seq_pad=Sp),
            grid=(nsteps,),
            in_specs=in_specs,
            out_specs=pl.BlockSpec((1, 1, tb), lambda b: (b, 0, 0)),  # lane-dense row
            out_shape=jax.ShapeDtypeStruct((nsteps, 1, tb), jnp.float32),
            compiler_params=pltpu.CompilerParams(
                dimension_semantics=("parallel",)),       # batch blocks split across TCs
        )

    try:
        out = build(True)(*call_args)
    except Exception:
        # Fallback for jax versions without pipeline_mode / Buffered(1): default
        # double-buffering (only costs a little extra VMEM; working set is small).
        out = build(False)(*call_args)

    return out.reshape(Bp, 1)[:B]


if __name__ == "__main__":
    key = jax.random.PRNGKey(0)
    k_param, k_data = jax.random.split(key)

    # Small shapes: 4 sequences of length 8 -> TB=2 sequences per step, 2 grid steps.
    # (Module default seq_len=60 also works: S pads to 64 with masked attention keys.)
    B, S = 4, 8
    params = init_params(k_param)
    x = jax.random.normal(k_data, (B, S), jnp.float32)

    out = transformer_encoder_model(x, params)
    out = jax.block_until_ready(out)

    assert out.shape == (B, 1), f"bad output shape {out.shape}"
    assert bool(jnp.all(jnp.isfinite(out))), "non-finite output"
    print("KERNEL_OK")
</pallas_src>

<mosaic_0001>
module attributes {stable_mosaic.version = 11 : i64} {
  func.func @_model_kernel(%arg0: i32, %arg1: memref<16x1xf32, #tpu.memory_space<vmem>>, %arg2: memref<16x32xf32, #tpu.memory_space<vmem>>, %arg3: memref<16x128xf32, #tpu.memory_space<vmem>>, %arg4: memref<32x96xf32, #tpu.memory_space<vmem>>, %arg5: memref<32x32xf32, #tpu.memory_space<vmem>>, %arg6: memref<32x2048xf32, #tpu.memory_space<vmem>>, %arg7: memref<1x2048xf32, #tpu.memory_space<vmem>>, %arg8: memref<2048x32xf32, #tpu.memory_space<vmem>>, %arg9: memref<1x1x2xf32, #tpu.memory_space<vmem>>) attributes {dimension_semantics = [#tpu.dimension_semantics<parallel>], iteration_bounds = array<i64: 2>, scalar_prefetch = 0 : i64, scratch_operands = 0 : i64, tpu.core_type = #tpu.core_type<tc>, window_params = [{transform_indices = @transform_0, window_bounds = array<i64: 16, 1>}, {pipeline_mode = #tpu.pipeline_mode<synchronous>, transform_indices = @transform_1, window_bounds = array<i64: 16, 32>}, {pipeline_mode = #tpu.pipeline_mode<synchronous>, transform_indices = @transform_2, window_bounds = array<i64: 16, 128>}, {pipeline_mode = #tpu.pipeline_mode<synchronous>, transform_indices = @transform_3, window_bounds = array<i64: 32, 96>}, {pipeline_mode = #tpu.pipeline_mode<synchronous>, transform_indices = @transform_4, window_bounds = array<i64: 32, 32>}, {pipeline_mode = #tpu.pipeline_mode<synchronous>, transform_indices = @transform_5, window_bounds = array<i64: 32, 2048>}, {pipeline_mode = #tpu.pipeline_mode<synchronous>, transform_indices = @transform_6, window_bounds = array<i64: 1, 2048>}, {pipeline_mode = #tpu.pipeline_mode<synchronous>, transform_indices = @transform_7, window_bounds = array<i64: 2048, 32>}, {transform_indices = @transform_8, window_bounds = array<i64: 1, 1, 2>}]} {
    %c0 = arith.constant 0 : index
    %c0_0 = arith.constant 0 : index
    %0 = vector.load %arg3[%c0, %c0_0] : memref<16x128xf32, #tpu.memory_space<vmem>>, vector<16x128xf32>
    %1 = vector.extract_strided_slice %0 {offsets = [0, 0], sizes = [1, 32], strides = [1, 1]} : vector<16x128xf32> to vector<1x32xf32>
    %2 = vector.extract_strided_slice %0 {offsets = [1, 0], sizes = [1, 96], strides = [1, 1]} : vector<16x128xf32> to vector<1x96xf32>
    %3 = vector.extract_strided_slice %0 {offsets = [2, 0], sizes = [1, 32], strides = [1, 1]} : vector<16x128xf32> to vector<1x32xf32>
    %4 = vector.extract_strided_slice %0 {offsets = [3, 0], sizes = [1, 32], strides = [1, 1]} : vector<16x128xf32> to vector<1x32xf32>
    %5 = vector.extract_strided_slice %0 {offsets = [4, 0], sizes = [1, 32], strides = [1, 1]} : vector<16x128xf32> to vector<1x32xf32>
    %6 = vector.extract_strided_slice %0 {offsets = [5, 0], sizes = [1, 32], strides = [1, 1]} : vector<16x128xf32> to vector<1x32xf32>
    %7 = vector.extract_strided_slice %0 {offsets = [6, 0], sizes = [1, 32], strides = [1, 1]} : vector<16x128xf32> to vector<1x32xf32>
    %8 = vector.extract_strided_slice %0 {offsets = [7, 0], sizes = [1, 32], strides = [1, 1]} : vector<16x128xf32> to vector<1x32xf32>
    %9 = vector.extract_strided_slice %0 {offsets = [8, 0], sizes = [1, 32], strides = [1, 1]} : vector<16x128xf32> to vector<1x32xf32>
    %10 = vector.extract_strided_slice %0 {offsets = [9, 0], sizes = [1, 1], strides = [1, 1]} : vector<16x128xf32> to vector<1x1xf32>
    %c0_1 = arith.constant 0 : index
    %c0_2 = arith.constant 0 : index
    %11 = vector.load %arg1[%c0_1, %c0_2] : memref<16x1xf32, #tpu.memory_space<vmem>>, vector<16x1xf32>
    %12 = vector.broadcast %11 : vector<16x1xf32> to vector<16x32xf32>
    %13 = vector.broadcast %1 : vector<1x32xf32> to vector<16x32xf32>
    %14 = arith.mulf %12, %13 : vector<16x32xf32>
    %c0_3 = arith.constant 0 : index
    %c0_4 = arith.constant 0 : index
    %15 = vector.load %arg2[%c0_3, %c0_4] : memref<16x32xf32, #tpu.memory_space<vmem>>, vector<16x32xf32>
    %16 = arith.addf %14, %15 : vector<16x32xf32>
    %c0_5 = arith.constant 0 : index
    %c0_6 = arith.constant 0 : index
    %17 = vector.load %arg4[%c0_5, %c0_6] : memref<32x96xf32, #tpu.memory_space<vmem>>, vector<32x96xf32>
    %cst = arith.constant dense<0.000000e+00> : vector<16x96xf32>
    %18 = tpu.matmul %16, %17, %cst {dimension_numbers = #tpu.dot_dimension_numbers<[1], [0], [0], [1], [0, 0, 1, 1], [], []>} : vector<16x32xf32>, vector<32x96xf32>, vector<16x96xf32> -> vector<16x96xf32>
    %19 = vector.broadcast %2 : vector<1x96xf32> to vector<16x96xf32>
    %20 = arith.addf %18, %19 : vector<16x96xf32>
    %21 = vector.shape_cast %20 : vector<16x96xf32> to vector<2x8x96xf32>
    %c0_7 = arith.constant 0 : index
    %c0_8 = arith.constant 0 : index
    %22 = vector.load %arg5[%c0_7, %c0_8] : memref<32x32xf32, #tpu.memory_space<vmem>>, vector<32x32xf32>
    %23 = vector.extract_strided_slice %21 {offsets = [0, 0, 0], sizes = [2, 8, 16], strides = [1, 1, 1]} : vector<2x8x96xf32> to vector<2x8x16xf32>
    %24 = vector.extract_strided_slice %21 {offsets = [0, 0, 32], sizes = [2, 8, 16], strides = [1, 1, 1]} : vector<2x8x96xf32> to vector<2x8x16xf32>
    %25 = vector.extract_strided_slice %21 {offsets = [0, 0, 64], sizes = [2, 8, 16], strides = [1, 1, 1]} : vector<2x8x96xf32> to vector<2x8x16xf32>
    "tpu.trace_start"() <{level = 10 : i32, message = "bqd,bkd->bqk"}> : () -> ()
    %cst_9 = arith.constant dense<0.000000e+00> : vector<2x8x8xf32>
    %26 = tpu.matmul %23, %24, %cst_9 {dimension_numbers = #tpu.dot_dimension_numbers<[2], [2], [1], [1], [0, 0, 0, 1, 1, 1], [0], [0]>} : vector<2x8x16xf32>, vector<2x8x16xf32>, vector<2x8x8xf32> -> vector<2x8x8xf32>
    "tpu.trace_stop"() : () -> ()
    %cst_10 = arith.constant 2.500000e-01 : f32
    %27 = vector.broadcast %cst_10 : f32 to vector<2x8x8xf32>
    %28 = arith.mulf %26, %27 : vector<2x8x8xf32>
    %cst_11 = arith.constant dense<0xFF800000> : vector<2x8xf32>
    %29 = vector.multi_reduction <maximumf>, %28, %cst_11 [2] : vector<2x8x8xf32> to vector<2x8xf32>
    %30 = vector.shape_cast %29 : vector<2x8xf32> to vector<2x8x1xf32>
    %31 = vector.broadcast %30 : vector<2x8x1xf32> to vector<2x8x8xf32>
    %32 = arith.subf %28, %31 : vector<2x8x8xf32>
    %33 = math.exp %32 : vector<2x8x8xf32>
    %cst_12 = arith.constant dense<0.000000e+00> : vector<2x8xf32>
    %34 = vector.multi_reduction <add>, %33, %cst_12 [2] : vector<2x8x8xf32> to vector<2x8xf32>
    %35 = vector.shape_cast %34 : vector<2x8xf32> to vector<2x8x1xf32>
    %36 = vector.broadcast %35 : vector<2x8x1xf32> to vector<2x8x8xf32>
    %37 = arith.divf %33, %36 : vector<2x8x8xf32>
    "tpu.trace_start"() <{level = 10 : i32, message = "bqk,bkd->bqd"}> : () -> ()
    %cst_13 = arith.constant dense<0.000000e+00> : vector<2x8x16xf32>
    %38 = tpu.matmul %37, %25, %cst_13 {dimension_numbers = #tpu.dot_dimension_numbers<[2], [1], [1], [2], [0, 0, 0, 1, 1, 2], [0], [0]>} : vector<2x8x8xf32>, vector<2x8x16xf32>, vector<2x8x16xf32> -> vector<2x8x16xf32>
    "tpu.trace_stop"() : () -> ()
    %39 = vector.shape_cast %38 : vector<2x8x16xf32> to vector<16x16xf32>
    %40 = vector.extract_strided_slice %22 {offsets = [0, 0], sizes = [16, 32], strides = [1, 1]} : vector<32x32xf32> to vector<16x32xf32>
    %cst_14 = arith.constant dense<0.000000e+00> : vector<16x32xf32>
    %41 = tpu.matmul %39, %40, %cst_14 {dimension_numbers = #tpu.dot_dimension_numbers<[1], [0], [0], [1], [0, 0, 1, 1], [], []>} : vector<16x16xf32>, vector<16x32xf32>, vector<16x32xf32> -> vector<16x32xf32>
    %42 = vector.extract_strided_slice %21 {offsets = [0, 0, 16], sizes = [2, 8, 16], strides = [1, 1, 1]} : vector<2x8x96xf32> to vector<2x8x16xf32>
    %43 = vector.extract_strided_slice %21 {offsets = [0, 0, 48], sizes = [2, 8, 16], strides = [1, 1, 1]} : vector<2x8x96xf32> to vector<2x8x16xf32>
    %44 = vector.extract_strided_slice %21 {offsets = [0, 0, 80], sizes = [2, 8, 16], strides = [1, 1, 1]} : vector<2x8x96xf32> to vector<2x8x16xf32>
    "tpu.trace_start"() <{level = 10 : i32, message = "bqd,bkd->bqk"}> : () -> ()
    %cst_15 = arith.constant dense<0.000000e+00> : vector<2x8x8xf32>
    %45 = tpu.matmul %42, %43, %cst_15 {dimension_numbers = #tpu.dot_dimension_numbers<[2], [2], [1], [1], [0, 0, 0, 1, 1, 1], [0], [0]>} : vector<2x8x16xf32>, vector<2x8x16xf32>, vector<2x8x8xf32> -> vector<2x8x8xf32>
    "tpu.trace_stop"() : () -> ()
    %cst_16 = arith.constant 2.500000e-01 : f32
    %46 = vector.broadcast %cst_16 : f32 to vector<2x8x8xf32>
    %47 = arith.mulf %45, %46 : vector<2x8x8xf32>
    %cst_17 = arith.constant dense<0xFF800000> : vector<2x8xf32>
    %48 = vector.multi_reduction <maximumf>, %47, %cst_17 [2] : vector<2x8x8xf32> to vector<2x8xf32>
    %49 = vector.shape_cast %48 : vector<2x8xf32> to vector<2x8x1xf32>
    %50 = vector.broadcast %49 : vector<2x8x1xf32> to vector<2x8x8xf32>
    %51 = arith.subf %47, %50 : vector<2x8x8xf32>
    %52 = math.exp %51 : vector<2x8x8xf32>
    %cst_18 = arith.constant dense<0.000000e+00> : vector<2x8xf32>
    %53 = vector.multi_reduction <add>, %52, %cst_18 [2] : vector<2x8x8xf32> to vector<2x8xf32>
    %54 = vector.shape_cast %53 : vector<2x8xf32> to vector<2x8x1xf32>
    %55 = vector.broadcast %54 : vector<2x8x1xf32> to vector<2x8x8xf32>
    %56 = arith.divf %52, %55 : vector<2x8x8xf32>
    "tpu.trace_start"() <{level = 10 : i32, message = "bqk,bkd->bqd"}> : () -> ()
    %cst_19 = arith.constant dense<0.000000e+00> : vector<2x8x16xf32>
    %57 = tpu.matmul %56, %44, %cst_19 {dimension_numbers = #tpu.dot_dimension_numbers<[2], [1], [1], [2], [0, 0, 0, 1, 1, 2], [0], [0]>} : vector<2x8x8xf32>, vector<2x8x16xf32>, vector<2x8x16xf32> -> vector<2x8x16xf32>
    "tpu.trace_stop"() : () -> ()
    %58 = vector.shape_cast %57 : vector<2x8x16xf32> to vector<16x16xf32>
    %59 = vector.extract_strided_slice %22 {offsets = [16, 0], sizes = [16, 32], strides = [1, 1]} : vector<32x32xf32> to vector<16x32xf32>
    %cst_20 = arith.constant dense<0.000000e+00> : vector<16x32xf32>
    %60 = tpu.matmul %58, %59, %cst_20 {dimension_numbers = #tpu.dot_dimension_numbers<[1], [0], [0], [1], [0, 0, 1, 1], [], []>} : vector<16x16xf32>, vector<16x32xf32>, vector<16x32xf32> -> vector<16x32xf32>
    %61 = arith.addf %41, %60 : vector<16x32xf32>
    %62 = vector.broadcast %3 : vector<1x32xf32> to vector<16x32xf32>
    %63 = arith.addf %61, %62 : vector<16x32xf32>
    %64 = arith.addf %16, %63 : vector<16x32xf32>
    %cst_21 = arith.constant dense<0.000000e+00> : vector<16xf32>
    %65 = vector.multi_reduction <add>, %64, %cst_21 [1] : vector<16x32xf32> to vector<16xf32>
    %66 = vector.shape_cast %65 : vector<16xf32> to vector<16x1xf32>
    %cst_22 = arith.constant 3.200000e+01 : f32
    %67 = vector.broadcast %cst_22 : f32 to vector<16x1xf32>
    %68 = arith.divf %66, %67 : vector<16x1xf32>
    %69 = vector.broadcast %68 : vector<16x1xf32> to vector<16x32xf32>
    %70 = arith.subf %64, %69 : vector<16x32xf32>
    %71 = arith.mulf %70, %70 : vector<16x32xf32>
    %cst_23 = arith.constant dense<0.000000e+00> : vector<16xf32>
    %72 = vector.multi_reduction <add>, %71, %cst_23 [1] : vector<16x32xf32> to vector<16xf32>
    %73 = vector.shape_cast %72 : vector<16xf32> to vector<16x1xf32>
    %cst_24 = arith.constant 3.200000e+01 : f32
    %74 = vector.broadcast %cst_24 : f32 to vector<16x1xf32>
    %75 = arith.divf %73, %74 : vector<16x1xf32>
    %cst_25 = arith.constant 9.99999974E-6 : f32
    %76 = vector.broadcast %cst_25 : f32 to vector<16x1xf32>
    %77 = arith.addf %75, %76 : vector<16x1xf32>
    %78 = math.rsqrt %77 : vector<16x1xf32>
    %79 = vector.broadcast %78 : vector<16x1xf32> to vector<16x32xf32>
    %80 = arith.mulf %70, %79 : vector<16x32xf32>
    %81 = vector.broadcast %4 : vector<1x32xf32> to vector<16x32xf32>
    %82 = arith.mulf %80, %81 : vector<16x32xf32>
    %83 = vector.broadcast %5 : vector<1x32xf32> to vector<16x32xf32>
    %84 = arith.addf %82, %83 : vector<16x32xf32>
    %c0_26 = arith.constant 0 : index
    %c0_27 = arith.constant 0 : index
    %85 = vector.load %arg6[%c0_26, %c0_27] : memref<32x2048xf32, #tpu.memory_space<vmem>>, vector<32x2048xf32>
    %cst_28 = arith.constant dense<0.000000e+00> : vector<16x2048xf32>
    %86 = tpu.matmul %84, %85, %cst_28 {dimension_numbers = #tpu.dot_dimension_numbers<[1], [0], [0], [1], [0, 0, 1, 1], [], []>} : vector<16x32xf32>, vector<32x2048xf32>, vector<16x2048xf32> -> vector<16x2048xf32>
    %c0_29 = arith.constant 0 : index
    %c0_30 = arith.constant 0 : index
    %87 = vector.load %arg7[%c0_29, %c0_30] : memref<1x2048xf32, #tpu.memory_space<vmem>>, vector<1x2048xf32>
    %88 = vector.broadcast %87 : vector<1x2048xf32> to vector<16x2048xf32>
    %89 = arith.addf %86, %88 : vector<16x2048xf32>
    %cst_31 = arith.constant 0.000000e+00 : f32
    %90 = vector.broadcast %cst_31 : f32 to vector<16x2048xf32>
    %91 = arith.maximumf %89, %90 : vector<16x2048xf32>
    %c0_32 = arith.constant 0 : index
    %c0_33 = arith.constant 0 : index
    %92 = vector.load %arg8[%c0_32, %c0_33] : memref<2048x32xf32, #tpu.memory_space<vmem>>, vector<2048x32xf32>
    %cst_34 = arith.constant dense<0.000000e+00> : vector<16x32xf32>
    %93 = tpu.matmul %91, %92, %cst_34 {dimension_numbers = #tpu.dot_dimension_numbers<[1], [0], [0], [1], [0, 0, 1, 1], [], []>} : vector<16x2048xf32>, vector<2048x32xf32>, vector<16x32xf32> -> vector<16x32xf32>
    %94 = vector.broadcast %6 : vector<1x32xf32> to vector<16x32xf32>
    %95 = arith.addf %93, %94 : vector<16x32xf32>
    %96 = arith.addf %84, %95 : vector<16x32xf32>
    %cst_35 = arith.constant dense<0.000000e+00> : vector<16xf32>
    %97 = vector.multi_reduction <add>, %96, %cst_35 [1] : vector<16x32xf32> to vector<16xf32>
    %98 = vector.shape_cast %97 : vector<16xf32> to vector<16x1xf32>
    %cst_36 = arith.constant 3.200000e+01 : f32
    %99 = vector.broadcast %cst_36 : f32 to vector<16x1xf32>
    %100 = arith.divf %98, %99 : vector<16x1xf32>
    %101 = vector.broadcast %100 : vector<16x1xf32> to vector<16x32xf32>
    %102 = arith.subf %96, %101 : vector<16x32xf32>
    %103 = arith.mulf %102, %102 : vector<16x32xf32>
    %cst_37 = arith.constant dense<0.000000e+00> : vector<16xf32>
    %104 = vector.multi_reduction <add>, %103, %cst_37 [1] : vector<16x32xf32> to vector<16xf32>
    %105 = vector.shape_cast %104 : vector<16xf32> to vector<16x1xf32>
    %cst_38 = arith.constant 3.200000e+01 : f32
    %106 = vector.broadcast %cst_38 : f32 to vector<16x1xf32>
    %107 = arith.divf %105, %106 : vector<16x1xf32>
    %cst_39 = arith.constant 9.99999974E-6 : f32
    %108 = vector.broadcast %cst_39 : f32 to vector<16x1xf32>
    %109 = arith.addf %107, %108 : vector<16x1xf32>
    %110 = math.rsqrt %109 : vector<16x1xf32>
    %111 = vector.broadcast %110 : vector<16x1xf32> to vector<16x32xf32>
    %112 = arith.mulf %102, %111 : vector<16x32xf32>
    %113 = vector.broadcast %7 : vector<1x32xf32> to vector<16x32xf32>
    %114 = arith.mulf %112, %113 : vector<16x32xf32>
    %115 = vector.broadcast %8 : vector<1x32xf32> to vector<16x32xf32>
    %116 = arith.addf %114, %115 : vector<16x32xf32>
    %117 = vector.shape_cast %116 : vector<16x32xf32> to vector<2x8x32xf32>
    %118 = vector.extract_strided_slice %117 {offsets = [0, 7, 0], sizes = [2, 1, 32], strides = [1, 1, 1]} : vector<2x8x32xf32> to vector<2x1x32xf32>
    %119 = vector.shape_cast %118 : vector<2x1x32xf32> to vector<2x32xf32>
    %cst_40 = arith.constant dense<0.000000e+00> : vector<1x2xf32>
    %120 = tpu.matmul %9, %119, %cst_40 {dimension_numbers = #tpu.dot_dimension_numbers<[1], [1], [0], [0], [0, 0, 1, 0], [], []>} : vector<1x32xf32>, vector<2x32xf32>, vector<1x2xf32> -> vector<1x2xf32>
    %121 = vector.broadcast %10 : vector<1x1xf32> to vector<1x2xf32>
    %122 = arith.addf %120, %121 : vector<1x2xf32>
    %c0_41 = arith.constant 0 : index
    %c0_42 = arith.constant 0 : index
    %c0_43 = arith.constant 0 : index
    %123 = vector.load %arg9[%c0_41, %c0_42, %c0_43] : memref<1x1x2xf32, #tpu.memory_space<vmem>>, vector<1x1x2xf32>
    %124 = vector.shape_cast %123 : vector<1x1x2xf32> to vector<1x2xf32>
    %125 = vector.shape_cast %122 : vector<1x2xf32> to vector<1x1x2xf32>
    tpu.vector_store %arg9[%c0_41, %c0_42, %c0_43], %125 {strides = array<i32>} : memref<1x1x2xf32, #tpu.memory_space<vmem>>, vector<1x1x2xf32>,
    return
  }
  func.func @transform_0(%arg0: i32) -> (i32, i32) {
    %c0_i32 = arith.constant 0 : i32
    %c0_i32_0 = arith.constant 0 : i32
    return %arg0, %c0_i32 : i32, i32
  }
  func.func @transform_1(%arg0: i32) -> (i32, i32) {
    %c0_i32 = arith.constant 0 : i32
    %c0_i32_0 = arith.constant 0 : i32
    %c0_i32_1 = arith.constant 0 : i32
    return %c0_i32, %c0_i32_0 : i32, i32
  }
  func.func @transform_2(%arg0: i32) -> (i32, i32) {
    %c0_i32 = arith.constant 0 : i32
    %c0_i32_0 = arith.constant 0 : i32
    %c0_i32_1 = arith.constant 0 : i32
    return %c0_i32, %c0_i32_0 : i32, i32
  }
  func.func @transform_3(%arg0: i32) -> (i32, i32) {
    %c0_i32 = arith.constant 0 : i32
    %c0_i32_0 = arith.constant 0 : i32
    %c0_i32_1 = arith.constant 0 : i32
    return %c0_i32, %c0_i32_0 : i32, i32
  }
  func.func @transform_4(%arg0: i32) -> (i32, i32) {
    %c0_i32 = arith.constant 0 : i32
    %c0_i32_0 = arith.constant 0 : i32
    %c0_i32_1 = arith.constant 0 : i32
    return %c0_i32, %c0_i32_0 : i32, i32
  }
  func.func @transform_5(%arg0: i32) -> (i32, i32) {
    %c0_i32 = arith.constant 0 : i32
    %c0_i32_0 = arith.constant 0 : i32
    %c0_i32_1 = arith.constant 0 : i32
    return %c0_i32, %c0_i32_0 : i32, i32
  }
  func.func @transform_6(%arg0: i32) -> (i32, i32) {
    %c0_i32 = arith.constant 0 : i32
    %c0_i32_0 = arith.constant 0 : i32
    %c0_i32_1 = arith.constant 0 : i32
    return %c0_i32, %c0_i32_0 : i32, i32
  }
  func.func @transform_7(%arg0: i32) -> (i32, i32) {
    %c0_i32 = arith.constant 0 : i32
    %c0_i32_0 = arith.constant 0 : i32
    %c0_i32_1 = arith.constant 0 : i32
    return %c0_i32, %c0_i32_0 : i32, i32
  }
  func.func @transform_8(%arg0: i32) -> (i32, i32, i32) {
    %c0_i32 = arith.constant 0 : i32
    %c0_i32_0 = arith.constant 0 : i32
    %c0_i32_1 = arith.constant 0 : i32
    return %arg0, %c0_i32, %c0_i32_0 : i32, i32, i32
  }
}

module attributes {stable_mosaic.version = 11 : i64} {
  func.func @_model_kernel(%arg0: i32, %arg1: memref<16x1xf32, #tpu.memory_space<vmem>>, %arg2: memref<16x32xf32, #tpu.memory_space<vmem>>, %arg3: memref<16x128xf32, #tpu.memory_space<vmem>>, %arg4: memref<32x96xf32, #tpu.memory_space<vmem>>, %arg5: memref<32x32xf32, #tpu.memory_space<vmem>>, %arg6: memref<32x2048xf32, #tpu.memory_space<vmem>>, %arg7: memref<1x2048xf32, #tpu.memory_space<vmem>>, %arg8: memref<2048x32xf32, #tpu.memory_space<vmem>>, %arg9: memref<1x1x2xf32, #tpu.memory_space<vmem>>) attributes {dimension_semantics = [#tpu.dimension_semantics<parallel>], iteration_bounds = array<i64: 2>, scalar_prefetch = 0 : i64, scratch_operands = 0 : i64, tpu.core_type = #tpu.core_type<tc>, window_params = [{transform_indices = @transform_0, window_bounds = array<i64: 16, 1>}, {pipeline_mode = #tpu.pipeline_mode<synchronous>, transform_indices = @transform_1, window_bounds = array<i64: 16, 32>}, {pipeline_mode = #tpu.pipeline_mode<synchronous>, transform_indices = @transform_2, window_bounds = array<i64: 16, 128>}, {pipeline_mode = #tpu.pipeline_mode<synchronous>, transform_indices = @transform_3, window_bounds = array<i64: 32, 96>}, {pipeline_mode = #tpu.pipeline_mode<synchronous>, transform_indices = @transform_4, window_bounds = array<i64: 32, 32>}, {pipeline_mode = #tpu.pipeline_mode<synchronous>, transform_indices = @transform_5, window_bounds = array<i64: 32, 2048>}, {pipeline_mode = #tpu.pipeline_mode<synchronous>, transform_indices = @transform_6, window_bounds = array<i64: 1, 2048>}, {pipeline_mode = #tpu.pipeline_mode<synchronous>, transform_indices = @transform_7, window_bounds = array<i64: 2048, 32>}, {transform_indices = @transform_8, window_bounds = array<i64: 1, 1, 2>}]} {
    %c0 = arith.constant 0 : index
    %c0_0 = arith.constant 0 : index
    %0 = vector.load %arg3[%c0, %c0_0] : memref<16x128xf32, #tpu.memory_space<vmem>>, vector<16x128xf32>
    %1 = vector.extract_strided_slice %0 {offsets = [0, 0], sizes = [1, 32], strides = [1, 1]} : vector<16x128xf32> to vector<1x32xf32>
    %2 = vector.extract_strided_slice %0 {offsets = [1, 0], sizes = [1, 96], strides = [1, 1]} : vector<16x128xf32> to vector<1x96xf32>
    %3 = vector.extract_strided_slice %0 {offsets = [2, 0], sizes = [1, 32], strides = [1, 1]} : vector<16x128xf32> to vector<1x32xf32>
    %4 = vector.extract_strided_slice %0 {offsets = [3, 0], sizes = [1, 32], strides = [1, 1]} : vector<16x128xf32> to vector<1x32xf32>
    %5 = vector.extract_strided_slice %0 {offsets = [4, 0], sizes = [1, 32], strides = [1, 1]} : vector<16x128xf32> to vector<1x32xf32>
    %6 = vector.extract_strided_slice %0 {offsets = [5, 0], sizes = [1, 32], strides = [1, 1]} : vector<16x128xf32> to vector<1x32xf32>
    %7 = vector.extract_strided_slice %0 {offsets = [6, 0], sizes = [1, 32], strides = [1, 1]} : vector<16x128xf32> to vector<1x32xf32>
    %8 = vector.extract_strided_slice %0 {offsets = [7, 0], sizes = [1, 32], strides = [1, 1]} : vector<16x128xf32> to vector<1x32xf32>
    %9 = vector.extract_strided_slice %0 {offsets = [8, 0], sizes = [1, 32], strides = [1, 1]} : vector<16x128xf32> to vector<1x32xf32>
    %10 = vector.extract_strided_slice %0 {offsets = [9, 0], sizes = [1, 1], strides = [1, 1]} : vector<16x128xf32> to vector<1x1xf32>
    %c0_1 = arith.constant 0 : index
    %c0_2 = arith.constant 0 : index
    %11 = vector.load %arg1[%c0_1, %c0_2] : memref<16x1xf32, #tpu.memory_space<vmem>>, vector<16x1xf32>
    %12 = vector.broadcast %11 : vector<16x1xf32> to vector<16x32xf32>
    %13 = vector.broadcast %1 : vector<1x32xf32> to vector<16x32xf32>
    %14 = arith.mulf %12, %13 : vector<16x32xf32>
    %c0_3 = arith.constant 0 : index
    %c0_4 = arith.constant 0 : index
    %15 = vector.load %arg2[%c0_3, %c0_4] : memref<16x32xf32, #tpu.memory_space<vmem>>, vector<16x32xf32>
    %16 = arith.addf %14, %15 : vector<16x32xf32>
    %c0_5 = arith.constant 0 : index
    %c0_6 = arith.constant 0 : index
    %17 = vector.load %arg4[%c0_5, %c0_6] : memref<32x96xf32, #tpu.memory_space<vmem>>, vector<32x96xf32>
    %cst = arith.constant dense<0.000000e+00> : vector<16x96xf32>
    %18 = tpu.matmul %16, %17, %cst {dimension_numbers = #tpu.dot_dimension_numbers<[1], [0], [0], [1], [0, 0, 1, 1], [], []>} : vector<16x32xf32>, vector<32x96xf32>, vector<16x96xf32> -> vector<16x96xf32>
    %19 = vector.broadcast %2 : vector<1x96xf32> to vector<16x96xf32>
    %20 = arith.addf %18, %19 : vector<16x96xf32>
    %21 = vector.shape_cast %20 : vector<16x96xf32> to vector<2x8x96xf32>
    %c0_7 = arith.constant 0 : index
    %c0_8 = arith.constant 0 : index
    %22 = vector.load %arg5[%c0_7, %c0_8] : memref<32x32xf32, #tpu.memory_space<vmem>>, vector<32x32xf32>
    %23 = vector.extract_strided_slice %21 {offsets = [0, 0, 0], sizes = [2, 8, 16], strides = [1, 1, 1]} : vector<2x8x96xf32> to vector<2x8x16xf32>
    %24 = vector.extract_strided_slice %21 {offsets = [0, 0, 32], sizes = [2, 8, 16], strides = [1, 1, 1]} : vector<2x8x96xf32> to vector<2x8x16xf32>
    %25 = vector.extract_strided_slice %21 {offsets = [0, 0, 64], sizes = [2, 8, 16], strides = [1, 1, 1]} : vector<2x8x96xf32> to vector<2x8x16xf32>
    "tpu.trace_start"() <{level = 10 : i32, message = "bqd,bkd->bqk"}> : () -> ()
    %cst_9 = arith.constant dense<0.000000e+00> : vector<2x8x8xf32>
    %26 = tpu.matmul %23, %24, %cst_9 {dimension_numbers = #tpu.dot_dimension_numbers<[2], [2], [1], [1], [0, 0, 0, 1, 1, 1], [0], [0]>} : vector<2x8x16xf32>, vector<2x8x16xf32>, vector<2x8x8xf32> -> vector<2x8x8xf32>
    "tpu.trace_stop"() : () -> ()
    %cst_10 = arith.constant 2.500000e-01 : f32
    %27 = vector.broadcast %cst_10 : f32 to vector<2x8x8xf32>
    %28 = arith.mulf %26, %27 : vector<2x8x8xf32>
    %cst_11 = arith.constant dense<0xFF800000> : vector<2x8xf32>
    %29 = vector.multi_reduction <maximumf>, %28, %cst_11 [2] : vector<2x8x8xf32> to vector<2x8xf32>
    %30 = vector.shape_cast %29 : vector<2x8xf32> to vector<2x8x1xf32>
    %31 = vector.broadcast %30 : vector<2x8x1xf32> to vector<2x8x8xf32>
    %32 = arith.subf %28, %31 : vector<2x8x8xf32>
    %33 = math.exp %32 : vector<2x8x8xf32>
    %cst_12 = arith.constant dense<0.000000e+00> : vector<2x8xf32>
    %34 = vector.multi_reduction <add>, %33, %cst_12 [2] : vector<2x8x8xf32> to vector<2x8xf32>
    %35 = vector.shape_cast %34 : vector<2x8xf32> to vector<2x8x1xf32>
    %36 = vector.broadcast %35 : vector<2x8x1xf32> to vector<2x8x8xf32>
    %37 = arith.divf %33, %36 : vector<2x8x8xf32>
    "tpu.trace_start"() <{level = 10 : i32, message = "bqk,bkd->bqd"}> : () -> ()
    %cst_13 = arith.constant dense<0.000000e+00> : vector<2x8x16xf32>
    %38 = tpu.matmul %37, %25, %cst_13 {dimension_numbers = #tpu.dot_dimension_numbers<[2], [1], [1], [2], [0, 0, 0, 1, 1, 2], [0], [0]>} : vector<2x8x8xf32>, vector<2x8x16xf32>, vector<2x8x16xf32> -> vector<2x8x16xf32>
    "tpu.trace_stop"() : () -> ()
    %39 = vector.shape_cast %38 : vector<2x8x16xf32> to vector<16x16xf32>
    %40 = vector.extract_strided_slice %22 {offsets = [0, 0], sizes = [16, 32], strides = [1, 1]} : vector<32x32xf32> to vector<16x32xf32>
    %cst_14 = arith.constant dense<0.000000e+00> : vector<16x32xf32>
    %41 = tpu.matmul %39, %40, %cst_14 {dimension_numbers = #tpu.dot_dimension_numbers<[1], [0], [0], [1], [0, 0, 1, 1], [], []>} : vector<16x16xf32>, vector<16x32xf32>, vector<16x32xf32> -> vector<16x32xf32>
    %42 = vector.extract_strided_slice %21 {offsets = [0, 0, 16], sizes = [2, 8, 16], strides = [1, 1, 1]} : vector<2x8x96xf32> to vector<2x8x16xf32>
    %43 = vector.extract_strided_slice %21 {offsets = [0, 0, 48], sizes = [2, 8, 16], strides = [1, 1, 1]} : vector<2x8x96xf32> to vector<2x8x16xf32>
    %44 = vector.extract_strided_slice %21 {offsets = [0, 0, 80], sizes = [2, 8, 16], strides = [1, 1, 1]} : vector<2x8x96xf32> to vector<2x8x16xf32>
    "tpu.trace_start"() <{level = 10 : i32, message = "bqd,bkd->bqk"}> : () -> ()
    %cst_15 = arith.constant dense<0.000000e+00> : vector<2x8x8xf32>
    %45 = tpu.matmul %42, %43, %cst_15 {dimension_numbers = #tpu.dot_dimension_numbers<[2], [2], [1], [1], [0, 0, 0, 1, 1, 1], [0], [0]>} : vector<2x8x16xf32>, vector<2x8x16xf32>, vector<2x8x8xf32> -> vector<2x8x8xf32>
    "tpu.trace_stop"() : () -> ()
    %cst_16 = arith.constant 2.500000e-01 : f32
    %46 = vector.broadcast %cst_16 : f32 to vector<2x8x8xf32>
    %47 = arith.mulf %45, %46 : vector<2x8x8xf32>
    %cst_17 = arith.constant dense<0xFF800000> : vector<2x8xf32>
    %48 = vector.multi_reduction <maximumf>, %47, %cst_17 [2] : vector<2x8x8xf32> to vector<2x8xf32>
    %49 = vector.shape_cast %48 : vector<2x8xf32> to vector<2x8x1xf32>
    %50 = vector.broadcast %49 : vector<2x8x1xf32> to vector<2x8x8xf32>
    %51 = arith.subf %47, %50 : vector<2x8x8xf32>
    %52 = math.exp %51 : vector<2x8x8xf32>
    %cst_18 = arith.constant dense<0.000000e+00> : vector<2x8xf32>
    %53 = vector.multi_reduction <add>, %52, %cst_18 [2] : vector<2x8x8xf32> to vector<2x8xf32>
    %54 = vector.shape_cast %53 : vector<2x8xf32> to vector<2x8x1xf32>
    %55 = vector.broadcast %54 : vector<2x8x1xf32> to vector<2x8x8xf32>
    %56 = arith.divf %52, %55 : vector<2x8x8xf32>
    "tpu.trace_start"() <{level = 10 : i32, message = "bqk,bkd->bqd"}> : () -> ()
    %cst_19 = arith.constant dense<0.000000e+00> : vector<2x8x16xf32>
    %57 = tpu.matmul %56, %44, %cst_19 {dimension_numbers = #tpu.dot_dimension_numbers<[2], [1], [1], [2], [0, 0, 0, 1, 1, 2], [0], [0]>} : vector<2x8x8xf32>, vector<2x8x16xf32>, vector<2x8x16xf32> -> vector<2x8x16xf32>
    "tpu.trace_stop"() : () -> ()
    %58 = vector.shape_cast %57 : vector<2x8x16xf32> to vector<16x16xf32>
    %59 = vector.extract_strided_slice %22 {offsets = [16, 0], sizes = [16, 32], strides = [1, 1]} : vector<32x32xf32> to vector<16x32xf32>
    %cst_20 = arith.constant dense<0.000000e+00> : vector<16x32xf32>
    %60 = tpu.matmul %58, %59, %cst_20 {dimension_numbers = #tpu.dot_dimension_numbers<[1], [0], [0], [1], [0, 0, 1, 1], [], []>} : vector<16x16xf32>, vector<16x32xf32>, vector<16x32xf32> -> vector<16x32xf32>
    %61 = arith.addf %41, %60 : vector<16x32xf32>
    %62 = vector.broadcast %3 : vector<1x32xf32> to vector<16x32xf32>
    %63 = arith.addf %61, %62 : vector<16x32xf32>
    %64 = arith.addf %16, %63 : vector<16x32xf32>
    %cst_21 = arith.constant dense<0.000000e+00> : vector<16xf32>
    %65 = vector.multi_reduction <add>, %64, %cst_21 [1] : vector<16x32xf32> to vector<16xf32>
    %66 = vector.shape_cast %65 : vector<16xf32> to vector<16x1xf32>
    %cst_22 = arith.constant 3.200000e+01 : f32
    %67 = vector.broadcast %cst_22 : f32 to vector<16x1xf32>
    %68 = arith.divf %66, %67 : vector<16x1xf32>
    %69 = vector.broadcast %68 : vector<16x1xf32> to vector<16x32xf32>
    %70 = arith.subf %64, %69 : vector<16x32xf32>
    %71 = arith.mulf %70, %70 : vector<16x32xf32>
    %cst_23 = arith.constant dense<0.000000e+00> : vector<16xf32>
    %72 = vector.multi_reduction <add>, %71, %cst_23 [1] : vector<16x32xf32> to vector<16xf32>
    %73 = vector.shape_cast %72 : vector<16xf32> to vector<16x1xf32>
    %cst_24 = arith.constant 3.200000e+01 : f32
    %74 = vector.broadcast %cst_24 : f32 to vector<16x1xf32>
    %75 = arith.divf %73, %74 : vector<16x1xf32>
    %cst_25 = arith.constant 9.99999974E-6 : f32
    %76 = vector.broadcast %cst_25 : f32 to vector<16x1xf32>
    %77 = arith.addf %75, %76 : vector<16x1xf32>
    %78 = math.rsqrt %77 : vector<16x1xf32>
    %79 = vector.broadcast %78 : vector<16x1xf32> to vector<16x32xf32>
    %80 = arith.mulf %70, %79 : vector<16x32xf32>
    %81 = vector.broadcast %4 : vector<1x32xf32> to vector<16x32xf32>
    %82 = arith.mulf %80, %81 : vector<16x32xf32>
    %83 = vector.broadcast %5 : vector<1x32xf32> to vector<16x32xf32>
    %84 = arith.addf %82, %83 : vector<16x32xf32>
    %c0_26 = arith.constant 0 : index
    %c0_27 = arith.constant 0 : index
    %85 = vector.load %arg6[%c0_26, %c0_27] : memref<32x2048xf32, #tpu.memory_space<vmem>>, vector<32x2048xf32>
    %cst_28 = arith.constant dense<0.000000e+00> : vector<16x2048xf32>
    %86 = tpu.matmul %84, %85, %cst_28 {dimension_numbers = #tpu.dot_dimension_numbers<[1], [0], [0], [1], [0, 0, 1, 1], [], []>} : vector<16x32xf32>, vector<32x2048xf32>, vector<16x2048xf32> -> vector<16x2048xf32>
    %c0_29 = arith.constant 0 : index
    %c0_30 = arith.constant 0 : index
    %87 = vector.load %arg7[%c0_29, %c0_30] : memref<1x2048xf32, #tpu.memory_space<vmem>>, vector<1x2048xf32>
    %88 = vector.broadcast %87 : vector<1x2048xf32> to vector<16x2048xf32>
    %89 = arith.addf %86, %88 : vector<16x2048xf32>
    %cst_31 = arith.constant 0.000000e+00 : f32
    %90 = vector.broadcast %cst_31 : f32 to vector<16x2048xf32>
    %91 = arith.maximumf %89, %90 : vector<16x2048xf32>
    %c0_32 = arith.constant 0 : index
    %c0_33 = arith.constant 0 : index
    %92 = vector.load %arg8[%c0_32, %c0_33] : memref<2048x32xf32, #tpu.memory_space<vmem>>, vector<2048x32xf32>
    %cst_34 = arith.constant dense<0.000000e+00> : vector<16x32xf32>
    %93 = tpu.matmul %91, %92, %cst_34 {dimension_numbers = #tpu.dot_dimension_numbers<[1], [0], [0], [1], [0, 0, 1, 1], [], []>} : vector<16x2048xf32>, vector<2048x32xf32>, vector<16x32xf32> -> vector<16x32xf32>
    %94 = vector.broadcast %6 : vector<1x32xf32> to vector<16x32xf32>
    %95 = arith.addf %93, %94 : vector<16x32xf32>
    %96 = arith.addf %84, %95 : vector<16x32xf32>
    %cst_35 = arith.constant dense<0.000000e+00> : vector<16xf32>
    %97 = vector.multi_reduction <add>, %96, %cst_35 [1] : vector<16x32xf32> to vector<16xf32>
    %98 = vector.shape_cast %97 : vector<16xf32> to vector<16x1xf32>
    %cst_36 = arith.constant 3.200000e+01 : f32
    %99 = vector.broadcast %cst_36 : f32 to vector<16x1xf32>
    %100 = arith.divf %98, %99 : vector<16x1xf32>
    %101 = vector.broadcast %100 : vector<16x1xf32> to vector<16x32xf32>
    %102 = arith.subf %96, %101 : vector<16x32xf32>
    %103 = arith.mulf %102, %102 : vector<16x32xf32>
    %cst_37 = arith.constant dense<0.000000e+00> : vector<16xf32>
    %104 = vector.multi_reduction <add>, %103, %cst_37 [1] : vector<16x32xf32> to vector<16xf32>
    %105 = vector.shape_cast %104 : vector<16xf32> to vector<16x1xf32>
    %cst_38 = arith.constant 3.200000e+01 : f32
    %106 = vector.broadcast %cst_38 : f32 to vector<16x1xf32>
    %107 = arith.divf %105, %106 : vector<16x1xf32>
    %cst_39 = arith.constant 9.99999974E-6 : f32
    %108 = vector.broadcast %cst_39 : f32 to vector<16x1xf32>
    %109 = arith.addf %107, %108 : vector<16x1xf32>
    %110 = math.rsqrt %109 : vector<16x1xf32>
    %111 = vector.broadcast %110 : vector<16x1xf32> to vector<16x32xf32>
    %112 = arith.mulf %102, %111 : vector<16x32xf32>
    %113 = vector.broadcast %7 : vector<1x32xf32> to vector<16x32xf32>
    %114 = arith.mulf %112, %113 : vector<16x32xf32>
    %115 = vector.broadcast %8 : vector<1x32xf32> to vector<16x32xf32>
    %116 = arith.addf %114, %115 : vector<16x32xf32>
    %117 = vector.shape_cast %116 : vector<16x32xf32> to vector<2x8x32xf32>
    %118 = vector.extract_strided_slice %117 {offsets = [0, 7, 0], sizes = [2, 1, 32], strides = [1, 1, 1]} : vector<2x8x32xf32> to vector<2x1x32xf32>
    %119 = vector.shape_cast %118 : vector<2x1x32xf32> to vector<2x32xf32>
    %cst_40 = arith.constant dense<0.000000e+00> : vector<1x2xf32>
    %120 = tpu.matmul %9, %119, %cst_40 {dimension_numbers = #tpu.dot_dimension_numbers<[1], [1], [0], [0], [0, 0, 1, 0], [], []>} : vector<1x32xf32>, vector<2x32xf32>, vector<1x2xf32> -> vector<1x2xf32>
    %121 = vector.broadcast %10 : vector<1x1xf32> to vector<1x2xf32>
    %122 = arith.addf %120, %121 : vector<1x2xf32>
    %c0_41 = arith.constant 0 : index
    %c0_42 = arith.constant 0 : index
    %c0_43 = arith.constant 0 : index
    %123 = vector.load %arg9[%c0_41, %c0_42, %c0_43] : memref<1x1x2xf32, #tpu.memory_space<vmem>>, vector<1x1x2xf32>
    %124 = vector.shape_cast %123 : vector<1x1x2xf32> to vector<1x2xf32>
    %125 = vector.shape_cast %122 : vector<1x2xf32> to vector<1x1x2xf32>
    tpu.vector_store %arg9[%c0_41, %c0_42, %c0_43], %125 {strides = array<i32>} : memref<1x1x2xf32, #tpu.memory_space<vmem>>, vector<1x1x2xf32>,
    return
  }
  func.func @transform_0(%arg0: i32) -> (i32, i32) {
    %c0_i32 = arith.constant 0 : i32
    %c0_i32_0 = arith.constant 0 : i32
    return %arg0, %c0_i32 : i32, i32
  }
  func.func @transform_1(%arg0: i32) -> (i32, i32) {
    %c0_i32 = arith.constant 0 : i32
    %c0_i32_0 = arith.constant 0 : i32
    %c0_i32_1 = arith.constant 0 : i32
    return %c0_i32, %c0_i32_0 : i32, i32
  }
  func.func @transform_2(%arg0: i32) -> (i32, i32) {
    %c0_i32 = arith.constant 0 : i32
    %c0_i32_0 = arith.constant 0 : i32
    %c0_i32_1 = arith.constant 0 : i32
    return %c0_i32, %c0_i32_0 : i32, i32
  }
  func.func @transform_3(%arg0: i32) -> (i32, i32) {
    %c0_i32 = arith.constant 0 : i32
    %c0_i32_0 = arith.constant 0 : i32
    %c0_i32_1 = arith.constant 0 : i32
    return %c0_i32, %c0_i32_0 : i32, i32
  }
  func.func @transform_4(%arg0: i32) -> (i32, i32) {
    %c0_i32 = arith.constant 0 : i32
    %c0_i32_0 = arith.constant 0 : i32
    %c0_i32_1 = arith.constant 0 : i32
    return %c0_i32, %c0_i32_0 : i32, i32
  }
  func.func @transform_5(%arg0: i32) -> (i32, i32) {
    %c0_i32 = arith.constant 0 : i32
    %c0_i32_0 = arith.constant 0 : i32
    %c0_i32_1 = arith.constant 0 : i32
    return %c0_i32, %c0_i32_0 : i32, i32
  }
  func.func @transform_6(%arg0: i32) -> (i32, i32) {
    %c0_i32 = arith.constant 0 : i32
    %c0_i32_0 = arith.constant 0 : i32
    %c0_i32_1 = arith.constant 0 : i32
    return %c0_i32, %c0_i32_0 : i32, i32
  }
  func.func @transform_7(%arg0: i32) -> (i32, i32) {
    %c0_i32 = arith.constant 0 : i32
    %c0_i32_0 = arith.constant 0 : i32
    %c0_i32_1 = arith.constant 0 : i32
    return %c0_i32, %c0_i32_0 : i32, i32
  }
  func.func @transform_8(%arg0: i32) -> (i32, i32, i32) {
    %c0_i32 = arith.constant 0 : i32
    %c0_i32_0 = arith.constant 0 : i32
    %c0_i32_1 = arith.constant 0 : i32
    return %arg0, %c0_i32, %c0_i32_0 : i32, i32, i32
  }
}

</mosaic_0001>

<bundles_post_ra>
// kernel: tpu_custom_call.1
= control target key start
LH: loop header
LB: loop body
LE: loop exit
PB: predicated region body
PF: predicated region fallthrough
CT: control target
= control target key end

     0   :  { %13 = vsyncpa [#allocation3], 0  ;;  %s5558_s0 = inlined_call_operand.vmem [shape: f32[32,1], index: 0, kind: input, shape index: {}]   ;;  %s5559_s1 = inlined_call_operand.vmem [shape: f32[16,32], index: 1, kind: input, shape index: {}]   ;;  %s5560_s2 = inlined_call_operand.vmem [shape: f32[16,128], index: 2, kind: input, shape index: {}]   ;;  %s5561_s3 = inlined_call_operand.vmem [shape: f32[32,96], index: 3, kind: input, shape index: {}]   ;;  %s5562_s4 = inlined_call_operand.vmem [shape: f32[32,32], index: 4, kind: input, shape index: {}]   ;;  %s5563_s5 = inlined_call_operand.vmem [shape: f32[32,2048], index: 5, kind: input, shape index: {}]   ;;  %s5564_s6 = inlined_call_operand.vmem [shape: f32[1,2048], index: 6, kind: input, shape index: {}]   ;;  %s5565_s7 = inlined_call_operand.vmem [shape: f32[2048,32], index: 7, kind: input, shape index: {}]   ;;  %s5566_s8 = inlined_call_operand.hbm [shape: f32[2,1,2], index: 8, kind: output, shape index: {}]  }
   0x1   :  { %15 = vsyncpa [#allocation3 + $0x1], 0  ;;  %s4135_s27 = smov 0   ;;  %s4137_s28 = smov 0  }
   0x2   :  { %s4139_s29 = smov 0   ;;  %s4141_s30 = smov 0  }
   0x3 LB: > { %s4156_s9 = sadd.s32 4294967295, %s4079_s30   ;;  %s3154_s10 = sadd.s32 4294967294, %s4079_s30   ;;  %s4079_s30 = sphi %s4141_s30, %s5572_s30   ;;  %s4075_s29 = sphi %s4139_s29, %s5571_s29   ;;  %s4071_s28 = sphi %s4137_s28, %s5570_s28   ;;  %s4067_s27 = sphi %s4135_s27, %s5569_s27  }
   0x4   : > { %s4160_s11 = sadd.s32 1, %s4079_s30   ;;  %s201_s12 = sadd.s32 1, %s4075_s29 }
   0x5   : > { %s198_s13 = ssub.s32 %s4079_s30, %s4160_s11  ;;  %p211_p0 = scmp.ne.s32.totalorder %s4075_s29, %s4071_s28 }
   0x6   : > { %p199_p1 = scmp.eq.s32.totalorder %s198_s13, 0  ;;  %p212_p2 = scmp.eq.s32.totalorder %s4156_s9, 1 }
   0x7   : > { %p217_p3 = scmp.ne.s32.totalorder %s4071_s28, %s4067_s27  ;;  %p218_p4 = scmp.eq.s32.totalorder %s3154_s10, 1 }
   0x8   : > { %s4171_s14 = scalar_select %p199_p1, %s4075_s29, %s201_s12  }
   0x9   : > { %p4173_p5 = por %p212_p2, %p211_p0  ;;  %p4177_p6 = por %p218_p4, %p217_p3 }
   0xa   : > { %p3157_p7 = scmp.ge.s32.totalorder %s4079_s30, 1  ;;  %p266_p8 = scmp.lt.s32.totalorder %s4079_s30, 3 }
   0xc   : > { %p267_p9 = pnand %p3157_p7, %p266_p8 }
   0xd   : > { %s3158_s17 = sshll.u32 (!%p267_p9), %s4156_s9, 1  ;;  %v4081_v0 = vmov (!%p267_p9), 0   ;;  %v329_v1 = vld [vmem:[%s5561_s3] sm:$0xff] (!%p267_p9)  ;;  %v330_v2 = vld [vmem:[%s5561_s3 + $0x8] sm:$0xff] (!%p267_p9)  ;;  %v331_v6 = vld [vmem:[%s5561_s3 + $0x10] sm:$0xff] (!%p267_p9)  ;;  %v319_v9 = vlaneseq (!%p267_p9)  ;;  %vm337_vm0 = vcmask (!%p267_p9), 261120  }
   0xe   : > { %270 = sbr.rel (%p267_p9) target bundleno = 3396 (0xd44), region = 52  ;;  %3990 = vset.pattern.permute.xlu0 (!%p267_p9), %v4081_v0  ;;  %p300_p10 = scmp.lt.s32.totalorder (!%p267_p9), %s3158_s17, 3  ;;  %3991 = vset.pattern.permute.xlu1 (!%p267_p9), %v4081_v0  ;;  %v3605_v3 = vpack.c.bf16 (!%p267_p9), %v330_v2, %v329_v1  ;;  %v332_v7 = vld [vmem:[%s5561_s3 + $0x18] sm:$0xff] (!%p267_p9)  ;;  %v4207_v12 = vld [vmem:[%s5560_s2] sm:$0xff] (!%p267_p9)  ;;  %v326_v18 = vld [vmem:[%s5559_s1 + $0x8] sm:$0xff] (!%p267_p9)  ;;  %v4082_v22 = vmov (!%p267_p9), 0.0  }
   0xf   : > { %v3609_v8 = vpack.c.bf16 (!%p267_p9), %v332_v7, %v331_v6  ;;  %v4199_v10 = vshrl.u32 (!%p267_p9), %v319_v9, 7  ;;  %v325_v15 = vld [vmem:[%s5559_s1] sm:$0xff] (!%p267_p9)  ;;  %3546 = vmatprep.subr.mxu1 (!%p267_p9), %v4082_v22  ;;  %vm4083_vm1 = vmmov (!%p267_p9), 0   ;;  %s4084_s23 = smov (!%p267_p9), 96   ;;  %vm426_vm2 = vcmask (!%p267_p9), 130048   ;;  %s4085_s24 = smov (!%p267_p9), 64  }
  0x10   : > { %3606 = vmatprep.subr.bf16.mxu0 (!%p267_p9), %v3605_v3  ;;  %3548 = vmatprep.mubr.msk.f32.mxu1 (!%p267_p9), %vm4083_vm1, %v4082_v22  ;;  %vm580_vm3 = vcmask (!%p267_p9), 64512   ;;  %s4087_s26 = smov (!%p267_p9), 112   ;;  %s4088_s10 = smov (!%p267_p9), 48   ;;  %vm3006_vm4 = vcmask (!%p267_p9), 1041409   ;;  %vm3084_vm5 = vcmask (!%p267_p9), 8192  }
  0x11   : > { %3608 = vmatpush3.bf16.msra.mxu0 (!%p267_p9), %v3605_v3  ;;  %v4202_v11 = vsub.s32 (!%p267_p9), 0, %v4199_v10  ;;  %v4232_v23 = vsub.s32 (!%p267_p9), 1, %v4199_v10  ;;  %s297_s21 = sand.u32 (!%p267_p9), 1, %s4071_s28   ;;  %s3196_s22 = sshll.u32 (!%p267_p9), %s4156_s9, 4 }
  0x12   : > { %3610 = vmatprep.subr.bf16.mxu0 (!%p267_p9), %v3609_v8  ;;  %s3087_s12 = scalar_lea.sflag (!%p267_p9), [#allocation3], %s297_s21  ;;  %s4089_s9 = smov (!%p267_p9), [#allocation2]  }
  0x13   : > { %v322_v13 = vrot.slane (!%p267_p9), %v4207_v12, %v4202_v11  ;;  %v336_v24 = vrot.slane (!%p267_p9), %v4207_v12, %v4232_v23 }
  0x15   : > { %s5574_s17 = smov (!%p300_p10, %s3158_s17), 3  ;;  %3612 = vmatpush3.bf16.msra.mxu0 %v3609_v8 }
  0x16   : > { %s3159_s18 = sshll.u32 %s5574_s17, 3  ;;  %3556 = vmatprep.subr.mxu0 %v4082_v22  ;;  %s4021_s17 = sshll.u32 %s4089_s9, 4  ;;  %s4022_s17 = int_to_ptr.vmem [resolvable:$false] %s4021_s17 }
  0x17   : > { %s303_s25 = scalar_lea.vmem %s5558_s0, %s3159_s18  ;;  %s4023_s18 = scalar_lea.vmem %s4022_s17, 32 }
  0x18   : > { %v307_v4 = vld [vmem:[%s303_s25] sm:$0xff]  ;;  %v308_v5 = vld [vmem:[%s303_s25 + $0x8] sm:$0xff]  ;;  %s4086_s25 = smov 80  }
  0x19   : > { %311 = vperm.xlu0 %3990, %v307_v4  }
  0x1d   : > { %316 = vperm.xlu0 %3990, %v308_v5  }
  0x98   : > { %v312_v14 = vpop.permute.xlu0 %311 }
  0x99   : > { %v323_v16 = vmul.f32 %v322_v13, %v312_v14 }
  0x9b   : > { %v4214_v17 = vadd.f32 %v325_v15, %v323_v16 }
  0x9c   : > { %v317_v19 = vpop.permute.xlu0 %316 }
  0x9d   : > { %v324_v20 = vmul.f32 %v322_v13, %v317_v19  ;;  %3543 = vmatprep.mubr.msk.f32.mxu0 %vm337_vm0, %v4214_v17 }
  0x9f   : > { %v4221_v21 = vadd.f32 %v326_v18, %v324_v20 }
  0xa1   : > { %3544 = vmatmul.mubr.msk.f32.vlgmr.msra.gmra.mrb[0].mxu0 %vm337_vm0, %v4221_v21 }
  0xa2   : > { %3558 = vmatprep.mubr.msk.f32.mxu0 %vm4083_vm1, %v4082_v22 }
 0x174   : > { %v3545_v25 = vpop.f32.mrb[0].mxu0 }
 0x175   : > { %v410_v26 = vpop.f32.mrb[1].mxu0  ;;  %v4239_v28 = vadd.f32 %v3545_v25, %v336_v24 }
 0x176   : > { %v4236_v27 = vadd.f32 %v410_v26, %v336_v24 }
 0x178   : > { %424 = vrot.lane.b32.xlu1 %v4236_v27, %s4084_s23 }
 0x17c   : > { %502 = vrot.lane.b32.xlu1 %v4239_v28, %s4084_s23  ;;  %s298_s23 = scalar_lea.vmem [#allocation2], %s297_s21 }
 0x1ea   : > { %v425_v29 = vpop.permute.xlu1 %424 }
 0x1eb   : > { %3547 = vmatpush3.xpose.msk.msra.mxu1 %vm426_vm2, %v425_v29 }
 0x1ec   : > { %3551 = vmatprep.subr.mxu1 %v4082_v22 }
 0x1ee   : > { %3549 = vmatmul.mubr.msk.f32.vlgmr.msra.gmra.mrb[0].mxu1 %vm426_vm2, %v4236_v27  ;;  %v503_v30 = vpop.permute.xlu1 %502 }
 0x1ef   : > { %3552 = vmatpush3.xpose.msk.msra.mxu1 %vm426_vm2, %v503_v30  ;;  %3553 = vmatprep.mubr.msk.f32.mxu1 %vm4083_vm1, %v4082_v22 }
 0x1f0   : > { %3561 = vmatprep.subr.mxu1 %v4082_v22 }
 0x1f2   : > { %3554 = vmatmul.mubr.msk.f32.vlgmr.msra.gmra.mrb[2].mxu1 %vm426_vm2, %v4239_v28 }
 0x1f3   : > { %3563 = vmatprep.mubr.msk.f32.mxu1 %vm4083_vm1, %v4082_v22 }
 0x2c1   : > { %v497_v31 = vpop.f32.mrb[0].mxu1 }
 0x2c2   : > { %v578_v32 = vmul.f32 0.25, %v497_v31  ;;  %v3550_v33 = vpop.f32.mrb[1].mxu1 }
 0x2c4   : > { %v581_v34 = vsel %vm580_vm3, %v578_v32, -inf }
 0x2c5   : > { %582 = vmax.xlane.f32.xlu0 %v581_v34  ;;  %v574_v35 = vpop.f32.mrb[2].mxu1 }
 0x2c6   : > { %v579_v36 = vmul.f32 0.25, %v574_v35  ;;  %v3555_v37 = vpop.f32.mrb[3].mxu1  ;;  %v422_v35 = vld [vmem:[%s5562_s4 + $0x18] sm:$0xff] }
 0x2c7   : > { %v419_v37 = vld [vmem:[%s5562_s4] sm:$0xff] }
 0x2c8   : > { %v584_v38 = vsel %vm580_vm3, %v579_v36, -inf }
 0x2c9   : > { %585 = vmax.xlane.f32.xlu1 %v584_v38  ;;  %v420_v38 = vld [vmem:[%s5562_s4 + $0x8] sm:$0xff] }
 0x2da   : > { %603 = vrot.lane.b32.xlu1 %v4236_v27, %s4085_s24 }
 0x2db   : > { %679 = vrot.lane.b32.xlu0 %v4239_v28, %s4085_s24  ;;  %s3099_s24 = sshll.u32 %s298_s23, 4  ;;  %s5518_s24 = int_to_ptr.vmem [resolvable:$true] %s3099_s24 }
 0x2dc   : > { %s4017_s13 = scalar_lea.vmem %s5518_s24, 16  ;;  %p4024_p0 = scmp.lt.s32.totalorder %s5518_s24, %s4022_s17 }
 0x2dd   : > { %p4018_p11 = scmp.ne.s32.totalorder %s5518_s24, %s4017_s13  ;;  %p4025_p1 = scmp.lt.s32.totalorder %s4023_s18, %s4017_s13 }
 0x2de   : > { %757 = vrot.lane.b32.xlu1 %v4236_v27, %s4086_s25 }
 0x2df   : > { %p4019_p12 = pnand %p4018_p11, %p4173_p5  ;;  %p4026_p2 = por %p4025_p1, %p4024_p0 }
 0x2e1   : > { %p4020_p13 = pneg %p4019_p12 }
 0x2e2   : > { %835 = vrot.lane.b32.xlu1 %v4239_v28, %s4086_s25 }
 0x2e3   : > { %p4027_p3 = pnand %p4026_p2, %p4020_p13 }
 0x2e6   : > { %833 = vrot.lane.b32.xlu1 %v4239_v28, %s4087_s26 }
 0x352   : > { %v583_v39 = vpop.xlane.xlu0 %582 }
 0x353   : > { %v587_v40 = vsub.f32 %v578_v32, %v583_v39  ;;  %v3617_v39 = vpack.c.bf16 %v420_v38, %v419_v37 }
 0x355   : > { %v589_v41 = vmul.f32 1.442695, %v587_v40 }
 0x356   : > { %v680_v42 = vpop.permute.xlu0 %679  ;;  %v586_v43 = vpop.xlane.xlu1 %585 }
 0x357   : > { %3992 = vpow2.f32 %v589_v41  ;;  %v588_v44 = vsub.f32 %v579_v36, %v586_v43  ;;  %3562 = vmatpush3.msra.mxu1 %v680_v42 }
 0x358   : > { %3571 = vmatprep.subr.mxu1 %v4082_v22 }
 0x359   : > { %v591_v45 = vmul.f32 1.442695, %v588_v44  ;;  %v4309_v44 = vsub.s32 2, %v4199_v10 }
 0x35a   : > { %v604_v46 = vpop.permute.xlu1 %603 }
 0x35b   : > { %3994 = vpow2.f32 %v591_v45  ;;  %3557 = vmatpush3.msra.mxu0 %v604_v46  ;;  %v1252_v45 = vrot.slane %v4207_v12, %v4309_v44 }
 0x35c   : > { %3566 = vmatprep.subr.mxu0 %v4082_v22 }
 0x35e   : > { %v758_v53 = vpop.permute.xlu1 %757 }
 0x361   : > { %v3993_v47 = vpop.eup %3992 }
 0x362   : > { %v593_v48 = vsel %vm580_vm3, %v3993_v47, 0.0  ;;  %v836_v57 = vpop.permute.xlu1 %835 }
 0x363   : > { %594 = vadd.xlane.f32.xlu0 %v593_v48 }
 0x365   : > { %v3995_v49 = vpop.eup %3994 }
 0x366   : > { %v596_v50 = vsel %vm580_vm3, %v3995_v49, 0.0  ;;  %v834_v60 = vpop.permute.xlu1 %833 }
 0x367   : > { %597 = vadd.xlane.f32.xlu0 %v596_v50 }
 0x37d   : > { %755 = vrot.lane.b32.xlu0 %v4236_v27, %s4087_s26 }
 0x3f0   : > { %v595_v51 = vpop.xlane.xlu0 %594 }
 0x3f1   : > { %3996 = vrcp.f32 %v595_v51 }
 0x3f4   : > { %v598_v52 = vpop.xlane.xlu0 %597 }
 0x3f5   : > { %3998 = vrcp.f32 %v598_v52 }
 0x3f8   : > { %v756_v59 = vpop.permute.xlu0 %755 }
 0x3fb   : > { %v3997_v54 = vpop.eup %3996 }
 0x3fc   : > { %v600_v55 = vmul.f32 %v3997_v54, %v3993_v47 }
 0x3fe   : > { %3559 = vmatmul.mubr.msk.f32.vlgmr.msra.gmra.mrb[2].mxu0 %vm580_vm3, %v600_v55 }
 0x3ff   : > { %v3999_v56 = vpop.eup %3998  ;;  %3567 = vmatpush3.xpose.msk.msra.mxu0 %vm426_vm2, %v758_v53  ;;  %3568 = vmatprep.mubr.msk.f32.mxu0 %vm4083_vm1, %v4082_v22 }
 0x400   : > { %v602_v58 = vmul.f32 %v3999_v56, %v3995_v49  ;;  %3576 = vmatprep.subr.mxu0 %v4082_v22 }
 0x402   : > { %3564 = vmatmul.mubr.msk.f32.vlgmr.msra.gmra.mrb[4].mxu1 %vm580_vm3, %v602_v58  ;;  %3569 = vmatmul.mubr.msk.f32.vlgmr.msra.gmra.mrb[4].mxu0 %vm426_vm2, %v756_v59 }
 0x403   : > { %3572 = vmatpush3.xpose.msk.msra.mxu1 %vm426_vm2, %v836_v57  ;;  %3573 = vmatprep.mubr.msk.f32.mxu1 %vm4083_vm1, %v4082_v22 }
 0x404   : > { %3581 = vmatprep.subr.mxu1 %v4082_v22  ;;  %3578 = vmatprep.mubr.msk.f32.mxu0 %vm4083_vm1, %v4082_v22 }
 0x406   : > { %3574 = vmatmul.mubr.msk.f32.vlgmr.msra.gmra.mrb[6].mxu1 %vm426_vm2, %v834_v60 }
 0x407   : > { %3583 = vmatprep.mubr.msk.f32.mxu1 %vm4083_vm1, %v4082_v22 }
 0x4d1   : > { %v675_v61 = vpop.f32.mrb[2].mxu0 }
 0x4d2   : > { %v3560_v62 = vpop.f32.mrb[3].mxu0 }
 0x4d3   : > { %v1297_v62 = vld [vmem:[%s5563_s5 + $0x8] sm:$0xff] }
 0x4d5   : > { %v751_v63 = vpop.f32.mrb[4].mxu1  ;;  %v829_v0 = vpop.f32.mrb[4].mxu0 }
 0x4d6   : > { %v911_v1 = vmul.f32 0.25, %v829_v0  ;;  %v3565_v2 = vpop.f32.mrb[5].mxu1  ;;  %v3570_v3 = vpop.f32.mrb[5].mxu0  ;;  %v1299_v0 = vld [vmem:[%s5563_s5 + $0x18] sm:$0xff] }
 0x4d7   : > { %v1315_v2 = vld [vmem:[%s5563_s5 + $0x98] sm:$0xff]  ;;  %v1296_v3 = vld [vmem:[%s5563_s5] sm:$0xff] }
 0x4d8   : > { %v913_v4 = vsel %vm580_vm3, %v911_v1, -inf }
 0x4d9   : > { %914 = vmax.xlane.f32.xlu0 %v913_v4  ;;  %v907_v5 = vpop.f32.mrb[6].mxu1  ;;  %v1312_v4 = vld [vmem:[%s5563_s5 + $0x80] sm:$0xff] }
 0x4da   : > { %v912_v6 = vmul.f32 0.25, %v907_v5  ;;  %v3575_v7 = vpop.f32.mrb[7].mxu1  ;;  %v3629_v5 = vpack.c.bf16 %v1315_v2, %v1299_v0  ;;  %v1305_v2 = vld [vmem:[%s5563_s5 + $0x48] sm:$0xff] }
 0x4db   : > { %v1298_v7 = vld [vmem:[%s5563_s5 + $0x10] sm:$0xff] }
 0x4dc   : > { %v916_v8 = vsel %vm580_vm3, %v912_v6, -inf }
 0x4dd   : > { %917 = vmax.xlane.f32.xlu1 %v916_v8  ;;  %v1314_v8 = vld [vmem:[%s5563_s5 + $0x90] sm:$0xff] }
 0x4ee   : > { %935 = vrot.lane.b32.xlu1 %v4236_v27, %s4088_s10 }
 0x566   : > { %v915_v9 = vpop.xlane.xlu0 %914 }
 0x567   : > { %v919_v13 = vsub.f32 %v911_v1, %v915_v9  ;;  %v3631_v9 = vpack.c.bf16 %v1314_v8, %v1298_v7  ;;  %v1304_v8 = vld [vmem:[%s5563_s5 + $0x40] sm:$0xff] }
 0x569   : > { %v921_v14 = vmul.f32 1.442695, %v919_v13  ;;  %v1329_v13 = vld [vmem:[%s5563_s5 + $0x108] sm:$0xff] }
 0x56a   : > { %v918_v15 = vpop.xlane.xlu1 %917 }
 0x56b   : > { %4000 = vpow2.f32 %v921_v14  ;;  %v920_v16 = vsub.f32 %v912_v6, %v918_v15  ;;  %v3623_v6 = vpack.c.bf16 %v1312_v4, %v1296_v3  ;;  %v1345_v14 = vld [vmem:[%s5563_s5 + $0x188] sm:$0xff]  ;;  %v1331_v15 = vld [vmem:[%s5563_s5 + $0x118] sm:$0xff] }
 0x56c   : > { %v1321_v3 = vld [vmem:[%s5563_s5 + $0xc8] sm:$0xff]  ;;  %v1307_v4 = vld [vmem:[%s5563_s5 + $0x58] sm:$0xff] }
 0x56d   : > { %v923_v18 = vmul.f32 1.442695, %v920_v16  ;;  %v3625_v16 = vpack.c.bf16 %v1345_v14, %v1329_v13  ;;  %v1320_v13 = vld [vmem:[%s5563_s5 + $0xc0] sm:$0xff]  ;;  %v1306_v14 = vld [vmem:[%s5563_s5 + $0x50] sm:$0xff] }
 0x56e   : > { %v936_v19 = vpop.permute.xlu1 %935 }
 0x56f   : > { %4002 = vpow2.f32 %v923_v18  ;;  %3577 = vmatpush3.msra.mxu0 %v936_v19  ;;  %v1347_v18 = vld [vmem:[%s5563_s5 + $0x198] sm:$0xff]  ;;  %v1328_v19 = vld [vmem:[%s5563_s5 + $0x100] sm:$0xff] }
 0x575   : > { %v4001_v20 = vpop.eup %4000 }
 0x576   : > { %v925_v24 = vsel %vm580_vm3, %v4001_v20, 0.0 }
 0x577   : > { %926 = vadd.xlane.f32.xlu0 %v925_v24  ;;  %v3633_v24 = vpack.c.bf16 %v1347_v18, %v1331_v15  ;;  %v1322_v15 = vld [vmem:[%s5563_s5 + $0xd0] sm:$0xff] }
 0x579   : > { %v4003_v25 = vpop.eup %4002 }
 0x57a   : > { %v928_v26 = vsel %vm580_vm3, %v4003_v25, 0.0 }
 0x57b   : > { %929 = vadd.xlane.f32.xlu0 %v928_v26  ;;  %v1330_v26 = vld [vmem:[%s5563_s5 + $0x110] sm:$0xff] }
 0x591   : > { %1011 = vrot.lane.b32.xlu0 %v4239_v28, %s4088_s10  ;;  %v421_v28 = vld [vmem:[%s5562_s4 + $0x10] sm:$0xff]  ;;  %s5516_s10 = scalar_lea.hbm %s5566_s8, %s3196_s22 }
 0x592   : > { %v3613_v36 = vpack.c.bf16 %v422_v35, %v421_v28 }
 0x594   : > { %3614 = vmatprep.subr.bf16.mxu0 %v3613_v36 }
 0x604   : > { %v927_v27 = vpop.xlane.xlu0 %926 }
 0x605   : > { %4004 = vrcp.f32 %v927_v27  ;;  %v1346_v27 = vld [vmem:[%s5563_s5 + $0x190] sm:$0xff] }
 0x608   : > { %v930_v29 = vpop.xlane.xlu0 %929 }
 0x609   : > { %4006 = vrcp.f32 %v930_v29  ;;  %v3635_v29 = vpack.c.bf16 %v1346_v27, %v1330_v26  ;;  %v3655_v26 = vpack.c.bf16 %v1320_v13, %v1304_v8  ;;  %v3663_v27 = vpack.c.bf16 %v1322_v15, %v1306_v14  ;;  %v2117_v8 = vld [vmem:[%s5565_s7 + $0x98] sm:$0xff]  ;;  %v2148_v13 = vld [vmem:[%s5565_s7 + $0x190] sm:$0xff] }
 0x60a   : > { %v2149_v14 = vld [vmem:[%s5565_s7 + $0x198] sm:$0xff] }
 0x60c   : > { %v1012_v30 = vpop.permute.xlu0 %1011 }
 0x60d   : > { %3582 = vmatpush3.msra.mxu1 %v1012_v30  ;;  %v1301_v30 = vld [vmem:[%s5563_s5 + $0x28] sm:$0xff] }
 0x60f   : > { %v4005_v31 = vpop.eup %4004 }
 0x610   : > { %v932_v32 = vmul.f32 %v4005_v31, %v4001_v20  ;;  %v1344_v20 = vld [vmem:[%s5563_s5 + $0x180] sm:$0xff]  ;;  %v1317_v31 = vld [vmem:[%s5563_s5 + $0xa8] sm:$0xff] }
 0x612   : > { %3579 = vmatmul.mubr.msk.f32.vlgmr.msra.gmra.mrb[6].mxu0 %vm580_vm3, %v932_v32  ;;  %v1303_v32 = vld [vmem:[%s5563_s5 + $0x38] sm:$0xff] }
 0x613   : > { %v4007_v33 = vpop.eup %4006  ;;  %3616 = vmatpush3.bf16.msra.mxu0 %v3613_v36 }
 0x614   : > { %v934_v34 = vmul.f32 %v4007_v33, %v4003_v25  ;;  %3618 = vmatprep.subr.bf16.mxu0 %v3617_v39  ;;  %v3627_v25 = vpack.c.bf16 %v1344_v20, %v1328_v19  ;;  %v3637_v33 = vpack.c.bf16 %v1317_v31, %v1301_v30  ;;  %v1337_v19 = vld [vmem:[%s5563_s5 + $0x148] sm:$0xff]  ;;  %v1352_v30 = vld [vmem:[%s5563_s5 + $0x1c0] sm:$0xff]  ;;  %v1338_v31 = vld [vmem:[%s5563_s5 + $0x150] sm:$0xff] }
 0x615   : > { %v1353_v20 = vld [vmem:[%s5563_s5 + $0x1c8] sm:$0xff] }
 0x616   : > { %3584 = vmatmul.mubr.msk.f32.vlgmr.msra.gmra.mrb[8].mxu1 %vm580_vm3, %v934_v34  ;;  %v1319_v34 = vld [vmem:[%s5563_s5 + $0xb8] sm:$0xff] }
 0x617   : > { %1514 = vmatprep.mubr.f32.mxu1 %v4082_v22  ;;  %v3645_v28 = vpack.c.bf16 %v1319_v34, %v1303_v32  ;;  %v1354_v32 = vld [vmem:[%s5563_s5 + $0x1d0] sm:$0xff] }
 0x6e5   : > { %v1007_v40 = vpop.f32.mrb[6].mxu0 }
 0x6e6   : > { %v3580_v41 = vpop.f32.mrb[7].mxu0  ;;  %3590 = vmatprep.mubr.msk.f32.mxu0 %vm426_vm2, %v1007_v40 }
 0x6e7   : > { %v4388_v41 = vsub.s32 3, %v4199_v10 }
 0x6e9   : > { %v1083_v42 = vpop.f32.mrb[8].mxu1 }
 0x6ea   : > { %v3585_v43 = vpop.f32.mrb[9].mxu1  ;;  %3591 = vmatmul.mubr.msk.f32.vlgmr.msra.gmra.mrb[8].mxu0 %vm426_vm2, %v1083_v42  ;;  %v4391_v42 = vsub.s32 4, %v4199_v10 }
 0x6eb   : > { %3597 = vmatprep.mubr.msk.f32.mxu0 %vm426_vm2, %v675_v61  ;;  %3620 = vmatpush3.bf16.msra.mxu0 %v3617_v39 }
 0x6ec   : > { %3630 = vmatprep.subr.bf16.mxu0 %v3629_v5  ;;  %v1323_v5 = vld [vmem:[%s5563_s5 + $0xd8] sm:$0xff] }
 0x6ed   : > { %v3661_v18 = vpack.c.bf16 %v1323_v5, %v1307_v4  ;;  %v2130_v5 = vld [vmem:[%s5565_s7 + $0x100] sm:$0xff] }
 0x6f2   : > { %3598 = vmatmul.mubr.msk.f32.vlgmr.msra.gmra.mrb[8].mxu0 %vm426_vm2, %v751_v63  ;;  %v1313_v63 = vld [vmem:[%s5563_s5 + $0x88] sm:$0xff] }
 0x6f3   : > { %1591 = vmatprep.mubr.f32.mxu0 %v4082_v22  ;;  %v3621_v1 = vpack.c.bf16 %v1313_v63, %v1297_v62  ;;  %3632 = vmatpush1.bf16.msra.mxu0 %v3631_v9  ;;  %v1334_v62 = vld [vmem:[%s5563_s5 + $0x130] sm:$0xff] }
 0x6f4   : > { %3634 = vmatprep.subr.bf16.mxu0 %v3633_v24  ;;  %v1350_v63 = vld [vmem:[%s5563_s5 + $0x1b0] sm:$0xff]  ;;  %v1339_v24 = vld [vmem:[%s5563_s5 + $0x158] sm:$0xff] }
 0x6f5   : > { %3622 = vmatprep.subr.bf16.mxu1 %v3621_v1  ;;  %v3651_v7 = vpack.c.bf16 %v1350_v63, %v1334_v62  ;;  %v2147_v62 = vld [vmem:[%s5565_s7 + $0x188] sm:$0xff] }
 0x6f6   : > { %3624 = vmatpush1.bf16.msra.mxu1 %v3623_v6 }
 0x6f7   : > { %3626 = vmatprep.subr.bf16.mxu1 %v3625_v16  ;;  %3636 = vmatpush1.bf16.msra.mxu0 %v3635_v29  ;;  %v3653_v16 = vpack.c.bf16 %v1321_v3, %v1305_v2  ;;  %v1336_v29 = vld [vmem:[%s5563_s5 + $0x140] sm:$0xff]  ;;  %v2099_v2 = vld [vmem:[%s5565_s7 + $0x8] sm:$0xff] }
 0x6f8   : > { %3646 = vmatprep.subr.bf16.mxu0 %v3645_v28  ;;  %v1309_v28 = vld [vmem:[%s5563_s5 + $0x68] sm:$0xff] }
 0x6fa   : > { %3628 = vmatpush1.bf16.msra.mxu1 %v3627_v25  ;;  %v1355_v25 = vld [vmem:[%s5563_s5 + $0x1d8] sm:$0xff] }
 0x6fb   : > { %3638 = vmatprep.subr.bf16.mxu1 %v3637_v33  ;;  %v3657_v33 = vpack.c.bf16 %v1353_v20, %v1337_v19  ;;  %v3665_v34 = vpack.c.bf16 %v1355_v25, %v1339_v24  ;;  %v2101_v19 = vld [vmem:[%s5565_s7 + $0x18] sm:$0xff]  ;;  %v3721_v24 = vpack.c.bf16 %v2149_v14, %v2148_v13  ;;  %v2132_v25 = vld [vmem:[%s5565_s7 + $0x110] sm:$0xff] }
 0x6fc   : > { %v2140_v14 = vld [vmem:[%s5565_s7 + $0x150] sm:$0xff] }
 0x7c5   : > { %v3599_v46 = vpop.f32.mrb[8].mxu0 }
 0x7c6   : > { %v1254_v47 = vadd.f32 %v3599_v46, %v1252_v45  ;;  %v1240_v48 = vpop.f32.mrb[9].mxu0 }
 0x7c7   : > { %v1253_v49 = vadd.f32 %v1252_v45, %v1240_v48  ;;  %v1287_v45 = vrot.slane %v4207_v12, %v4388_v41  ;;  %v1293_v48 = vrot.slane %v4207_v12, %v4391_v42  ;;  %v1333_v12 = vld [vmem:[%s5563_s5 + $0x128] sm:$0xff] }
 0x7c8   : > { %v1256_v50 = vadd.f32 %v1254_v47, %v4221_v21  ;;  %v1300_v47 = vld [vmem:[%s5563_s5 + $0x20] sm:$0xff] }
 0x7c9   : > { %v1255_v51 = vadd.f32 %v1253_v49, %v4214_v17 }
 0x7ca   : > { %v1260_v52 = vsel %vm337_vm0, %v1256_v50, 0.0 }
 0x7cb   : > { %1261 = vadd.xlane.f32.xlu0 %v1260_v52  ;;  %v1257_v53 = vsel %vm337_vm0, %v1255_v51, 0.0  ;;  %v1302_v52 = vld [vmem:[%s5563_s5 + $0x30] sm:$0xff] }
 0x7cc   : > { %1258 = vadd.xlane.f32.xlu1 %v1257_v53  ;;  %v1318_v53 = vld [vmem:[%s5563_s5 + $0xb0] sm:$0xff] }
 0x858   : > { %v1262_v54 = vpop.xlane.xlu0 %1261 }
 0x859   : > { %v1265_v55 = vmul.f32 0.03125, %v1262_v54  ;;  %v1259_v56 = vpop.xlane.xlu1 %1258 }
 0x85a   : > { %v1264_v57 = vmul.f32 0.03125, %v1259_v56  ;;  %v1335_v56 = vld [vmem:[%s5563_s5 + $0x138] sm:$0xff] }
 0x85b   : > { %v4317_v58 = vsub.f32 %v1256_v50, %v1265_v55  ;;  %v1349_v55 = vld [vmem:[%s5563_s5 + $0x1a8] sm:$0xff] }
 0x85c   : > { %v4319_v59 = vsub.f32 %v1255_v51, %v1264_v57  ;;  %v1316_v51 = vld [vmem:[%s5563_s5 + $0xa0] sm:$0xff]  ;;  %v1351_v57 = vld [vmem:[%s5563_s5 + $0x1b8] sm:$0xff]  ;;  %v3641_v0 = vpack.c.bf16 %v1349_v55, %v1333_v12 }
 0x85d   : > { %v1269_v60 = vmul.f32 %v4317_v58, %v4317_v58  ;;  %v3649_v1 = vpack.c.bf16 %v1351_v57, %v1335_v56  ;;  %v1356_v55 = vld [vmem:[%s5563_s5 + $0x1e0] sm:$0xff]  ;;  %v1342_v56 = vld [vmem:[%s5563_s5 + $0x170] sm:$0xff] }
 0x85e   : > { %v1268_v17 = vmul.f32 %v4319_v59, %v4319_v59  ;;  %v1358_v57 = vld [vmem:[%s5563_s5 + $0x1f0] sm:$0xff] }
 0x85f   : > { %v1273_v21 = vsel %vm337_vm0, %v1269_v60, 0.0  ;;  %v1332_v60 = vld [vmem:[%s5563_s5 + $0x120] sm:$0xff] }
 0x860   : > { %1274 = vadd.xlane.f32.xlu0 %v1273_v21  ;;  %v1270_v61 = vsel %vm337_vm0, %v1268_v17, 0.0 }
 0x861   : > { %1271 = vadd.xlane.f32.xlu1 %v1270_v61  ;;  %v1348_v61 = vld [vmem:[%s5563_s5 + $0x1a0] sm:$0xff] }
 0x862   : > { %v3643_v6 = vpack.c.bf16 %v1348_v61, %v1332_v60  ;;  %v2114_v60 = vld [vmem:[%s5565_s7 + $0x80] sm:$0xff] }
 0x863   : > { %v2146_v61 = vld [vmem:[%s5565_s7 + $0x180] sm:$0xff] }
 0x864   : > { %v3717_v4 = vpack.c.bf16 %v2147_v62, %v2146_v61  ;;  %v2138_v62 = vld [vmem:[%s5565_s7 + $0x140] sm:$0xff] }
 0x8ed   : > { %v1275_v35 = vpop.xlane.xlu0 %1274 }
 0x8ee   : > { %v1277_v36 = vmul.f32 0.03125, %v1275_v35  ;;  %v1272_v37 = vpop.xlane.xlu1 %1271  ;;  %v1325_v35 = vld [vmem:[%s5563_s5 + $0xe8] sm:$0xff] }
 0x8ef   : > { %v1276_v38 = vmul.f32 0.03125, %v1272_v37  ;;  %v1327_v37 = vld [vmem:[%s5563_s5 + $0xf8] sm:$0xff] }
 0x8f0   : > { %v1279_v39 = vadd.f32 1e-05, %v1277_v36  ;;  %v1311_v36 = vld [vmem:[%s5563_s5 + $0x78] sm:$0xff] }
 0x8f1   : > { %v1278_v40 = vadd.f32 1e-05, %v1276_v38  ;;  %v3659_v38 = vpack.c.bf16 %v1352_v30, %v1336_v29  ;;  %v2119_v29 = vld [vmem:[%s5565_s7 + $0xa8] sm:$0xff]  ;;  %v2150_v30 = vld [vmem:[%s5565_s7 + $0x1a0] sm:$0xff] }
 0x8f2   : > { %4008 = vrsqrt.f32 %v1279_v39  ;;  %v3667_v39 = vpack.c.bf16 %v1354_v32, %v1338_v31  ;;  %v2151_v31 = vld [vmem:[%s5565_s7 + $0x1a8] sm:$0xff] }
 0x8f3   : > { %4010 = vrsqrt.f32 %v1278_v40  ;;  %v1308_v40 = vld [vmem:[%s5563_s5 + $0x60] sm:$0xff] }
 0x8fc   : > { %v4009_v43 = vpop.eup %4008 }
 0x8fd   : > { %v4011_v46 = vpop.eup %4010  ;;  %v1283_v49 = vmul.f32 %v4009_v43, %v4317_v58  ;;  %v3639_v58 = vpack.c.bf16 %v1316_v51, %v1300_v47  ;;  %v1324_v43 = vld [vmem:[%s5563_s5 + $0xe0] sm:$0xff]  ;;  %v3669_v47 = vpack.c.bf16 %v1325_v35, %v1309_v28  ;;  %v1343_v51 = vld [vmem:[%s5563_s5 + $0x178] sm:$0xff]  ;;  %v2103_v28 = vld [vmem:[%s5565_s7 + $0x28] sm:$0xff] }
 0x8fe   : > { %v1282_v50 = vmul.f32 %v4011_v46, %v4319_v59  ;;  %v3647_v59 = vpack.c.bf16 %v1318_v53, %v1302_v52  ;;  %v1326_v46 = vld [vmem:[%s5563_s5 + $0xf0] sm:$0xff]  ;;  %v1359_v52 = vld [vmem:[%s5563_s5 + $0x1f8] sm:$0xff]  ;;  %v3671_v53 = vpack.c.bf16 %v1324_v43, %v1308_v40 }
 0x8ff   : > { %v1289_v17 = vmul.f32 %v1287_v45, %v1283_v49  ;;  %v1341_v49 = vld [vmem:[%s5563_s5 + $0x168] sm:$0xff]  ;;  %v2121_v40 = vld [vmem:[%s5565_s7 + $0xb8] sm:$0xff]  ;;  %v2152_v43 = vld [vmem:[%s5565_s7 + $0x1b0] sm:$0xff] }
 0x900   : > { %v1288_v54 = vmul.f32 %v1287_v45, %v1282_v50  ;;  %v1310_v45 = vld [vmem:[%s5563_s5 + $0x70] sm:$0xff]  ;;  %v1357_v50 = vld [vmem:[%s5563_s5 + $0x1e8] sm:$0xff] }
 0x901   : > { %v4456_v9 = vadd.f32 %v1293_v48, %v1289_v17  ;;  %v3679_v12 = vpack.c.bf16 %v1326_v46, %v1310_v45  ;;  %v2115_v17 = vld [vmem:[%s5565_s7 + $0x88] sm:$0xff]  ;;  %v2153_v45 = vld [vmem:[%s5565_s7 + $0x1b8] sm:$0xff] }
 0x902   : > { %v4426_v21 = vadd.f32 %v1293_v48, %v1288_v54  ;;  %v3677_v48 = vpack.c.bf16 %v1327_v37, %v1311_v36  ;;  %v1340_v54 = vld [vmem:[%s5563_s5 + $0x160] sm:$0xff]  ;;  %v3685_v3 = vpack.c.bf16 %v2115_v17, %v2114_v60  ;;  %v3725_v36 = vpack.c.bf16 %v2151_v31, %v2150_v30  ;;  %v2107_v60 = vld [vmem:[%s5565_s7 + $0x48] sm:$0xff] }
 0x903   : > { %v3675_v63 = vpack.c.bf16 %v1356_v55, %v1340_v54  ;;  %v2134_v37 = vld [vmem:[%s5565_s7 + $0x120] sm:$0xff]  ;;  %v2123_v54 = vld [vmem:[%s5565_s7 + $0xc8] sm:$0xff] }
 0x904   : > { %3178 = vmatmul.mubr.msk.f32.vlgmr.msra.gmra.mrb[10].mxu1 %vm337_vm0, %v4426_v21  ;;  %3180 = vmatmul.mubr.msk.f32.vlgmr.msra.gmra.mrb[10].mxu0 %vm337_vm0, %v4426_v21  ;;  %v2154_v55 = vld [vmem:[%s5565_s7 + $0x1c0] sm:$0xff]  ;;  %v2111_v30 = vld [vmem:[%s5565_s7 + $0x68] sm:$0xff] }
 0x905   : > { %3640 = vmatpush1.bf16.msra.mxu1 %v3639_v58  ;;  %3648 = vmatpush1.bf16.msra.mxu0 %v3647_v59  ;;  %v3673_v58 = vpack.c.bf16 %v1357_v50, %v1341_v49  ;;  %v3681_v59 = vpack.c.bf16 %v1359_v52, %v1343_v51  ;;  %v2105_v49 = vld [vmem:[%s5565_s7 + $0x38] sm:$0xff]  ;;  %v3729_v51 = vpack.c.bf16 %v2153_v45, %v2152_v43  ;;  %v2136_v52 = vld [vmem:[%s5565_s7 + $0x130] sm:$0xff]  ;;  %v2142_v31 = vld [vmem:[%s5565_s7 + $0x160] sm:$0xff] }
 0x906   : > { %1520 = vmatprep.mubr.f32.mxu1 %v4082_v22  ;;  %1597 = vmatprep.mubr.f32.mxu0 %v4082_v22 }
 0x907   : > { %3642 = vmatprep.subr.bf16.mxu1 %v3641_v0  ;;  %3650 = vmatprep.subr.bf16.mxu0 %v3649_v1  ;;  %v3683_v0 = vpack.c.bf16 %v1358_v57, %v1342_v56  ;;  %v2098_v1 = vld [vmem:[%s5565_s7] sm:$0xff]  ;;  %v2155_v56 = vld [vmem:[%s5565_s7 + $0x1c8] sm:$0xff] }
 0x908   : > { %3179 = vmatmul.mubr.msk.f32.gmra.mrb[12].mxu1 %vm337_vm0, %v4456_v9  ;;  %3181 = vmatmul.mubr.msk.f32.gmra.mrb[12].mxu0 %vm337_vm0, %v4456_v9  ;;  %v3687_v15 = vpack.c.bf16 %v2099_v2, %v2098_v1  ;;  %v3733_v61 = vpack.c.bf16 %v2155_v56, %v2154_v55  ;;  %v2125_v1 = vld [vmem:[%s5565_s7 + $0xd8] sm:$0xff]  ;;  %v2156_v2 = vld [vmem:[%s5565_s7 + $0x1d0] sm:$0xff] }
 0x909   : > { %3644 = vmatpush1.bf16.msra.mxu1 %v3643_v6  ;;  %3652 = vmatpush1.bf16.msra.mxu0 %v3651_v7  ;;  %v2131_v6 = vld [vmem:[%s5565_s7 + $0x108] sm:$0xff]  ;;  %v2116_v7 = vld [vmem:[%s5565_s7 + $0x90] sm:$0xff] }
 0x90a   : > { %1668 = vmatprep.mubr.f32.mxu1 %v4082_v22  ;;  %1745 = vmatprep.mubr.f32.mxu0 %v4082_v22  ;;  %v3689_v20 = vpack.c.bf16 %v2117_v8, %v2116_v7  ;;  %v2109_v7 = vld [vmem:[%s5565_s7 + $0x58] sm:$0xff] }
 0x90b   : > { %3654 = vmatprep.subr.bf16.mxu1 %v3653_v16  ;;  %3662 = vmatprep.subr.bf16.mxu0 %v3661_v18  ;;  %v3719_v16 = vpack.c.bf16 %v2131_v6, %v2130_v5  ;;  %v2100_v18 = vld [vmem:[%s5565_s7 + $0x10] sm:$0xff] }
 0x90c   : > { %3182 = vmatmul.mubr.msk.f32.vlgmr.msra.gmra.mrb[14].mxu1 %vm337_vm0, %v4426_v21  ;;  %3184 = vmatmul.mubr.msk.f32.vlgmr.msra.gmra.mrb[14].mxu0 %vm337_vm0, %v4426_v21  ;;  %v3691_v32 = vpack.c.bf16 %v2101_v19, %v2100_v18  ;;  %v2108_v6 = vld [vmem:[%s5565_s7 + $0x50] sm:$0xff]  ;;  %v2127_v18 = vld [vmem:[%s5565_s7 + $0xe8] sm:$0xff]  ;;  %v2158_v19 = vld [vmem:[%s5565_s7 + $0x1e0] sm:$0xff] }
 0x90d   : > { %3656 = vmatpush1.bf16.msra.mxu1 %v3655_v26  ;;  %3664 = vmatpush1.bf16.msra.mxu0 %v3663_v27  ;;  %v2133_v26 = vld [vmem:[%s5565_s7 + $0x118] sm:$0xff]  ;;  %v2118_v27 = vld [vmem:[%s5565_s7 + $0xa0] sm:$0xff] }
 0x90e   : > { %1674 = vmatprep.mubr.f32.mxu1 %v4082_v22  ;;  %1751 = vmatprep.mubr.f32.mxu0 %v4082_v22  ;;  %v3693_v35 = vpack.c.bf16 %v2119_v29, %v2118_v27 }
 0x90f   : > { %3658 = vmatprep.subr.bf16.mxu1 %v3657_v33  ;;  %3666 = vmatprep.subr.bf16.mxu0 %v3665_v34  ;;  %v3723_v33 = vpack.c.bf16 %v2133_v26, %v2132_v25  ;;  %v2102_v34 = vld [vmem:[%s5565_s7 + $0x20] sm:$0xff] }
 0x910   : > { %3183 = vmatmul.mubr.msk.f32.gmra.mrb[16].mxu1 %vm337_vm0, %v4456_v9  ;;  %3185 = vmatmul.mubr.msk.f32.gmra.mrb[16].mxu0 %vm337_vm0, %v4456_v9  ;;  %v3695_v46 = vpack.c.bf16 %v2103_v28, %v2102_v34  ;;  %v2110_v26 = vld [vmem:[%s5565_s7 + $0x60] sm:$0xff]  ;;  %v2128_v28 = vld [vmem:[%s5565_s7 + $0xf0] sm:$0xff] }
 0x911   : > { %3660 = vmatpush1.bf16.msra.mxu1 %v3659_v38  ;;  %3668 = vmatpush1.bf16.msra.mxu0 %v3667_v39  ;;  %v2135_v38 = vld [vmem:[%s5565_s7 + $0x128] sm:$0xff]  ;;  %v2120_v39 = vld [vmem:[%s5565_s7 + $0xb0] sm:$0xff] }
 0x912   : > { %1822 = vmatprep.mubr.f32.mxu1 %v4082_v22  ;;  %1899 = vmatprep.mubr.f32.mxu0 %v4082_v22  ;;  %v3697_v50 = vpack.c.bf16 %v2121_v40, %v2120_v39  ;;  %v2112_v39 = vld [vmem:[%s5565_s7 + $0x70] sm:$0xff]  ;;  %v2113_v40 = vld [vmem:[%s5565_s7 + $0x78] sm:$0xff] }
 0x913   : > { %3670 = vmatprep.subr.bf16.mxu1 %v3669_v47  ;;  %3678 = vmatprep.subr.bf16.mxu0 %v3677_v48  ;;  %v3727_v47 = vpack.c.bf16 %v2135_v38, %v2134_v37  ;;  %v2104_v48 = vld [vmem:[%s5565_s7 + $0x30] sm:$0xff]  ;;  %v2161_v38 = vld [vmem:[%s5565_s7 + $0x1f8] sm:$0xff]  ;;  %v3715_v45 = vpack.c.bf16 %v2113_v40, %v2112_v39  ;;  %v2182_v39 = vld [vmem:[%s5565_s7 + $0x2a0] sm:$0xff] }
 0x914   : > { %3186 = vmatmul.mubr.msk.f32.vlgmr.msra.gmra.mrb[18].mxu1 %vm337_vm0, %v4426_v21  ;;  %3188 = vmatmul.mubr.msk.f32.vlgmr.msra.gmra.mrb[18].mxu0 %vm337_vm0, %v4426_v21  ;;  %v3699_v57 = vpack.c.bf16 %v2105_v49, %v2104_v48  ;;  %v2178_v49 = vld [vmem:[%s5565_s7 + $0x280] sm:$0xff] }
 0x915   : > { %3672 = vmatpush1.bf16.msra.mxu1 %v3671_v53  ;;  %3680 = vmatpush1.bf16.msra.mxu0 %v3679_v12  ;;  %v2137_v53 = vld [vmem:[%s5565_s7 + $0x138] sm:$0xff]  ;;  %v2122_v12 = vld [vmem:[%s5565_s7 + $0xc0] sm:$0xff] }
 0x916   : > { %1828 = vmatprep.mubr.f32.mxu1 %v4082_v22  ;;  %1905 = vmatprep.mubr.f32.mxu0 %v4082_v22  ;;  %v3701_v17 = vpack.c.bf16 %v2123_v54, %v2122_v12  ;;  %v4788_v54 = vld [vmem:[%s5564_s6] sm:$0xff] }
 0x917   : > { %3674 = vmatprep.subr.bf16.mxu1 %v3673_v58  ;;  %3682 = vmatprep.subr.bf16.mxu0 %v3681_v59  ;;  %v3731_v58 = vpack.c.bf16 %v2137_v53, %v2136_v52  ;;  %v2106_v59 = vld [vmem:[%s5565_s7 + $0x40] sm:$0xff]  ;;  %v2211_v53 = vld [vmem:[%s5565_s7 + $0x388] sm:$0xff]  ;;  %v1367_v55 = vrot.slane %v4788_v54, %v4202_v11  ;;  %v1375_v56 = vrot.slane %v4788_v54, %v4309_v44 }
 0x918   : > { %3187 = vmatmul.mubr.msk.f32.gmra.mrb[20].mxu1 %vm337_vm0, %v4456_v9  ;;  %3189 = vmatmul.mubr.msk.f32.gmra.mrb[20].mxu0 %vm337_vm0, %v4456_v9 }
 0x919   : > { %3676 = vmatpush1.bf16.msra.mxu1 %v3675_v63  ;;  %3684 = vmatpush1.bf16.msra.mxu0 %v3683_v0  ;;  %v2139_v63 = vld [vmem:[%s5565_s7 + $0x148] sm:$0xff]  ;;  %v2124_v0 = vld [vmem:[%s5565_s7 + $0xd0] sm:$0xff] }
 0x91a   : > { %1976 = vmatprep.mubr.f32.mxu1 %v4082_v22  ;;  %2053 = vmatprep.mubr.f32.mxu0 %v4082_v22  ;;  %v3735_v5 = vpack.c.bf16 %v2139_v63, %v2138_v62  ;;  %v3705_v8 = vpack.c.bf16 %v2125_v1, %v2124_v0  ;;  %v2194_v63 = vld [vmem:[%s5565_s7 + $0x300] sm:$0xff]  ;;  %v2195_v0 = vld [vmem:[%s5565_s7 + $0x308] sm:$0xff]  ;;  %v2180_v1 = vld [vmem:[%s5565_s7 + $0x290] sm:$0xff] }
 0x91b   : > { %3686 = vmatprep.subr.bf16.mxu1 %v3685_v3  ;;  %3718 = vmatprep.subr.bf16.mxu0 %v3717_v4  ;;  %v2157_v3 = vld [vmem:[%s5565_s7 + $0x1d8] sm:$0xff]  ;;  %v3703_v4 = vpack.c.bf16 %v2107_v60, %v2106_v59  ;;  %v2162_v59 = vld [vmem:[%s5565_s7 + $0x200] sm:$0xff]  ;;  %v2163_v60 = vld [vmem:[%s5565_s7 + $0x208] sm:$0xff] }
 0x91c   : > { %3190 = vmatmul.mubr.msk.f32.vlgmr.msra.gmra.mrb[22].mxu1 %vm337_vm0, %v4426_v21  ;;  %3192 = vmatmul.mubr.msk.f32.vlgmr.msra.gmra.mrb[22].mxu0 %vm337_vm0, %v4426_v21  ;;  %v3737_v13 = vpack.c.bf16 %v2157_v3, %v2156_v2 }
 0x91d   : > { %1982 = vmatprep.mubr.f32.mxu1 %v4082_v22  ;;  %2059 = vmatprep.mubr.f32.mxu0 %v4082_v22 }
 0x91e   : > { %3688 = vmatpush3.bf16.msra.mxu1 %v3687_v15  ;;  %3720 = vmatpush3.bf16.msra.mxu0 %v3719_v16  ;;  %v2141_v15 = vld [vmem:[%s5565_s7 + $0x158] sm:$0xff]  ;;  %v2126_v16 = vld [vmem:[%s5565_s7 + $0xe0] sm:$0xff] }
 0x91f   : > { %3690 = vmatprep.subr.bf16.mxu1 %v3689_v20  ;;  %3722 = vmatprep.subr.bf16.mxu0 %v3721_v24  ;;  %v2159_v20 = vld [vmem:[%s5565_s7 + $0x1e8] sm:$0xff]  ;;  %v3707_v24 = vpack.c.bf16 %v2109_v7, %v2108_v6  ;;  %v3739_v25 = vpack.c.bf16 %v2141_v15, %v2140_v14  ;;  %v3709_v27 = vpack.c.bf16 %v2127_v18, %v2126_v16  ;;  %v2181_v6 = vld [vmem:[%s5565_s7 + $0x298] sm:$0xff]  ;;  %v2212_v7 = vld [vmem:[%s5565_s7 + $0x390] sm:$0xff]  ;;  %v4826_v15 = vsub.s32 7, %v4199_v10 }
 0x920   : > { %3191 = vmatmul.mubr.msk.f32.gmra.mrb[24].mxu1 %vm337_vm0, %v4456_v9  ;;  %3193 = vmatmul.mubr.msk.f32.gmra.mrb[24].mxu0 %vm337_vm0, %v4456_v9  ;;  %v3741_v29 = vpack.c.bf16 %v2159_v20, %v2158_v19  ;;  %v3751_v16 = vpack.c.bf16 %v2163_v60, %v2162_v59  ;;  %v3783_v18 = vpack.c.bf16 %v2195_v0, %v2194_v63  ;;  %v2164_v20 = vld [vmem:[%s5565_s7 + $0x210] sm:$0xff]  ;;  %v2199_v0 = vld [vmem:[%s5565_s7 + $0x328] sm:$0xff] }
 0x922   : > { %3692 = vmatpush3.bf16.msra.mxu1 %v3691_v32  ;;  %3724 = vmatpush3.bf16.msra.mxu0 %v3723_v33  ;;  %v2143_v32 = vld [vmem:[%s5565_s7 + $0x168] sm:$0xff]  ;;  %v3711_v33 = vpack.c.bf16 %v2111_v30, %v2110_v26 }
 0x923   : > { %3694 = vmatprep.subr.bf16.mxu1 %v3693_v35  ;;  %3726 = vmatprep.subr.bf16.mxu0 %v3725_v36  ;;  %v3743_v34 = vpack.c.bf16 %v2143_v32, %v2142_v31  ;;  %v2129_v35 = vld [vmem:[%s5565_s7 + $0xf8] sm:$0xff]  ;;  %v2160_v36 = vld [vmem:[%s5565_s7 + $0x1f0] sm:$0xff] }
 0x924   : > { %v3713_v37 = vpack.c.bf16 %v2129_v35, %v2128_v28  ;;  %v3745_v43 = vpack.c.bf16 %v2161_v38, %v2160_v36  ;;  %v2165_v31 = vld [vmem:[%s5565_s7 + $0x218] sm:$0xff]  ;;  %v2196_v32 = vld [vmem:[%s5565_s7 + $0x310] sm:$0xff] }
 0x925   : > { %v2197_v38 = vld [vmem:[%s5565_s7 + $0x318] sm:$0xff] }
 0x926   : > { %3696 = vmatpush3.bf16.msra.mxu1 %v3695_v46  ;;  %3728 = vmatpush3.bf16.msra.mxu0 %v3727_v47  ;;  %v2144_v46 = vld [vmem:[%s5565_s7 + $0x170] sm:$0xff]  ;;  %v2145_v47 = vld [vmem:[%s5565_s7 + $0x178] sm:$0xff] }
 0x927   : > { %3698 = vmatprep.subr.bf16.mxu1 %v3697_v50  ;;  %3730 = vmatprep.subr.bf16.mxu0 %v3729_v51  ;;  %v3747_v48 = vpack.c.bf16 %v2145_v47, %v2144_v46  ;;  %v2179_v50 = vld [vmem:[%s5565_s7 + $0x288] sm:$0xff]  ;;  %v2210_v51 = vld [vmem:[%s5565_s7 + $0x380] sm:$0xff] }
 0x928   : > { %v3749_v52 = vpack.c.bf16 %v2179_v50, %v2178_v49  ;;  %v3781_v12 = vpack.c.bf16 %v2211_v53, %v2210_v51  ;;  %v2183_v46 = vld [vmem:[%s5565_s7 + $0x2a8] sm:$0xff]  ;;  %v2214_v47 = vld [vmem:[%s5565_s7 + $0x3a0] sm:$0xff] }
 0x929   : > { %v2166_v49 = vld [vmem:[%s5565_s7 + $0x220] sm:$0xff] }
 0x92a   : > { %3700 = vmatpush3.bf16.msra.mxu1 %v3699_v57  ;;  %3732 = vmatpush3.bf16.msra.mxu0 %v3731_v58  ;;  %v1371_v57 = vrot.slane %v4788_v54, %v4232_v23  ;;  %v1379_v58 = vrot.slane %v4788_v54, %v4388_v41 }
 0x92b   : > { %3702 = vmatprep.subr.bf16.mxu1 %v3701_v17  ;;  %3734 = vmatprep.subr.bf16.mxu0 %v3733_v61  ;;  %v4805_v17 = vsub.s32 5, %v4199_v10 }
 0x92d   : > { %v4830_v19 = vrot.slane %v4788_v54, %v4805_v17 }
 0x92e   : > { %3704 = vmatpush3.bf16.msra.mxu1 %v3703_v4  ;;  %3736 = vmatpush3.bf16.msra.mxu0 %v3735_v5 }
 0x92f   : > { %3706 = vmatprep.subr.bf16.mxu1 %v3705_v8  ;;  %3738 = vmatprep.subr.bf16.mxu0 %v3737_v13  ;;  %v2213_v8 = vld [vmem:[%s5565_s7 + $0x398] sm:$0xff] }
 0x930   : > { %v3785_v30 = vpack.c.bf16 %v2213_v8, %v2212_v7 }
 0x932   : > { %3708 = vmatpush3.bf16.msra.mxu1 %v3707_v24  ;;  %3740 = vmatpush3.bf16.msra.mxu0 %v3739_v25 }
 0x933   : > { %3710 = vmatprep.subr.bf16.mxu1 %v3709_v27  ;;  %3742 = vmatprep.subr.bf16.mxu0 %v3741_v29  ;;  %v3753_v29 = vpack.c.bf16 %v2181_v6, %v2180_v1  ;;  %v2184_v1 = vld [vmem:[%s5565_s7 + $0x2b0] sm:$0xff]  ;;  %v2217_v6 = vld [vmem:[%s5565_s7 + $0x3b8] sm:$0xff] }
 0x936   : > { %3712 = vmatpush3.bf16.msra.mxu1 %v3711_v33  ;;  %3744 = vmatpush3.bf16.msra.mxu0 %v3743_v34 }
 0x937   : > { %3714 = vmatprep.subr.bf16.mxu1 %v3713_v37  ;;  %3746 = vmatprep.subr.bf16.mxu0 %v3745_v43 }
 0x93a   : > { %3716 = vmatpush3.bf16.msra.mxu1 %v3715_v45  ;;  %3748 = vmatpush3.bf16.msra.mxu0 %v3747_v48  ;;  %v4849_v45 = vrot.slane %v4788_v54, %v4826_v15  ;;  %v2215_v48 = vld [vmem:[%s5565_s7 + $0x3a8] sm:$0xff] }
 0x93b   : > { %3750 = vmatprep.subr.bf16.mxu1 %v3749_v52  ;;  %3782 = vmatprep.subr.bf16.mxu0 %v3781_v12  ;;  %v3755_v12 = vpack.c.bf16 %v2165_v31, %v2164_v20  ;;  %v3789_v63 = vpack.c.bf16 %v2215_v48, %v2214_v47  ;;  %v2168_v20 = vld [vmem:[%s5565_s7 + $0x230] sm:$0xff]  ;;  %v2201_v31 = vld [vmem:[%s5565_s7 + $0x338] sm:$0xff] }
 0x9d7   : > { %v1516_v61 = vpop.f32.mrb[10].mxu1  ;;  %v1593_v62 = vpop.f32.mrb[10].mxu0 }
 0x9d8   : > { %v1517_v2 = vadd.f32 %v1516_v61, %v1367_v55  ;;  %v1594_v3 = vadd.f32 %v1593_v62, %v1375_v56  ;;  %v1518_v4 = vpop.f32.mrb[11].mxu1  ;;  %v1595_v5 = vpop.f32.mrb[11].mxu0  ;;  %v3757_v62 = vpack.c.bf16 %v2183_v46, %v2182_v39  ;;  %v2170_v39 = vld [vmem:[%s5565_s7 + $0x240] sm:$0xff] }
 0x9d9   : > { %v1519_v13 = vadd.f32 %v1518_v4, %v1371_v57  ;;  %v1596_v14 = vadd.f32 %v1595_v5, %v1379_v58  ;;  %v2185_v4 = vld [vmem:[%s5565_s7 + $0x2b8] sm:$0xff]  ;;  %v2216_v5 = vld [vmem:[%s5565_s7 + $0x3b0] sm:$0xff] }
 0x9da   : > { %v2066_v33 = vmax.f32 %v1517_v2, 0.0  ;;  %v2068_v34 = vmax.f32 %v1594_v3, 0.0 }
 0x9db   : > { %v2067_v24 = vmax.f32 %v1519_v13, 0.0  ;;  %v2069_v25 = vmax.f32 %v1596_v14, 0.0  ;;  %v1522_v26 = vpop.f32.mrb[12].mxu1  ;;  %v1599_v27 = vpop.f32.mrb[12].mxu0 }
 0x9dc   : > { %v1523_v28 = vadd.f32 %v1522_v26, %v1367_v55  ;;  %v1600_v35 = vadd.f32 %v1599_v27, %v1375_v56  ;;  %v1524_v36 = vpop.f32.mrb[13].mxu1  ;;  %v1601_v37 = vpop.f32.mrb[13].mxu0  ;;  %v3787_v55 = vpack.c.bf16 %v2197_v38, %v2196_v32  ;;  %v2167_v56 = vld [vmem:[%s5565_s7 + $0x228] sm:$0xff]  ;;  %v3761_v27 = vpack.c.bf16 %v2185_v4, %v2184_v1  ;;  %v2186_v32 = vld [vmem:[%s5565_s7 + $0x2c0] sm:$0xff] }
 0x9dd   : > { %v1525_v40 = vadd.f32 %v1524_v36, %v1371_v57  ;;  %v1602_v43 = vadd.f32 %v1601_v37, %v1379_v58  ;;  %2422 = vmatprep.mubr.f32.mxu1 %v2067_v24  ;;  %2497 = vmatprep.mubr.f32.mxu0 %v2069_v25  ;;  %v2198_v57 = vld [vmem:[%s5565_s7 + $0x320] sm:$0xff]  ;;  %v2169_v24 = vld [vmem:[%s5565_s7 + $0x238] sm:$0xff] }
 0x9de   : > { %2423 = vmatmul.mubr.f32.vlgmr.msra.gmra.mrb[26].mxu1 %v2066_v33  ;;  %2498 = vmatmul.mubr.f32.vlgmr.msra.gmra.mrb[26].mxu0 %v2068_v34  ;;  %v2082_v58 = vmax.f32 %v1523_v28, 0.0  ;;  %v2084_v59 = vmax.f32 %v1600_v35, 0.0  ;;  %v2187_v33 = vld [vmem:[%s5565_s7 + $0x2c8] sm:$0xff]  ;;  %v2218_v34 = vld [vmem:[%s5565_s7 + $0x3c0] sm:$0xff]  ;;  %v3763_v37 = vpack.c.bf16 %v2169_v24, %v2168_v20 }
 0x9df   : > { %v2083_v50 = vmax.f32 %v1525_v40, 0.0  ;;  %v2085_v51 = vmax.f32 %v1602_v43, 0.0  ;;  %3752 = vmatpush3.bf16.msra.mxu1 %v3751_v16  ;;  %3784 = vmatpush3.bf16.msra.mxu0 %v3783_v18  ;;  %v4863_v52 = vpop.f32.mrb[14].mxu1  ;;  %v4865_v53 = vpop.f32.mrb[14].mxu0  ;;  %v3759_v16 = vpack.c.bf16 %v2167_v56, %v2166_v49  ;;  %v3791_v18 = vpack.c.bf16 %v2199_v0, %v2198_v57  ;;  %v2219_v28 = vld [vmem:[%s5565_s7 + $0x3c8] sm:$0xff]  ;;  %v2202_v49 = vld [vmem:[%s5565_s7 + $0x340] sm:$0xff] }
 0x9e0   : > { %v1672_v60 = vpop.f32.mrb[15].mxu1  ;;  %v1749_v61 = vpop.f32.mrb[15].mxu0  ;;  %3754 = vmatprep.subr.bf16.mxu1 %v3753_v29  ;;  %3786 = vmatprep.subr.bf16.mxu0 %v3785_v30  ;;  %v3793_v29 = vpack.c.bf16 %v2217_v6, %v2216_v5  ;;  %v2200_v30 = vld [vmem:[%s5565_s7 + $0x330] sm:$0xff]  ;;  %v2171_v40 = vld [vmem:[%s5565_s7 + $0x248] sm:$0xff]  ;;  %v3765_v47 = vpack.c.bf16 %v2187_v33, %v2186_v32  ;;  %v3797_v48 = vpack.c.bf16 %v2219_v28, %v2218_v34  ;;  %v2221_v56 = vld [vmem:[%s5565_s7 + $0x3d8] sm:$0xff]  ;;  %v4955_v57 = vsub.s32 6, %v4199_v10 }
 0x9e1   : > { %v1673_v2 = vadd.f32 %v1672_v60, %v4830_v19  ;;  %v1750_v3 = vadd.f32 %v1749_v61, %v4849_v45  ;;  %2427 = vmatprep.mubr.f32.mxu1 %v2083_v50  ;;  %2502 = vmatprep.mubr.f32.mxu0 %v2085_v51  ;;  %v3795_v38 = vpack.c.bf16 %v2201_v31, %v2200_v30  ;;  %v2203_v50 = vld [vmem:[%s5565_s7 + $0x348] sm:$0xff]  ;;  %v2188_v51 = vld [vmem:[%s5565_s7 + $0x2d0] sm:$0xff]  ;;  %v2173_v10 = vld [vmem:[%s5565_s7 + $0x258] sm:$0xff] }
 0x9e2   : > { %2428 = vmatmul.mubr.f32.gmra.mrb[28].mxu1 %v2082_v58  ;;  %2503 = vmatmul.mubr.f32.gmra.mrb[28].mxu0 %v2084_v59  ;;  %v4960_v58 = vld [vmem:[%s5564_s6 + $0x8] sm:$0xff]  ;;  %v3767_v61 = vpack.c.bf16 %v2171_v40, %v2170_v39  ;;  %v2204_v5 = vld [vmem:[%s5565_s7 + $0x350] sm:$0xff]  ;;  %v2205_v6 = vld [vmem:[%s5565_s7 + $0x358] sm:$0xff] }
 0x9e3   : > { %v2071_v7 = vmax.f32 %v1673_v2, 0.0  ;;  %v2073_v8 = vmax.f32 %v1750_v3, 0.0  ;;  %3756 = vmatpush3.bf16.msra.mxu1 %v3755_v12  ;;  %3788 = vmatpush3.bf16.msra.mxu0 %v3787_v55  ;;  %v4890_v13 = vpop.f32.mrb[16].mxu1  ;;  %v4892_v14 = vpop.f32.mrb[16].mxu0  ;;  %v2189_v12 = vld [vmem:[%s5565_s7 + $0x2d8] sm:$0xff]  ;;  %v2220_v55 = vld [vmem:[%s5565_s7 + $0x3d0] sm:$0xff]  ;;  %v1423_v2 = vrot.slane %v4960_v58, %v4955_v57  ;;  %v3803_v30 = vpack.c.bf16 %v2205_v6, %v2204_v5 }
 0x9e4   : > { %v4900_v25 = vpop.f32.mrb[17].mxu1  ;;  %v4902_v26 = vpop.f32.mrb[17].mxu0  ;;  %3758 = vmatprep.subr.bf16.mxu1 %v3757_v62  ;;  %3790 = vmatprep.subr.bf16.mxu0 %v3789_v63  ;;  %v3799_v62 = vpack.c.bf16 %v2203_v50, %v2202_v49  ;;  %v2172_v63 = vld [vmem:[%s5565_s7 + $0x250] sm:$0xff]  ;;  %v3769_v3 = vpack.c.bf16 %v2189_v12, %v2188_v51  ;;  %v3801_v4 = vpack.c.bf16 %v2221_v56, %v2220_v55  ;;  %v2223_v20 = vld [vmem:[%s5565_s7 + $0x3e8] sm:$0xff]  ;;  %v2174_v31 = vld [vmem:[%s5565_s7 + $0x260] sm:$0xff] }
 0x9e5   : > { %2572 = vmatprep.mubr.f32.mxu1 %v2071_v7  ;;  %2647 = vmatprep.mubr.f32.mxu0 %v2073_v8  ;;  %v2190_v7 = vld [vmem:[%s5565_s7 + $0x2e0] sm:$0xff]  ;;  %v1427_v8 = vrot.slane %v4960_v58, %v4826_v15  ;;  %v2175_v32 = vld [vmem:[%s5565_s7 + $0x268] sm:$0xff]  ;;  %v2193_v49 = vld [vmem:[%s5565_s7 + $0x2f8] sm:$0xff]  ;;  %v1383_v12 = vrot.slane %v4788_v54, %v4391_v42  ;;  %v1391_v55 = vrot.slane %v4788_v54, %v4955_v57 }
 0x9e6   : > { %v2206_v39 = vld [vmem:[%s5565_s7 + $0x360] sm:$0xff]  ;;  %v2207_v40 = vld [vmem:[%s5565_s7 + $0x368] sm:$0xff]  ;;  %v2224_v50 = vld [vmem:[%s5565_s7 + $0x3f0] sm:$0xff] }
 0x9e7   : > { %3760 = vmatpush3.bf16.msra.mxu1 %v3759_v16  ;;  %3792 = vmatpush3.bf16.msra.mxu0 %v3791_v18  ;;  %v4922_v35 = vpop.f32.mrb[18].mxu1  ;;  %v4924_v36 = vpop.f32.mrb[18].mxu0  ;;  %v2191_v16 = vld [vmem:[%s5565_s7 + $0x2e8] sm:$0xff]  ;;  %v2222_v18 = vld [vmem:[%s5565_s7 + $0x3e0] sm:$0xff]  ;;  %v2225_v51 = vld [vmem:[%s5565_s7 + $0x3f8] sm:$0xff] }
 0x9e8   : > { %v4932_v43 = vpop.f32.mrb[19].mxu1  ;;  %v4934_v46 = vpop.f32.mrb[19].mxu0  ;;  %3762 = vmatprep.subr.bf16.mxu1 %v3761_v27  ;;  %3794 = vmatprep.subr.bf16.mxu0 %v3793_v29  ;;  %v3771_v29 = vpack.c.bf16 %v2173_v10, %v2172_v63  ;;  %v3807_v63 = vpack.c.bf16 %v2207_v40, %v2206_v39  ;;  %v2176_v10 = vld [vmem:[%s5565_s7 + $0x270] sm:$0xff]  ;;  %v2259_v39 = vld [vmem:[%s5565_s7 + $0x508] sm:$0xff] }
 0x9e9   : > { %v2244_v40 = vld [vmem:[%s5565_s7 + $0x490] sm:$0xff] }
 0x9eb   : > { %3764 = vmatpush3.bf16.msra.mxu1 %v3763_v37  ;;  %3796 = vmatpush3.bf16.msra.mxu0 %v3795_v38  ;;  %v4962_v59 = vpop.f32.mrb[20].mxu1  ;;  %v4964_v60 = vpop.f32.mrb[20].mxu0  ;;  %v3773_v37 = vpack.c.bf16 %v2191_v16, %v2190_v7  ;;  %v3805_v38 = vpack.c.bf16 %v2223_v20, %v2222_v18  ;;  %v3809_v16 = vpack.c.bf16 %v2225_v51, %v2224_v50  ;;  %v2209_v18 = vld [vmem:[%s5565_s7 + $0x378] sm:$0xff]  ;;  %v2242_v20 = vld [vmem:[%s5565_s7 + $0x480] sm:$0xff] }
 0x9ec   : > { %v4972_v0 = vpop.f32.mrb[21].mxu1  ;;  %v4974_v1 = vpop.f32.mrb[21].mxu0  ;;  %3766 = vmatprep.subr.bf16.mxu1 %v3765_v47  ;;  %3798 = vmatprep.subr.bf16.mxu0 %v3797_v48  ;;  %v2192_v47 = vld [vmem:[%s5565_s7 + $0x2f0] sm:$0xff]  ;;  %v2245_v51 = vld [vmem:[%s5565_s7 + $0x498] sm:$0xff] }
 0x9ed   : > { %v3777_v7 = vpack.c.bf16 %v2193_v49, %v2192_v47  ;;  %v1671_v47 = vadd.f32 %v4863_v52, %v1383_v12  ;;  %v1748_v49 = vadd.f32 %v4865_v53, %v1391_v55  ;;  %v1679_v52 = vadd.f32 %v4900_v25, %v4830_v19 }
 0x9ee   : > { %v1756_v53 = vadd.f32 %v4902_v26, %v4849_v45  ;;  %v1677_v19 = vadd.f32 %v4890_v13, %v1383_v12  ;;  %v1754_v45 = vadd.f32 %v4892_v14, %v1391_v55  ;;  %v2260_v14 = vld [vmem:[%s5565_s7 + $0x510] sm:$0xff]  ;;  %v2261_v12 = vld [vmem:[%s5565_s7 + $0x518] sm:$0xff]  ;;  %v2246_v55 = vld [vmem:[%s5565_s7 + $0x4a0] sm:$0xff] }
 0x9ef   : > { %3768 = vmatpush3.bf16.msra.mxu1 %v3767_v61  ;;  %3800 = vmatpush3.bf16.msra.mxu0 %v3799_v62  ;;  %v4998_v24 = vpop.f32.mrb[22].mxu1  ;;  %v2055_v27 = vpop.f32.mrb[22].mxu0  ;;  %v3775_v62 = vpack.c.bf16 %v2175_v32, %v2174_v31  ;;  %v2226_v31 = vld [vmem:[%s5565_s7 + $0x400] sm:$0xff]  ;;  %v2227_v32 = vld [vmem:[%s5565_s7 + $0x408] sm:$0xff]  ;;  %v2087_v25 = vmax.f32 %v1679_v52, 0.0 }
 0x9f0   : > { %v5006_v33 = vadd.f32 %v2055_v27, %v1423_v2  ;;  %v5008_v34 = vpop.f32.mrb[23].mxu1  ;;  %v2057_v28 = vpop.f32.mrb[23].mxu0  ;;  %3770 = vmatprep.subr.bf16.mxu1 %v3769_v3  ;;  %3802 = vmatprep.subr.bf16.mxu0 %v3801_v4  ;;  %v2177_v3 = vld [vmem:[%s5565_s7 + $0x278] sm:$0xff]  ;;  %v2208_v4 = vld [vmem:[%s5565_s7 + $0x370] sm:$0xff]  ;;  %v2089_v26 = vmax.f32 %v1756_v53, 0.0 }
 0x9f1   : > { %v5019_v48 = vadd.f32 %v2057_v28, %v1427_v8  ;;  %v3811_v28 = vpack.c.bf16 %v2209_v18, %v2208_v4  ;;  %v2072_v18 = vmax.f32 %v1748_v49, 0.0  ;;  %v2263_v49 = vld [vmem:[%s5565_s7 + $0x528] sm:$0xff] }
 0x9f3   : > { %3772 = vmatpush3.bf16.msra.mxu1 %v3771_v29  ;;  %3804 = vmatpush3.bf16.msra.mxu0 %v3803_v30  ;;  %v5034_v56 = vpop.f32.mrb[24].mxu1  ;;  %v2061_v61 = vpop.f32.mrb[24].mxu0  ;;  %v2274_v29 = vld [vmem:[%s5565_s7 + $0x580] sm:$0xff]  ;;  %v2275_v30 = vld [vmem:[%s5565_s7 + $0x588] sm:$0xff] }
 0x9f4   : > { %v5045_v54 = vadd.f32 %v2061_v61, %v1423_v2  ;;  %v5047_v5 = vpop.f32.mrb[25].mxu1  ;;  %v2063_v6 = vpop.f32.mrb[25].mxu0  ;;  %3774 = vmatprep.subr.bf16.mxu1 %v3773_v37  ;;  %3806 = vmatprep.subr.bf16.mxu0 %v3805_v38  ;;  %v2243_v2 = vld [vmem:[%s5565_s7 + $0x488] sm:$0xff]  ;;  %v2258_v38 = vld [vmem:[%s5565_s7 + $0x500] sm:$0xff]  ;;  %v3845_v50 = vpack.c.bf16 %v2275_v30, %v2274_v29  ;;  %v2276_v61 = vld [vmem:[%s5565_s7 + $0x590] sm:$0xff]  ;;  %v2086_v29 = vmax.f32 %v1677_v19, 0.0 }
 0x9f5   : > { %v5058_v27 = vadd.f32 %v2063_v6, %v1427_v8  ;;  %v3779_v8 = vpack.c.bf16 %v2177_v3, %v2176_v10  ;;  %v3813_v37 = vpack.c.bf16 %v2243_v2, %v2242_v20  ;;  %v5102_v10 = vrot.slane %v4960_v58, %v4388_v41  ;;  %v2229_v41 = vld [vmem:[%s5565_s7 + $0x418] sm:$0xff]  ;;  %v2279_v2 = vld [vmem:[%s5565_s7 + $0x5a8] sm:$0xff]  ;;  %v2250_v19 = vld [vmem:[%s5565_s7 + $0x4c0] sm:$0xff] }
 0x9f6   : > { %v3815_v3 = vpack.c.bf16 %v2227_v32, %v2226_v31  ;;  %v3847_v4 = vpack.c.bf16 %v2259_v39, %v2258_v38  ;;  %v3817_v6 = vpack.c.bf16 %v2245_v51, %v2244_v40  ;;  %v2088_v30 = vmax.f32 %v1754_v45, 0.0  ;;  %v2249_v51 = vld [vmem:[%s5565_s7 + $0x4b8] sm:$0xff]  ;;  %v2251_v45 = vld [vmem:[%s5565_s7 + $0x4c8] sm:$0xff] }
 0x9f7   : > { %3776 = vmatpush3.bf16.msra.mxu1 %v3775_v62  ;;  %3808 = vmatpush3.bf16.msra.mxu0 %v3807_v63  ;;  %v2277_v62 = vld [vmem:[%s5565_s7 + $0x598] sm:$0xff]  ;;  %v5098_v63 = vrot.slane %v4960_v58, %v4232_v23  ;;  %v2228_v23 = vld [vmem:[%s5565_s7 + $0x410] sm:$0xff]  ;;  %v1904_v13 = vadd.f32 %v4934_v46, %v5102_v10  ;;  %v2278_v46 = vld [vmem:[%s5565_s7 + $0x5a0] sm:$0xff]  ;;  %v3851_v32 = vpack.c.bf16 %v2261_v12, %v2260_v14 }
 0x9f8   : > { %3778 = vmatprep.subr.bf16.mxu1 %v3777_v7  ;;  %3810 = vmatprep.subr.bf16.mxu0 %v3809_v16  ;;  %v3849_v7 = vpack.c.bf16 %v2277_v62, %v2276_v61  ;;  %v2070_v16 = vmax.f32 %v1671_v47, 0.0  ;;  %v3819_v31 = vpack.c.bf16 %v2229_v41, %v2228_v23  ;;  %v3853_v40 = vpack.c.bf16 %v2279_v2, %v2278_v46  ;;  %v2262_v47 = vld [vmem:[%s5565_s7 + $0x520] sm:$0xff]  ;;  %v2280_v61 = vld [vmem:[%s5565_s7 + $0x5b0] sm:$0xff]  ;;  %v2281_v62 = vld [vmem:[%s5565_s7 + $0x5b8] sm:$0xff] }
 0x9f9   : > { %v1827_v20 = vadd.f32 %v4932_v43, %v5098_v63  ;;  %v2247_v43 = vld [vmem:[%s5565_s7 + $0x4a8] sm:$0xff]  ;;  %v2077_v38 = vmax.f32 %v1904_v13, 0.0  ;;  %v3855_v53 = vpack.c.bf16 %v2263_v49, %v2262_v47  ;;  %v2282_v23 = vld [vmem:[%s5565_s7 + $0x5c0] sm:$0xff]  ;;  %v3829_v14 = vpack.c.bf16 %v2251_v45, %v2250_v19  ;;  %v2252_v46 = vld [vmem:[%s5565_s7 + $0x4d0] sm:$0xff] }
 0x9fa   : > { %v3821_v39 = vpack.c.bf16 %v2247_v43, %v2246_v55  ;;  %v2283_v41 = vld [vmem:[%s5565_s7 + $0x5c8] sm:$0xff]  ;;  %v2266_v55 = vld [vmem:[%s5565_s7 + $0x540] sm:$0xff]  ;;  %v2253_v2 = vld [vmem:[%s5565_s7 + $0x4d8] sm:$0xff] }
 0x9fb   : > { %3780 = vmatpush3.bf16.msra.mxu1 %v3779_v8  ;;  %3812 = vmatpush3.bf16.msra.mxu0 %v3811_v28  ;;  %v2230_v8 = vld [vmem:[%s5565_s7 + $0x420] sm:$0xff]  ;;  %v2231_v28 = vld [vmem:[%s5565_s7 + $0x428] sm:$0xff]  ;;  %v3861_v12 = vpack.c.bf16 %v2283_v41, %v2282_v23  ;;  %v2288_v19 = vld [vmem:[%s5565_s7 + $0x5f0] sm:$0xff]  ;;  %v1399_v23 = vrot.slane %v4960_v58, %v4202_v11 }
 0x9fc   : > { %3814 = vmatprep.subr.bf16.mxu1 %v3813_v37  ;;  %3846 = vmatprep.subr.bf16.mxu0 %v3845_v50  ;;  %v2075_v37 = vmax.f32 %v1827_v20, 0.0  ;;  %v2248_v50 = vld [vmem:[%s5565_s7 + $0x4b0] sm:$0xff]  ;;  %v3823_v52 = vpack.c.bf16 %v2231_v28, %v2230_v8  ;;  %v2234_v20 = vld [vmem:[%s5565_s7 + $0x440] sm:$0xff]  ;;  %v2235_v13 = vld [vmem:[%s5565_s7 + $0x448] sm:$0xff] }
 0x9fd   : > { %v2267_v43 = vld [vmem:[%s5565_s7 + $0x548] sm:$0xff]  ;;  %v2236_v8 = vld [vmem:[%s5565_s7 + $0x450] sm:$0xff]  ;;  %v2237_v28 = vld [vmem:[%s5565_s7 + $0x458] sm:$0xff] }
 0x9fe   : > { %2573 = vmatmul.mubr.f32.vlgmr.msra.gmra.mrb[30].mxu1 %v2070_v16  ;;  %2648 = vmatmul.mubr.f32.vlgmr.msra.gmra.mrb[30].mxu0 %v2072_v18  ;;  %v2264_v16 = vld [vmem:[%s5565_s7 + $0x530] sm:$0xff]  ;;  %v2265_v18 = vld [vmem:[%s5565_s7 + $0x538] sm:$0xff]  ;;  %v2254_v47 = vld [vmem:[%s5565_s7 + $0x4e0] sm:$0xff] }
 0x9ff   : > { %2577 = vmatprep.mubr.f32.mxu1 %v2087_v25  ;;  %2652 = vmatprep.mubr.f32.mxu0 %v2089_v26  ;;  %v3859_v26 = vpack.c.bf16 %v2265_v18, %v2264_v16  ;;  %v2255_v49 = vld [vmem:[%s5565_s7 + $0x4e8] sm:$0xff]  ;;  %v2256_v16 = vld [vmem:[%s5565_s7 + $0x4f0] sm:$0xff]  ;;  %v2257_v18 = vld [vmem:[%s5565_s7 + $0x4f8] sm:$0xff] }
 0xa00   : > { %3816 = vmatpush3.bf16.msra.mxu1 %v3815_v3  ;;  %3848 = vmatpush3.bf16.msra.mxu0 %v3847_v4  ;;  %v2232_v3 = vld [vmem:[%s5565_s7 + $0x430] sm:$0xff]  ;;  %v2233_v4 = vld [vmem:[%s5565_s7 + $0x438] sm:$0xff]  ;;  %v3841_v11 = vpack.c.bf16 %v2257_v18, %v2256_v16 }
 0xa01   : > { %3818 = vmatprep.subr.bf16.mxu1 %v3817_v6  ;;  %3850 = vmatprep.subr.bf16.mxu0 %v3849_v7  ;;  %v3825_v6 = vpack.c.bf16 %v2249_v51, %v2248_v50  ;;  %v3857_v7 = vpack.c.bf16 %v2281_v62, %v2280_v61  ;;  %v3827_v25 = vpack.c.bf16 %v2233_v4, %v2232_v3  ;;  %v2286_v50 = vld [vmem:[%s5565_s7 + $0x5e0] sm:$0xff]  ;;  %v2287_v51 = vld [vmem:[%s5565_s7 + $0x5e8] sm:$0xff]  ;;  %v2289_v45 = vld [vmem:[%s5565_s7 + $0x5f8] sm:$0xff] }
 0xa02   : > { %2578 = vmatmul.mubr.f32.gmra.mrb[32].mxu1 %v2086_v29  ;;  %2653 = vmatmul.mubr.f32.gmra.mrb[32].mxu0 %v2088_v30  ;;  %v2284_v29 = vld [vmem:[%s5565_s7 + $0x5d0] sm:$0xff]  ;;  %v2285_v30 = vld [vmem:[%s5565_s7 + $0x5d8] sm:$0xff]  ;;  %v3835_v61 = vpack.c.bf16 %v2237_v28, %v2236_v8  ;;  %v3837_v3 = vpack.c.bf16 %v2255_v49, %v2254_v47  ;;  %v3869_v4 = vpack.c.bf16 %v2287_v51, %v2286_v50  ;;  %v2291_v8 = vld [vmem:[%s5565_s7 + $0x608] sm:$0xff] }
 0xa03   : > { %2722 = vmatprep.mubr.f32.mxu1 %v2075_v37  ;;  %2797 = vmatprep.mubr.f32.mxu0 %v2077_v38  ;;  %v3833_v37 = vpack.c.bf16 %v2253_v2, %v2252_v46  ;;  %v3865_v38 = vpack.c.bf16 %v2285_v30, %v2284_v29  ;;  %v2307_v46 = vld [vmem:[%s5565_s7 + $0x688] sm:$0xff]  ;;  %v2322_v28 = vld [vmem:[%s5565_s7 + $0x700] sm:$0xff]  ;;  %v2308_v47 = vld [vmem:[%s5565_s7 + $0x690] sm:$0xff]  ;;  %v5308_v50 = vrot.slane %v4960_v58, %v4805_v17 }
 0xa04   : > { %3820 = vmatpush3.bf16.msra.mxu1 %v3819_v31  ;;  %3852 = vmatpush3.bf16.msra.mxu0 %v3851_v32  ;;  %v3831_v31 = vpack.c.bf16 %v2235_v13, %v2234_v20  ;;  %v3863_v32 = vpack.c.bf16 %v2267_v43, %v2266_v55  ;;  %v2241_v20 = vld [vmem:[%s5565_s7 + $0x478] sm:$0xff]  ;;  %v2272_v13 = vld [vmem:[%s5565_s7 + $0x570] sm:$0xff]  ;;  %v2306_v43 = vld [vmem:[%s5565_s7 + $0x680] sm:$0xff] }
 0xa05   : > { %3822 = vmatprep.subr.bf16.mxu1 %v3821_v39  ;;  %3854 = vmatprep.subr.bf16.mxu0 %v3853_v40  ;;  %v2268_v39 = vld [vmem:[%s5565_s7 + $0x550] sm:$0xff]  ;;  %v2269_v40 = vld [vmem:[%s5565_s7 + $0x558] sm:$0xff]  ;;  %v2339_v2 = vld [vmem:[%s5565_s7 + $0x788] sm:$0xff]  ;;  %v1981_v16 = vadd.f32 %v5008_v34, %v5308_v50 }
 0xa06   : > { %v3867_v62 = vpack.c.bf16 %v2269_v40, %v2268_v39  ;;  %v2273_v55 = vld [vmem:[%s5565_s7 + $0x578] sm:$0xff]  ;;  %v2323_v40 = vld [vmem:[%s5565_s7 + $0x708] sm:$0xff]  ;;  %v2340_v51 = vld [vmem:[%s5565_s7 + $0x790] sm:$0xff] }
 0xa07   : > { %v3875_v30 = vpack.c.bf16 %v2273_v55, %v2272_v13  ;;  %v2309_v49 = vld [vmem:[%s5565_s7 + $0x698] sm:$0xff]  ;;  %v2342_v34 = vld [vmem:[%s5565_s7 + $0x7a0] sm:$0xff] }
 0xa08   : > { %3824 = vmatpush3.bf16.msra.mxu1 %v3823_v52  ;;  %3856 = vmatpush3.bf16.msra.mxu0 %v3855_v53  ;;  %v2238_v52 = vld [vmem:[%s5565_s7 + $0x460] sm:$0xff]  ;;  %v2239_v53 = vld [vmem:[%s5565_s7 + $0x468] sm:$0xff] }
 0xa09   : > { %3826 = vmatprep.subr.bf16.mxu1 %v3825_v6  ;;  %3858 = vmatprep.subr.bf16.mxu0 %v3857_v7  ;;  %v2270_v6 = vld [vmem:[%s5565_s7 + $0x560] sm:$0xff]  ;;  %v2271_v7 = vld [vmem:[%s5565_s7 + $0x568] sm:$0xff]  ;;  %v3839_v41 = vpack.c.bf16 %v2239_v53, %v2238_v52  ;;  %v3911_v52 = vpack.c.bf16 %v2323_v40, %v2322_v28  ;;  %v2297_v28 = vld [vmem:[%s5565_s7 + $0x638] sm:$0xff] }
 0xa0a   : > { %v2294_v13 = vld [vmem:[%s5565_s7 + $0x620] sm:$0xff]  ;;  %v2329_v40 = vld [vmem:[%s5565_s7 + $0x738] sm:$0xff] }
 0xa0c   : > { %3828 = vmatpush3.bf16.msra.mxu1 %v3827_v25  ;;  %3860 = vmatpush3.bf16.msra.mxu0 %v3859_v26  ;;  %v3871_v25 = vpack.c.bf16 %v2271_v7, %v2270_v6  ;;  %v2240_v26 = vld [vmem:[%s5565_s7 + $0x470] sm:$0xff] }
 0xa0d   : > { %3830 = vmatprep.subr.bf16.mxu1 %v3829_v14  ;;  %3862 = vmatprep.subr.bf16.mxu0 %v3861_v12  ;;  %v1407_v14 = vrot.slane %v4960_v58, %v4309_v44  ;;  %v3873_v12 = vpack.c.bf16 %v2289_v45, %v2288_v19  ;;  %v2338_v44 = vld [vmem:[%s5565_s7 + $0x780] sm:$0xff]  ;;  %v3843_v29 = vpack.c.bf16 %v2241_v20, %v2240_v26  ;;  %v2311_v45 = vld [vmem:[%s5565_s7 + $0x6a8] sm:$0xff] }
 0xa0e   : > { %v3909_v39 = vpack.c.bf16 %v2339_v2, %v2338_v44  ;;  %v2310_v19 = vld [vmem:[%s5565_s7 + $0x6a0] sm:$0xff]  ;;  %v2327_v44 = vld [vmem:[%s5565_s7 + $0x728] sm:$0xff]  ;;  %v2312_v2 = vld [vmem:[%s5565_s7 + $0x6b0] sm:$0xff] }
 0xa0f   : > { %v3885_v55 = vpack.c.bf16 %v2311_v45, %v2310_v19  ;;  %v2332_v45 = vld [vmem:[%s5565_s7 + $0x750] sm:$0xff] }
 0xa10   : > { %3832 = vmatpush3.bf16.msra.mxu1 %v3831_v31  ;;  %3864 = vmatpush3.bf16.msra.mxu0 %v3863_v32  ;;  %v3877_v31 = vpack.c.bf16 %v2307_v46, %v2306_v43  ;;  %v2290_v32 = vld [vmem:[%s5565_s7 + $0x600] sm:$0xff] }
 0xa11   : > { %3834 = vmatprep.subr.bf16.mxu1 %v3833_v37  ;;  %3866 = vmatprep.subr.bf16.mxu0 %v3865_v38  ;;  %v1825_v37 = vadd.f32 %v4922_v35, %v1399_v23  ;;  %v1902_v38 = vadd.f32 %v4924_v36, %v1407_v14  ;;  %v1833_v35 = vadd.f32 %v4972_v0, %v5098_v63  ;;  %v2326_v46 = vld [vmem:[%s5565_s7 + $0x720] sm:$0xff] }
 0xa12   : > { %v1910_v36 = vadd.f32 %v4974_v1, %v5102_v10  ;;  %v3881_v0 = vpack.c.bf16 %v2309_v49, %v2308_v47  ;;  %v1831_v1 = vadd.f32 %v4962_v59, %v1399_v23  ;;  %v1908_v10 = vadd.f32 %v4964_v60, %v1407_v14  ;;  %v2324_v59 = vld [vmem:[%s5565_s7 + $0x710] sm:$0xff]  ;;  %v2325_v60 = vld [vmem:[%s5565_s7 + $0x718] sm:$0xff]  ;;  %v2343_v23 = vld [vmem:[%s5565_s7 + $0x7a8] sm:$0xff] }
 0xa13   : > { %v2074_v63 = vmax.f32 %v1825_v37, 0.0  ;;  %v2076_v53 = vmax.f32 %v1902_v38, 0.0  ;;  %v2091_v6 = vmax.f32 %v1833_v35, 0.0  ;;  %v3915_v20 = vpack.c.bf16 %v2325_v60, %v2324_v59  ;;  %v2295_v14 = vld [vmem:[%s5565_s7 + $0x628] sm:$0xff]  ;;  %v2314_v47 = vld [vmem:[%s5565_s7 + $0x6c0] sm:$0xff]  ;;  %v2301_v59 = vld [vmem:[%s5565_s7 + $0x658] sm:$0xff] }
 0xa14   : > { %3836 = vmatpush3.bf16.msra.mxu1 %v3835_v61  ;;  %3868 = vmatpush3.bf16.msra.mxu0 %v3867_v62  ;;  %v2341_v61 = vld [vmem:[%s5565_s7 + $0x798] sm:$0xff]  ;;  %v3879_v62 = vpack.c.bf16 %v2291_v8, %v2290_v32  ;;  %v2093_v7 = vmax.f32 %v1910_v36, 0.0  ;;  %v3917_v43 = vpack.c.bf16 %v2343_v23, %v2342_v34  ;;  %v3919_v32 = vpack.c.bf16 %v2327_v44, %v2326_v46  ;;  %v2296_v8 = vld [vmem:[%s5565_s7 + $0x630] sm:$0xff]  ;;  %v2315_v49 = vld [vmem:[%s5565_s7 + $0x6c8] sm:$0xff] }
 0xa15   : > { %3838 = vmatprep.subr.bf16.mxu1 %v3837_v3  ;;  %3870 = vmatprep.subr.bf16.mxu0 %v3869_v4  ;;  %v2292_v3 = vld [vmem:[%s5565_s7 + $0x610] sm:$0xff]  ;;  %v2293_v4 = vld [vmem:[%s5565_s7 + $0x618] sm:$0xff]  ;;  %v3913_v18 = vpack.c.bf16 %v2341_v61, %v2340_v51  ;;  %v2346_v35 = vld [vmem:[%s5565_s7 + $0x7c0] sm:$0xff]  ;;  %v3891_v51 = vpack.c.bf16 %v2297_v28, %v2296_v8  ;;  %v1415_v8 = vrot.slane %v4960_v58, %v4391_v42 }
 0xa16   : > { %v3883_v26 = vpack.c.bf16 %v2293_v4, %v2292_v3  ;;  %v2347_v36 = vld [vmem:[%s5565_s7 + $0x7c8] sm:$0xff]  ;;  %v2317_v3 = vld [vmem:[%s5565_s7 + $0x6d8] sm:$0xff]  ;;  %v2348_v4 = vld [vmem:[%s5565_s7 + $0x7d0] sm:$0xff] }
 0xa17   : > { %v2333_v34 = vld [vmem:[%s5565_s7 + $0x758] sm:$0xff]  ;;  %v2318_v23 = vld [vmem:[%s5565_s7 + $0x6e0] sm:$0xff]  ;;  %v2335_v46 = vld [vmem:[%s5565_s7 + $0x768] sm:$0xff]  ;;  %v1979_v58 = vadd.f32 %v4998_v24, %v1415_v8 }
 0xa18   : > { %3840 = vmatpush3.bf16.msra.mxu1 %v3839_v41  ;;  %3872 = vmatpush3.bf16.msra.mxu0 %v3871_v25  ;;  %v2090_v41 = vmax.f32 %v1831_v1, 0.0  ;;  %v2092_v25 = vmax.f32 %v1908_v10, 0.0  ;;  %v2331_v1 = vld [vmem:[%s5565_s7 + $0x748] sm:$0xff]  ;;  %v2316_v10 = vld [vmem:[%s5565_s7 + $0x6d0] sm:$0xff] }
 0xa19   : > { %3842 = vmatprep.subr.bf16.mxu1 %v3841_v11  ;;  %3874 = vmatprep.subr.bf16.mxu0 %v3873_v12  ;;  %v2079_v11 = vmax.f32 %v1981_v16, 0.0  ;;  %v2081_v12 = vmax.f32 %v5019_v48, 0.0  ;;  %v2313_v48 = vld [vmem:[%s5565_s7 + $0x6b8] sm:$0xff]  ;;  %v3897_v60 = vpack.c.bf16 %v2317_v3, %v2316_v10  ;;  %v2320_v44 = vld [vmem:[%s5565_s7 + $0x6f0] sm:$0xff] }
 0xa1a   : > { %v3889_v37 = vpack.c.bf16 %v2313_v48, %v2312_v2  ;;  %v2321_v2 = vld [vmem:[%s5565_s7 + $0x6f8] sm:$0xff]  ;;  %v2352_v48 = vld [vmem:[%s5565_s7 + $0x7f0] sm:$0xff] }
 0xa1b   : > { %v3905_v28 = vpack.c.bf16 %v2321_v2, %v2320_v44 }
 0xa1c   : > { %3844 = vmatpush3.bf16.msra.mxu1 %v3843_v29  ;;  %3876 = vmatpush3.bf16.msra.mxu0 %v3875_v30  ;;  %v2344_v29 = vld [vmem:[%s5565_s7 + $0x7b0] sm:$0xff]  ;;  %v2345_v30 = vld [vmem:[%s5565_s7 + $0x7b8] sm:$0xff] }
 0xa1d   : > { %3878 = vmatprep.subr.bf16.mxu1 %v3877_v31  ;;  %3910 = vmatprep.subr.bf16.mxu0 %v3909_v39  ;;  %v3887_v31 = vpack.c.bf16 %v2295_v14, %v2294_v13  ;;  %v3921_v38 = vpack.c.bf16 %v2345_v30, %v2344_v29  ;;  %v2328_v39 = vld [vmem:[%s5565_s7 + $0x730] sm:$0xff]  ;;  %v3931_v13 = vpack.c.bf16 %v2333_v34, %v2332_v45  ;;  %v2302_v14 = vld [vmem:[%s5565_s7 + $0x660] sm:$0xff]  ;;  %v2353_v29 = vld [vmem:[%s5565_s7 + $0x7f8] sm:$0xff] }
 0xa1e   : > { %v3923_v61 = vpack.c.bf16 %v2329_v40, %v2328_v39  ;;  %v2336_v39 = vld [vmem:[%s5565_s7 + $0x770] sm:$0xff]  ;;  %v2337_v40 = vld [vmem:[%s5565_s7 + $0x778] sm:$0xff] }
 0xa1f   : > { %2723 = vmatmul.mubr.f32.vlgmr.msra.gmra.mrb[34].mxu1 %v2074_v63  ;;  %2798 = vmatmul.mubr.f32.vlgmr.msra.gmra.mrb[34].mxu0 %v2076_v53  ;;  %v3925_v63 = vpack.c.bf16 %v2347_v36, %v2346_v35  ;;  %v2330_v53 = vld [vmem:[%s5565_s7 + $0x740] sm:$0xff]  ;;  %v3939_v42 = vpack.c.bf16 %v2337_v40, %v2336_v39  ;;  %v2078_v35 = vmax.f32 %v1979_v58, 0.0  ;;  %v2080_v36 = vmax.f32 %v5006_v33, 0.0 }
 0xa20   : > { %2727 = vmatprep.mubr.f32.mxu1 %v2091_v6  ;;  %2802 = vmatprep.mubr.f32.mxu0 %v2093_v7  ;;  %v2349_v6 = vld [vmem:[%s5565_s7 + $0x7d8] sm:$0xff]  ;;  %v3927_v16 = vpack.c.bf16 %v2331_v1, %v2330_v53 }
 0xa21   : > { %3880 = vmatpush3.bf16.msra.mxu1 %v3879_v62  ;;  %3912 = vmatpush3.bf16.msra.mxu0 %v3911_v52  ;;  %v2298_v62 = vld [vmem:[%s5565_s7 + $0x640] sm:$0xff]  ;;  %v2299_v52 = vld [vmem:[%s5565_s7 + $0x648] sm:$0xff]  ;;  %v3929_v19 = vpack.c.bf16 %v2349_v6, %v2348_v4 }
 0xa22   : > { %3882 = vmatprep.subr.bf16.mxu1 %v3881_v0  ;;  %3914 = vmatprep.subr.bf16.mxu0 %v3913_v18  ;;  %v3893_v0 = vpack.c.bf16 %v2315_v49, %v2314_v47  ;;  %v3895_v7 = vpack.c.bf16 %v2299_v52, %v2298_v62  ;;  %v2300_v18 = vld [vmem:[%s5565_s7 + $0x650] sm:$0xff]  ;;  %v1987_v49 = vadd.f32 %v5047_v5, %v5308_v50  ;;  %v2097_v62 = vmax.f32 %v5058_v27, 0.0 }
 0xa23   : > { %2728 = vmatmul.mubr.f32.gmra.mrb[36].mxu1 %v2090_v41  ;;  %2803 = vmatmul.mubr.f32.gmra.mrb[36].mxu0 %v2092_v25  ;;  %v2319_v41 = vld [vmem:[%s5565_s7 + $0x6e8] sm:$0xff]  ;;  %v2350_v25 = vld [vmem:[%s5565_s7 + $0x7e0] sm:$0xff]  ;;  %v2096_v52 = vmax.f32 %v5045_v54, 0.0 }
 0xa24   : > { %2872 = vmatprep.mubr.f32.mxu1 %v2079_v11  ;;  %2947 = vmatprep.mubr.f32.mxu0 %v2081_v12  ;;  %v2303_v11 = vld [vmem:[%s5565_s7 + $0x668] sm:$0xff]  ;;  %v3901_v12 = vpack.c.bf16 %v2319_v41, %v2318_v23 }
 0xa25   : > { %3884 = vmatpush3.bf16.msra.mxu1 %v3883_v26  ;;  %3916 = vmatpush3.bf16.msra.mxu0 %v3915_v20  ;;  %v2351_v26 = vld [vmem:[%s5565_s7 + $0x7e8] sm:$0xff]  ;;  %v3899_v20 = vpack.c.bf16 %v2301_v59, %v2300_v18  ;;  %v3903_v30 = vpack.c.bf16 %v2303_v11, %v2302_v14 }
 0xa26   : > { %3886 = vmatprep.subr.bf16.mxu1 %v3885_v55  ;;  %3918 = vmatprep.subr.bf16.mxu0 %v3917_v43  ;;  %v3933_v55 = vpack.c.bf16 %v2351_v26, %v2350_v25  ;;  %v2334_v43 = vld [vmem:[%s5565_s7 + $0x760] sm:$0xff] }
 0xa29   : > { %3888 = vmatpush3.bf16.msra.mxu1 %v3887_v31  ;;  %3920 = vmatpush3.bf16.msra.mxu0 %v3919_v32  ;;  %v3935_v31 = vpack.c.bf16 %v2335_v46, %v2334_v43  ;;  %v2304_v32 = vld [vmem:[%s5565_s7 + $0x670] sm:$0xff] }
 0xa2a   : > { %3890 = vmatprep.subr.bf16.mxu1 %v3889_v37  ;;  %3922 = vmatprep.subr.bf16.mxu0 %v3921_v38  ;;  %v3937_v37 = vpack.c.bf16 %v2353_v29, %v2352_v48  ;;  %v2305_v38 = vld [vmem:[%s5565_s7 + $0x678] sm:$0xff] }
 0xa2b   : > { %v3907_v47 = vpack.c.bf16 %v2305_v38, %v2304_v32 }
 0xa2d   : > { %3892 = vmatpush3.bf16.msra.mxu1 %v3891_v51  ;;  %3924 = vmatpush3.bf16.msra.mxu0 %v3923_v61  ;;  %v1985_v51 = vadd.f32 %v5034_v56, %v1415_v8  ;;  %v2095_v61 = vmax.f32 %v1987_v49, 0.0  ;;  %v5492_v56 = vld [vmem:[%s5560_s2] sm:$0xff] }
 0xa2e   : > { %3894 = vmatprep.subr.bf16.mxu1 %v3893_v0  ;;  %3926 = vmatprep.subr.bf16.mxu0 %v3925_v63  ;;  %v2357_v27 = vrot.slane %v5492_v56, %v4805_v17 }
 0xa2f   : > { %v2094_v24 = vmax.f32 %v1985_v51, 0.0 }
 0xa31   : > { %3896 = vmatpush3.bf16.msra.mxu1 %v3895_v7  ;;  %3928 = vmatpush3.bf16.msra.mxu0 %v3927_v16 }
 0xa32   : > { %3898 = vmatprep.subr.bf16.mxu1 %v3897_v60  ;;  %3930 = vmatprep.subr.bf16.mxu0 %v3929_v19 }
 0xa35   : > { %3900 = vmatpush3.bf16.msra.mxu1 %v3899_v20  ;;  %3932 = vmatpush3.bf16.msra.mxu0 %v3931_v13 }
 0xa36   : > { %3902 = vmatprep.subr.bf16.mxu1 %v3901_v12  ;;  %3934 = vmatprep.subr.bf16.mxu0 %v3933_v55 }
 0xa39   : > { %3904 = vmatpush3.bf16.msra.mxu1 %v3903_v30  ;;  %3936 = vmatpush3.bf16.msra.mxu0 %v3935_v31 }
 0xa3a   : > { %3906 = vmatprep.subr.bf16.mxu1 %v3905_v28  ;;  %3938 = vmatprep.subr.bf16.mxu0 %v3937_v37 }
 0xa3d   : > { %3908 = vmatpush3.bf16.msra.mxu1 %v3907_v47  ;;  %3940 = vmatpush3.bf16.msra.mxu0 %v3939_v42 }
 0xa3e   : > { %3600 = vmatprep.subr.mxu1 %v4082_v22 }
 0xa40   : > { %2873 = vmatmul.mubr.f32.vlgmr.msra.gmra.mrb[38].mxu1 %v2078_v35  ;;  %2948 = vmatmul.mubr.f32.vlgmr.msra.gmra.mrb[38].mxu0 %v2080_v36 }
 0xa41   : > { %2877 = vmatprep.mubr.f32.mxu1 %v2095_v61  ;;  %2952 = vmatprep.mubr.f32.mxu0 %v2097_v62 }
 0xa44   : > { %2878 = vmatmul.mubr.f32.gmra.mrb[40].mxu1 %v2094_v24  ;;  %2953 = vmatmul.mubr.f32.gmra.mrb[40].mxu0 %v2096_v52 }
 0xa45   : > { %3602 = vmatprep.mubr.msk.f32.mxu1 %vm4083_vm1, %v4082_v22 }
 0xab1   : > { %v3261_v33 = vpop.f32.mrb[26].mxu1  ;;  %v3299_v5 = vpop.f32.mrb[26].mxu0 }
 0xab2   : > { %v3262_v50 = vpop.f32.mrb[27].mxu1  ;;  %v3300_v0 = vpop.f32.mrb[27].mxu0 }
 0xab3   : > { %v3263_v63 = vadd.f32 %v3262_v50, %v3261_v33  ;;  %v3301_v53 = vadd.f32 %v3300_v0, %v3299_v5 }
 0xab5   : > { %v2425_v54 = vadd.f32 %v3263_v63, %v2357_v27  ;;  %v3264_v1 = vpop.f32.mrb[28].mxu1  ;;  %v3302_v10 = vpop.f32.mrb[28].mxu0 }
 0xab6   : > { %v3265_v3 = vpop.f32.mrb[29].mxu1  ;;  %v3303_v4 = vpop.f32.mrb[29].mxu0 }
 0xab7   : > { %v2500_v22 = vadd.f32 %v3301_v53, %v2425_v54  ;;  %v3266_v6 = vadd.f32 %v3265_v3, %v3264_v1  ;;  %v3304_v7 = vadd.f32 %v3303_v4, %v3302_v10 }
 0xab9   : > { %v2430_v16 = vadd.f32 %v3266_v6, %v2357_v27 }
 0xabb   : > { %v2505_v18 = vadd.f32 %v3304_v7, %v2430_v16 }
 0xad1   : > { %v3337_v59 = vpop.f32.mrb[30].mxu1  ;;  %v3375_v60 = vpop.f32.mrb[30].mxu0 }
 0xad2   : > { %v3338_v19 = vpop.f32.mrb[31].mxu1  ;;  %v3376_v45 = vpop.f32.mrb[31].mxu0 }
 0xad3   : > { %v3339_v34 = vadd.f32 %v3338_v19, %v3337_v59  ;;  %v3377_v17 = vadd.f32 %v3376_v45, %v3375_v60 }
 0xad5   : > { %v2575_v23 = vadd.f32 %v3339_v34, %v2500_v22  ;;  %v3340_v41 = vpop.f32.mrb[32].mxu1  ;;  %v3378_v25 = vpop.f32.mrb[32].mxu0 }
 0xad6   : > { %v3341_v26 = vpop.f32.mrb[33].mxu1  ;;  %v3379_v20 = vpop.f32.mrb[33].mxu0 }
 0xad7   : > { %v2650_v13 = vadd.f32 %v3377_v17, %v2575_v23  ;;  %v3342_v14 = vadd.f32 %v3341_v26, %v3340_v41  ;;  %v3380_v11 = vadd.f32 %v3379_v20, %v3378_v25  ;;  %v2989_v25 = vrot.slane %v5492_v56, %v4955_v57 }
 0xad8   : > { %v2995_v20 = vrot.slane %v5492_v56, %v4826_v15 }
 0xad9   : > { %v2580_v12 = vadd.f32 %v3342_v14, %v2505_v18 }
 0xadb   : > { %v2655_v55 = vadd.f32 %v3380_v11, %v2580_v12 }
 0xaf2   : > { %v3413_v43 = vpop.f32.mrb[34].mxu1  ;;  %v3451_v46 = vpop.f32.mrb[34].mxu0 }
 0xaf3   : > { %v3414_v44 = vpop.f32.mrb[35].mxu1  ;;  %v3452_v2 = vpop.f32.mrb[35].mxu0 }
 0xaf4   : > { %v3415_v48 = vadd.f32 %v3414_v44, %v3413_v43  ;;  %v3453_v29 = vadd.f32 %v3452_v2, %v3451_v46 }
 0xaf6   : > { %v2725_v30 = vadd.f32 %v3415_v48, %v2650_v13  ;;  %v3416_v31 = vpop.f32.mrb[36].mxu1  ;;  %v3454_v32 = vpop.f32.mrb[36].mxu0 }
 0xaf7   : > { %v3417_v8 = vpop.f32.mrb[37].mxu1  ;;  %v3455_v28 = vpop.f32.mrb[37].mxu0 }
 0xaf8   : > { %v2800_v37 = vadd.f32 %v3453_v29, %v2725_v30  ;;  %v3418_v38 = vadd.f32 %v3417_v8, %v3416_v31  ;;  %v3456_v39 = vadd.f32 %v3455_v28, %v3454_v32 }
 0xafa   : > { %v2730_v40 = vadd.f32 %v3418_v38, %v2655_v55 }
 0xafc   : > { %v2805_v47 = vadd.f32 %v3456_v39, %v2730_v40 }
 0xb13   : > { %v3489_v42 = vpop.f32.mrb[38].mxu1  ;;  %v3527_v58 = vpop.f32.mrb[38].mxu0 }
 0xb14   : > { %v3490_v49 = vpop.f32.mrb[39].mxu1  ;;  %v3528_v35 = vpop.f32.mrb[39].mxu0 }
 0xb15   : > { %v3491_v36 = vadd.f32 %v3490_v49, %v3489_v42  ;;  %v3529_v51 = vadd.f32 %v3528_v35, %v3527_v58 }
 0xb17   : > { %v2875_v61 = vadd.f32 %v3491_v36, %v2800_v37  ;;  %v3492_v62 = vpop.f32.mrb[40].mxu1  ;;  %v3530_v24 = vpop.f32.mrb[40].mxu0 }
 0xb18   : > { %v3493_v52 = vpop.f32.mrb[41].mxu1  ;;  %v3531_v33 = vpop.f32.mrb[41].mxu0 }
 0xb19   : > { %v2950_v5 = vadd.f32 %v3529_v51, %v2875_v61  ;;  %v3494_v27 = vadd.f32 %v3493_v52, %v3492_v62  ;;  %v3532_v50 = vadd.f32 %v3531_v33, %v3530_v24 }
 0xb1b   : > { %v2880_v0 = vadd.f32 %v3494_v27, %v2805_v47  ;;  %v2958_v63 = vadd.f32 %v2950_v5, %v4426_v21 }
 0xb1d   : > { %v2955_v53 = vadd.f32 %v3532_v50, %v2880_v0  ;;  %v2960_v54 = vsel %vm337_vm0, %v2958_v63, 0.0 }
 0xb1e   : > { %2961 = vadd.xlane.f32.xlu1 %v2960_v54 }
 0xb1f   : > { %v2959_v1 = vadd.f32 %v2955_v53, %v4456_v9  ;;  %v306_v9 = vld [vmem:[%s5560_s2 + $0x8] sm:$0xff] }
 0xb21   : > { %v2963_v10 = vsel %vm337_vm0, %v2959_v1, 0.0 }
 0xb22   : > { %2964 = vadd.xlane.f32.xlu0 %v2963_v10 }
 0xbab   : > { %v2962_v3 = vpop.xlane.xlu1 %2961 }
 0xbac   : > { %v2966_v4 = vmul.f32 0.03125, %v2962_v3 }
 0xbae   : > { %v2968_v22 = vsub.f32 %v2958_v63, %v2966_v4 }
 0xbaf   : > { %v2965_v6 = vpop.xlane.xlu0 %2964 }
 0xbb0   : > { %v2967_v7 = vmul.f32 0.03125, %v2965_v6  ;;  %v2970_v16 = vmul.f32 %v2968_v22, %v2968_v22 }
 0xbb2   : > { %v2969_v18 = vsub.f32 %v2959_v1, %v2967_v7  ;;  %v2972_v59 = vsel %vm337_vm0, %v2970_v16, 0.0 }
 0xbb3   : > { %2973 = vadd.xlane.f32.xlu1 %v2972_v59 }
 0xbb4   : > { %v2971_v21 = vmul.f32 %v2969_v18, %v2969_v18 }
 0xbb6   : > { %v2975_v60 = vsel %vm337_vm0, %v2971_v21, 0.0 }
 0xbb7   : > { %2976 = vadd.xlane.f32.xlu0 %v2975_v60 }
 0xbc4   : > { %3000 = vperm.xlu1 %3991, %v306_v9  }
 0xc40   : > { %v2974_v19 = vpop.xlane.xlu1 %2973 }
 0xc41   : > { %v2978_v45 = vmul.f32 0.03125, %v2974_v19 }
 0xc43   : > { %v2980_v34 = vadd.f32 1e-05, %v2978_v45 }
 0xc44   : > { %v2977_v17 = vpop.xlane.xlu0 %2976  ;;  %v3001_v57 = vpop.permute.xlu1 %3000 }
 0xc45   : > { %4012 = vrsqrt.f32 %v2980_v34  ;;  %v2979_v23 = vmul.f32 0.03125, %v2977_v17  ;;  %v3008_v15 = vrot.slane %v3001_v57, 1 }
 0xc47   : > { %v2981_v41 = vadd.f32 1e-05, %v2979_v23 }
 0xc49   : > { %4014 = vrsqrt.f32 %v2981_v41 }
 0xc4f   : > { %v4013_v26 = vpop.eup %4012 }
 0xc50   : > { %v2984_v13 = vmul.f32 %v4013_v26, %v2968_v22 }
 0xc52   : > { %v2990_v14 = vmul.f32 %v2989_v25, %v2984_v13 }
 0xc53   : > { %v4015_v11 = vpop.eup %4014 }
 0xc54   : > { %v2985_v12 = vmul.f32 %v4015_v11, %v2969_v18  ;;  %v2996_v55 = vadd.f32 %v2995_v20, %v2990_v14 }
 0xc56   : > { %v2991_v43 = vmul.f32 %v2989_v25, %v2985_v12  ;;  %v3004_v44 = vrot.slane %v2996_v55, 7 }
 0xc58   : > { %v2997_v46 = vadd.f32 %v2995_v20, %v2991_v43 }
 0xc5a   : > { %v3005_v2 = vrot.slane %v2997_v46, 6 }
 0xc5c   : > { %v3007_v48 = vsel %vm3006_vm4, %v3005_v2, %v3004_v44 }
 0xc5d   : > { %3601 = vmatpush3.xpose.msk.msra.mxu1 %vm337_vm0, %v3007_v48 }
 0xc60   : > { %3603 = vmatmul.mubr.msk.f32.vlgmr.msra.gmra.mrb[42].mxu1 %vm337_vm0, %v306_v9 }
 0xd33   : > { %v3080_v56 = vpop.f32.mrb[42].mxu1 }
 0xd34   : > { %v3081_v29 = vadd.f32 %v3080_v56, %v3008_v15  ;;  %v3604_v30 = vpop.f32.mrb[43].mxu1 }
 0xd36   : > { %3085 = vst.msk [vmem:[%s298_s23] sm:$0x1] %vm3084_vm5, %v3081_v29 }
 0xd37   : > { %4030 = shalt.err (!%p4027_p3)
}
 0xd38   : > { %s4031_s19 = scalar_lea.hbm %s5516_s10, 16  ;;  %s4035_s22 = scalar_lea.hbm %s5566_s8, 32 }
 0xd39   : > { %p4032_p4 = scmp.ne.s32.totalorder %s5516_s10, %s4031_s19  ;;  %p4036_p9 = scmp.lt.u32.totalorder %s5516_s10, %s5566_s8 }
 0xd3a   : > { %p4037_p10 = scmp.lt.u32.totalorder %s4035_s22, %s4031_s19  ;;  %p4039_p12 = scmp.lt.u32.totalorder %s4031_s19, %s5516_s10 }
 0xd3b   : > { %p4033_p7 = pnand %p4032_p4, %p4173_p5 }
 0xd3c   : > { %p4038_p11 = por %p4037_p10, %p4036_p9 }
 0xd3d   : > { %p4034_p8 = pneg %p4033_p7 }
 0xd3e   : > { %p4040_p13 = por %p4039_p12, %p4038_p11 }
 0xd40   : > { %p4041_p0 = pnand %p4040_p13, %p4034_p8 }
 0xd42   : > { %4044 = shalt.err (!%p4041_p0)
}
 0xd43   : > { %3943 = dma.vmem_to_hbm [thread:$0]  (%p4173_p5), %s5518_s24, 16, %s5516_s10, %s3087_s12  }
 0xd44 PF: > { %p3949_p1 = scmp.ge.s32.totalorder %s4079_s30, 2  ;;  %s3111_s26 = sand.u32 1, %s4067_s27  }
 0xd45   : > { %s3112_s13 = scalar_lea.sflag [#allocation3], %s3111_s26 }
 0xd46   : > { %p3946_p2 = pnand %p3949_p1, %p4177_p6 }
 0xd48   : > { %4062 = dma.done.wait (!%p3946_p2), %s3112_s13, 16  }
 0xd49   : > { %4064 = vsyncadd (!%p3946_p2), %s3112_s13, 4294967280  ;;  %p18_p3 = scmp.ge.s32.totalorder %s4160_s11, 4   ;;  %s5569_s27 = smov %s4071_s28 }
 0xd4a   : > { %s5570_s28 = smov %s4075_s29  ;;  %s5571_s29 = smov %s4171_s14 }
 0xd4b   : > { %s5572_s30 = smov %s4160_s11  ;;  %20 = sbr.rel (!%p18_p3) target bundleno = 3 (0x3), region = 87 }
 0xd52   :  { %3116 = vsyncpa [#allocation3], 1 }
 0xd53   :  { %3118 = vsyncpa [#allocation3 + $0x1], 1 }

// kernel: tpu_custom_call.1
= control target key start
LH: loop header
LB: loop body
LE: loop exit
PB: predicated region body
PF: predicated region fallthrough
CT: control target
= control target key end

     0   :  { %13 = vsyncpa [#allocation3], 0  ;;  %s5558_s0 = inlined_call_operand.vmem [shape: f32[32,1], index: 0, kind: input, shape index: {}]   ;;  %s5559_s1 = inlined_call_operand.vmem [shape: f32[16,32], index: 1, kind: input, shape index: {}]   ;;  %s5560_s2 = inlined_call_operand.vmem [shape: f32[16,128], index: 2, kind: input, shape index: {}]   ;;  %s5561_s3 = inlined_call_operand.vmem [shape: f32[32,96], index: 3, kind: input, shape index: {}]   ;;  %s5562_s4 = inlined_call_operand.vmem [shape: f32[32,32], index: 4, kind: input, shape index: {}]   ;;  %s5563_s5 = inlined_call_operand.vmem [shape: f32[32,2048], index: 5, kind: input, shape index: {}]   ;;  %s5564_s6 = inlined_call_operand.vmem [shape: f32[1,2048], index: 6, kind: input, shape index: {}]   ;;  %s5565_s7 = inlined_call_operand.vmem [shape: f32[2048,32], index: 7, kind: input, shape index: {}]   ;;  %s5566_s8 = inlined_call_operand.hbm [shape: f32[2,1,2], index: 8, kind: output, shape index: {}]  }
   0x1   :  { %15 = vsyncpa [#allocation3 + $0x1], 0  ;;  %s4135_s27 = smov 0   ;;  %s4137_s28 = smov 0  }
   0x2   :  { %s4139_s29 = smov 0   ;;  %s4141_s30 = smov 0  }
   0x3 LB: > { %s4156_s9 = sadd.s32 4294967295, %s4079_s30   ;;  %s3154_s10 = sadd.s32 4294967294, %s4079_s30   ;;  %s4079_s30 = sphi %s4141_s30, %s5572_s30   ;;  %s4075_s29 = sphi %s4139_s29, %s5571_s29   ;;  %s4071_s28 = sphi %s4137_s28, %s5570_s28   ;;  %s4067_s27 = sphi %s4135_s27, %s5569_s27  }
   0x4   : > { %s4160_s11 = sadd.s32 1, %s4079_s30   ;;  %s201_s12 = sadd.s32 1, %s4075_s29 }
   0x5   : > { %s198_s13 = ssub.s32 %s4079_s30, %s4160_s11  ;;  %p211_p0 = scmp.ne.s32.totalorder %s4075_s29, %s4071_s28 }
   0x6   : > { %p199_p1 = scmp.eq.s32.totalorder %s198_s13, 0  ;;  %p212_p2 = scmp.eq.s32.totalorder %s4156_s9, 1 }
   0x7   : > { %p217_p3 = scmp.ne.s32.totalorder %s4071_s28, %s4067_s27  ;;  %p218_p4 = scmp.eq.s32.totalorder %s3154_s10, 1 }
   0x8   : > { %s4171_s14 = scalar_select %p199_p1, %s4075_s29, %s201_s12  }
   0x9   : > { %p4173_p5 = por %p212_p2, %p211_p0  ;;  %p4177_p6 = por %p218_p4, %p217_p3 }
   0xa   : > { %p3157_p7 = scmp.ge.s32.totalorder %s4079_s30, 1  ;;  %p266_p8 = scmp.lt.s32.totalorder %s4079_s30, 3 }
   0xc   : > { %p267_p9 = pnand %p3157_p7, %p266_p8 }
   0xd   : > { %s3158_s17 = sshll.u32 (!%p267_p9), %s4156_s9, 1  ;;  %v4081_v0 = vmov (!%p267_p9), 0   ;;  %v329_v1 = vld [vmem:[%s5561_s3] sm:$0xff] (!%p267_p9)  ;;  %v330_v2 = vld [vmem:[%s5561_s3 + $0x8] sm:$0xff] (!%p267_p9)  ;;  %v331_v6 = vld [vmem:[%s5561_s3 + $0x10] sm:$0xff] (!%p267_p9)  ;;  %v319_v9 = vlaneseq (!%p267_p9)  ;;  %vm337_vm0 = vcmask (!%p267_p9), 261120  }
   0xe   : > { %270 = sbr.rel (%p267_p9) target bundleno = 3396 (0xd44), region = 52  ;;  %3990 = vset.pattern.permute.xlu0 (!%p267_p9), %v4081_v0  ;;  %p300_p10 = scmp.lt.s32.totalorder (!%p267_p9), %s3158_s17, 3  ;;  %3991 = vset.pattern.permute.xlu1 (!%p267_p9), %v4081_v0  ;;  %v3605_v3 = vpack.c.bf16 (!%p267_p9), %v330_v2, %v329_v1  ;;  %v332_v7 = vld [vmem:[%s5561_s3 + $0x18] sm:$0xff] (!%p267_p9)  ;;  %v4207_v12 = vld [vmem:[%s5560_s2] sm:$0xff] (!%p267_p9)  ;;  %v326_v18 = vld [vmem:[%s5559_s1 + $0x8] sm:$0xff] (!%p267_p9)  ;;  %v4082_v22 = vmov (!%p267_p9), 0.0  }
   0xf   : > { %v3609_v8 = vpack.c.bf16 (!%p267_p9), %v332_v7, %v331_v6  ;;  %v4199_v10 = vshrl.u32 (!%p267_p9), %v319_v9, 7  ;;  %v325_v15 = vld [vmem:[%s5559_s1] sm:$0xff] (!%p267_p9)  ;;  %3546 = vmatprep.subr.mxu1 (!%p267_p9), %v4082_v22  ;;  %vm4083_vm1 = vmmov (!%p267_p9), 0   ;;  %s4084_s23 = smov (!%p267_p9), 96   ;;  %vm426_vm2 = vcmask (!%p267_p9), 130048   ;;  %s4085_s24 = smov (!%p267_p9), 64  }
  0x10   : > { %3606 = vmatprep.subr.bf16.mxu0 (!%p267_p9), %v3605_v3  ;;  %3548 = vmatprep.mubr.msk.f32.mxu1 (!%p267_p9), %vm4083_vm1, %v4082_v22  ;;  %vm580_vm3 = vcmask (!%p267_p9), 64512   ;;  %s4087_s26 = smov (!%p267_p9), 112   ;;  %s4088_s10 = smov (!%p267_p9), 48   ;;  %vm3006_vm4 = vcmask (!%p267_p9), 1041409   ;;  %vm3084_vm5 = vcmask (!%p267_p9), 8192  }
  0x11   : > { %3608 = vmatpush3.bf16.msra.mxu0 (!%p267_p9), %v3605_v3  ;;  %v4202_v11 = vsub.s32 (!%p267_p9), 0, %v4199_v10  ;;  %v4232_v23 = vsub.s32 (!%p267_p9), 1, %v4199_v10  ;;  %s297_s21 = sand.u32 (!%p267_p9), 1, %s4071_s28   ;;  %s3196_s22 = sshll.u32 (!%p267_p9), %s4156_s9, 4 }
  0x12   : > { %3610 = vmatprep.subr.bf16.mxu0 (!%p267_p9), %v3609_v8  ;;  %s3087_s12 = scalar_lea.sflag (!%p267_p9), [#allocation3], %s297_s21  ;;  %s4089_s9 = smov (!%p267_p9), [#allocation2]  }
  0x13   : > { %v322_v13 = vrot.slane (!%p267_p9), %v4207_v12, %v4202_v11  ;;  %v336_v24 = vrot.slane (!%p267_p9), %v4207_v12, %v4232_v23 }
  0x15   : > { %s5574_s17 = smov (!%p300_p10, %s3158_s17), 3  ;;  %3612 = vmatpush3.bf16.msra.mxu0 %v3609_v8 }
  0x16   : > { %s3159_s18 = sshll.u32 %s5574_s17, 3  ;;  %3556 = vmatprep.subr.mxu0 %v4082_v22  ;;  %s4021_s17 = sshll.u32 %s4089_s9, 4  ;;  %s4022_s17 = int_to_ptr.vmem [resolvable:$false] %s4021_s17 }
  0x17   : > { %s303_s25 = scalar_lea.vmem %s5558_s0, %s3159_s18  ;;  %s4023_s18 = scalar_lea.vmem %s4022_s17, 32 }
  0x18   : > { %v307_v4 = vld [vmem:[%s303_s25] sm:$0xff]  ;;  %v308_v5 = vld [vmem:[%s303_s25 + $0x8] sm:$0xff]  ;;  %s4086_s25 = smov 80  }
  0x19   : > { %311 = vperm.xlu0 %3990, %v307_v4  }
  0x1d   : > { %316 = vperm.xlu0 %3990, %v308_v5  }
  0x98   : > { %v312_v14 = vpop.permute.xlu0 %311 }
  0x99   : > { %v323_v16 = vmul.f32 %v322_v13, %v312_v14 }
  0x9b   : > { %v4214_v17 = vadd.f32 %v325_v15, %v323_v16 }
  0x9c   : > { %v317_v19 = vpop.permute.xlu0 %316 }
  0x9d   : > { %v324_v20 = vmul.f32 %v322_v13, %v317_v19  ;;  %3543 = vmatprep.mubr.msk.f32.mxu0 %vm337_vm0, %v4214_v17 }
  0x9f   : > { %v4221_v21 = vadd.f32 %v326_v18, %v324_v20 }
  0xa1   : > { %3544 = vmatmul.mubr.msk.f32.vlgmr.msra.gmra.mrb[0].mxu0 %vm337_vm0, %v4221_v21 }
  0xa2   : > { %3558 = vmatprep.mubr.msk.f32.mxu0 %vm4083_vm1, %v4082_v22 }
 0x174   : > { %v3545_v25 = vpop.f32.mrb[0].mxu0 }
 0x175   : > { %v410_v26 = vpop.f32.mrb[1].mxu0  ;;  %v4239_v28 = vadd.f32 %v3545_v25, %v336_v24 }
 0x176   : > { %v4236_v27 = vadd.f32 %v410_v26, %v336_v24 }
 0x178   : > { %424 = vrot.lane.b32.xlu1 %v4236_v27, %s4084_s23 }
 0x17c   : > { %502 = vrot.lane.b32.xlu1 %v4239_v28, %s4084_s23  ;;  %s298_s23 = scalar_lea.vmem [#allocation2], %s297_s21 }
 0x1ea   : > { %v425_v29 = vpop.permute.xlu1 %424 }
 0x1eb   : > { %3547 = vmatpush3.xpose.msk.msra.mxu1 %vm426_vm2, %v425_v29 }
 0x1ec   : > { %3551 = vmatprep.subr.mxu1 %v4082_v22 }
 0x1ee   : > { %3549 = vmatmul.mubr.msk.f32.vlgmr.msra.gmra.mrb[0].mxu1 %vm426_vm2, %v4236_v27  ;;  %v503_v30 = vpop.permute.xlu1 %502 }
 0x1ef   : > { %3552 = vmatpush3.xpose.msk.msra.mxu1 %vm426_vm2, %v503_v30  ;;  %3553 = vmatprep.mubr.msk.f32.mxu1 %vm4083_vm1, %v4082_v22 }
 0x1f0   : > { %3561 = vmatprep.subr.mxu1 %v4082_v22 }
 0x1f2   : > { %3554 = vmatmul.mubr.msk.f32.vlgmr.msra.gmra.mrb[2].mxu1 %vm426_vm2, %v4239_v28 }
 0x1f3   : > { %3563 = vmatprep.mubr.msk.f32.mxu1 %vm4083_vm1, %v4082_v22 }
 0x2c1   : > { %v497_v31 = vpop.f32.mrb[0].mxu1 }
 0x2c2   : > { %v578_v32 = vmul.f32 0.25, %v497_v31  ;;  %v3550_v33 = vpop.f32.mrb[1].mxu1 }
 0x2c4   : > { %v581_v34 = vsel %vm580_vm3, %v578_v32, -inf }
 0x2c5   : > { %582 = vmax.xlane.f32.xlu0 %v581_v34  ;;  %v574_v35 = vpop.f32.mrb[2].mxu1 }
 0x2c6   : > { %v579_v36 = vmul.f32 0.25, %v574_v35  ;;  %v3555_v37 = vpop.f32.mrb[3].mxu1  ;;  %v422_v35 = vld [vmem:[%s5562_s4 + $0x18] sm:$0xff] }
 0x2c7   : > { %v419_v37 = vld [vmem:[%s5562_s4] sm:$0xff] }
 0x2c8   : > { %v584_v38 = vsel %vm580_vm3, %v579_v36, -inf }
 0x2c9   : > { %585 = vmax.xlane.f32.xlu1 %v584_v38  ;;  %v420_v38 = vld [vmem:[%s5562_s4 + $0x8] sm:$0xff] }
 0x2da   : > { %603 = vrot.lane.b32.xlu1 %v4236_v27, %s4085_s24 }
 0x2db   : > { %679 = vrot.lane.b32.xlu0 %v4239_v28, %s4085_s24  ;;  %s3099_s24 = sshll.u32 %s298_s23, 4  ;;  %s5518_s24 = int_to_ptr.vmem [resolvable:$true] %s3099_s24 }
 0x2dc   : > { %s4017_s13 = scalar_lea.vmem %s5518_s24, 16  ;;  %p4024_p0 = scmp.lt.s32.totalorder %s5518_s24, %s4022_s17 }
 0x2dd   : > { %p4018_p11 = scmp.ne.s32.totalorder %s5518_s24, %s4017_s13  ;;  %p4025_p1 = scmp.lt.s32.totalorder %s4023_s18, %s4017_s13 }
 0x2de   : > { %757 = vrot.lane.b32.xlu1 %v4236_v27, %s4086_s25 }
 0x2df   : > { %p4019_p12 = pnand %p4018_p11, %p4173_p5  ;;  %p4026_p2 = por %p4025_p1, %p4024_p0 }
 0x2e1   : > { %p4020_p13 = pneg %p4019_p12 }
 0x2e2   : > { %835 = vrot.lane.b32.xlu1 %v4239_v28, %s4086_s25 }
 0x2e3   : > { %p4027_p3 = pnand %p4026_p2, %p4020_p13 }
 0x2e6   : > { %833 = vrot.lane.b32.xlu1 %v4239_v28, %s4087_s26 }
 0x352   : > { %v583_v39 = vpop.xlane.xlu0 %582 }
 0x353   : > { %v587_v40 = vsub.f32 %v578_v32, %v583_v39  ;;  %v3617_v39 = vpack.c.bf16 %v420_v38, %v419_v37 }
 0x355   : > { %v589_v41 = vmul.f32 1.442695, %v587_v40 }
 0x356   : > { %v680_v42 = vpop.permute.xlu0 %679  ;;  %v586_v43 = vpop.xlane.xlu1 %585 }
 0x357   : > { %3992 = vpow2.f32 %v589_v41  ;;  %v588_v44 = vsub.f32 %v579_v36, %v586_v43  ;;  %3562 = vmatpush3.msra.mxu1 %v680_v42 }
 0x358   : > { %3571 = vmatprep.subr.mxu1 %v4082_v22 }
 0x359   : > { %v591_v45 = vmul.f32 1.442695, %v588_v44  ;;  %v4309_v44 = vsub.s32 2, %v4199_v10 }
 0x35a   : > { %v604_v46 = vpop.permute.xlu1 %603 }
 0x35b   : > { %3994 = vpow2.f32 %v591_v45  ;;  %3557 = vmatpush3.msra.mxu0 %v604_v46  ;;  %v1252_v45 = vrot.slane %v4207_v12, %v4309_v44 }
 0x35c   : > { %3566 = vmatprep.subr.mxu0 %v4082_v22 }
 0x35e   : > { %v758_v53 = vpop.permute.xlu1 %757 }
 0x361   : > { %v3993_v47 = vpop.eup %3992 }
 0x362   : > { %v593_v48 = vsel %vm580_vm3, %v3993_v47, 0.0  ;;  %v836_v57 = vpop.permute.xlu1 %835 }
 0x363   : > { %594 = vadd.xlane.f32.xlu0 %v593_v48 }
 0x365   : > { %v3995_v49 = vpop.eup %3994 }
 0x366   : > { %v596_v50 = vsel %vm580_vm3, %v3995_v49, 0.0  ;;  %v834_v60 = vpop.permute.xlu1 %833 }
 0x367   : > { %597 = vadd.xlane.f32.xlu0 %v596_v50 }
 0x37d   : > { %755 = vrot.lane.b32.xlu0 %v4236_v27, %s4087_s26 }
 0x3f0   : > { %v595_v51 = vpop.xlane.xlu0 %594 }
 0x3f1   : > { %3996 = vrcp.f32 %v595_v51 }
 0x3f4   : > { %v598_v52 = vpop.xlane.xlu0 %597 }
 0x3f5   : > { %3998 = vrcp.f32 %v598_v52 }
 0x3f8   : > { %v756_v59 = vpop.permute.xlu0 %755 }
 0x3fb   : > { %v3997_v54 = vpop.eup %3996 }
 0x3fc   : > { %v600_v55 = vmul.f32 %v3997_v54, %v3993_v47 }
 0x3fe   : > { %3559 = vmatmul.mubr.msk.f32.vlgmr.msra.gmra.mrb[2].mxu0 %vm580_vm3, %v600_v55 }
 0x3ff   : > { %v3999_v56 = vpop.eup %3998  ;;  %3567 = vmatpush3.xpose.msk.msra.mxu0 %vm426_vm2, %v758_v53  ;;  %3568 = vmatprep.mubr.msk.f32.mxu0 %vm4083_vm1, %v4082_v22 }
 0x400   : > { %v602_v58 = vmul.f32 %v3999_v56, %v3995_v49  ;;  %3576 = vmatprep.subr.mxu0 %v4082_v22 }
 0x402   : > { %3564 = vmatmul.mubr.msk.f32.vlgmr.msra.gmra.mrb[4].mxu1 %vm580_vm3, %v602_v58  ;;  %3569 = vmatmul.mubr.msk.f32.vlgmr.msra.gmra.mrb[4].mxu0 %vm426_vm2, %v756_v59 }
 0x403   : > { %3572 = vmatpush3.xpose.msk.msra.mxu1 %vm426_vm2, %v836_v57  ;;  %3573 = vmatprep.mubr.msk.f32.mxu1 %vm4083_vm1, %v4082_v22 }
 0x404   : > { %3581 = vmatprep.subr.mxu1 %v4082_v22  ;;  %3578 = vmatprep.mubr.msk.f32.mxu0 %vm4083_vm1, %v4082_v22 }
 0x406   : > { %3574 = vmatmul.mubr.msk.f32.vlgmr.msra.gmra.mrb[6].mxu1 %vm426_vm2, %v834_v60 }
 0x407   : > { %3583 = vmatprep.mubr.msk.f32.mxu1 %vm4083_vm1, %v4082_v22 }
 0x4d1   : > { %v675_v61 = vpop.f32.mrb[2].mxu0 }
 0x4d2   : > { %v3560_v62 = vpop.f32.mrb[3].mxu0 }
 0x4d3   : > { %v1297_v62 = vld [vmem:[%s5563_s5 + $0x8] sm:$0xff] }
 0x4d5   : > { %v751_v63 = vpop.f32.mrb[4].mxu1  ;;  %v829_v0 = vpop.f32.mrb[4].mxu0 }
 0x4d6   : > { %v911_v1 = vmul.f32 0.25, %v829_v0  ;;  %v3565_v2 = vpop.f32.mrb[5].mxu1  ;;  %v3570_v3 = vpop.f32.mrb[5].mxu0  ;;  %v1299_v0 = vld [vmem:[%s5563_s5 + $0x18] sm:$0xff] }
 0x4d7   : > { %v1315_v2 = vld [vmem:[%s5563_s5 + $0x98] sm:$0xff]  ;;  %v1296_v3 = vld [vmem:[%s5563_s5] sm:$0xff] }
 0x4d8   : > { %v913_v4 = vsel %vm580_vm3, %v911_v1, -inf }
 0x4d9   : > { %914 = vmax.xlane.f32.xlu0 %v913_v4  ;;  %v907_v5 = vpop.f32.mrb[6].mxu1  ;;  %v1312_v4 = vld [vmem:[%s5563_s5 + $0x80] sm:$0xff] }
 0x4da   : > { %v912_v6 = vmul.f32 0.25, %v907_v5  ;;  %v3575_v7 = vpop.f32.mrb[7].mxu1  ;;  %v3629_v5 = vpack.c.bf16 %v1315_v2, %v1299_v0  ;;  %v1305_v2 = vld [vmem:[%s5563_s5 + $0x48] sm:$0xff] }
 0x4db   : > { %v1298_v7 = vld [vmem:[%s5563_s5 + $0x10] sm:$0xff] }
 0x4dc   : > { %v916_v8 = vsel %vm580_vm3, %v912_v6, -inf }
 0x4dd   : > { %917 = vmax.xlane.f32.xlu1 %v916_v8  ;;  %v1314_v8 = vld [vmem:[%s5563_s5 + $0x90] sm:$0xff] }
 0x4ee   : > { %935 = vrot.lane.b32.xlu1 %v4236_v27, %s4088_s10 }
 0x566   : > { %v915_v9 = vpop.xlane.xlu0 %914 }
 0x567   : > { %v919_v13 = vsub.f32 %v911_v1, %v915_v9  ;;  %v3631_v9 = vpack.c.bf16 %v1314_v8, %v1298_v7  ;;  %v1304_v8 = vld [vmem:[%s5563_s5 + $0x40] sm:$0xff] }
 0x569   : > { %v921_v14 = vmul.f32 1.442695, %v919_v13  ;;  %v1329_v13 = vld [vmem:[%s5563_s5 + $0x108] sm:$0xff] }
 0x56a   : > { %v918_v15 = vpop.xlane.xlu1 %917 }
 0x56b   : > { %4000 = vpow2.f32 %v921_v14  ;;  %v920_v16 = vsub.f32 %v912_v6, %v918_v15  ;;  %v3623_v6 = vpack.c.bf16 %v1312_v4, %v1296_v3  ;;  %v1345_v14 = vld [vmem:[%s5563_s5 + $0x188] sm:$0xff]  ;;  %v1331_v15 = vld [vmem:[%s5563_s5 + $0x118] sm:$0xff] }
 0x56c   : > { %v1321_v3 = vld [vmem:[%s5563_s5 + $0xc8] sm:$0xff]  ;;  %v1307_v4 = vld [vmem:[%s5563_s5 + $0x58] sm:$0xff] }
 0x56d   : > { %v923_v18 = vmul.f32 1.442695, %v920_v16  ;;  %v3625_v16 = vpack.c.bf16 %v1345_v14, %v1329_v13  ;;  %v1320_v13 = vld [vmem:[%s5563_s5 + $0xc0] sm:$0xff]  ;;  %v1306_v14 = vld [vmem:[%s5563_s5 + $0x50] sm:$0xff] }
 0x56e   : > { %v936_v19 = vpop.permute.xlu1 %935 }
 0x56f   : > { %4002 = vpow2.f32 %v923_v18  ;;  %3577 = vmatpush3.msra.mxu0 %v936_v19  ;;  %v1347_v18 = vld [vmem:[%s5563_s5 + $0x198] sm:$0xff]  ;;  %v1328_v19 = vld [vmem:[%s5563_s5 + $0x100] sm:$0xff] }
 0x575   : > { %v4001_v20 = vpop.eup %4000 }
 0x576   : > { %v925_v24 = vsel %vm580_vm3, %v4001_v20, 0.0 }
 0x577   : > { %926 = vadd.xlane.f32.xlu0 %v925_v24  ;;  %v3633_v24 = vpack.c.bf16 %v1347_v18, %v1331_v15  ;;  %v1322_v15 = vld [vmem:[%s5563_s5 + $0xd0] sm:$0xff] }
 0x579   : > { %v4003_v25 = vpop.eup %4002 }
 0x57a   : > { %v928_v26 = vsel %vm580_vm3, %v4003_v25, 0.0 }
 0x57b   : > { %929 = vadd.xlane.f32.xlu0 %v928_v26  ;;  %v1330_v26 = vld [vmem:[%s5563_s5 + $0x110] sm:$0xff] }
 0x591   : > { %1011 = vrot.lane.b32.xlu0 %v4239_v28, %s4088_s10  ;;  %v421_v28 = vld [vmem:[%s5562_s4 + $0x10] sm:$0xff]  ;;  %s5516_s10 = scalar_lea.hbm %s5566_s8, %s3196_s22 }
 0x592   : > { %v3613_v36 = vpack.c.bf16 %v422_v35, %v421_v28 }
 0x594   : > { %3614 = vmatprep.subr.bf16.mxu0 %v3613_v36 }
 0x604   : > { %v927_v27 = vpop.xlane.xlu0 %926 }
 0x605   : > { %4004 = vrcp.f32 %v927_v27  ;;  %v1346_v27 = vld [vmem:[%s5563_s5 + $0x190] sm:$0xff] }
 0x608   : > { %v930_v29 = vpop.xlane.xlu0 %929 }
 0x609   : > { %4006 = vrcp.f32 %v930_v29  ;;  %v3635_v29 = vpack.c.bf16 %v1346_v27, %v1330_v26  ;;  %v3655_v26 = vpack.c.bf16 %v1320_v13, %v1304_v8  ;;  %v3663_v27 = vpack.c.bf16 %v1322_v15, %v1306_v14  ;;  %v2117_v8 = vld [vmem:[%s5565_s7 + $0x98] sm:$0xff]  ;;  %v2148_v13 = vld [vmem:[%s5565_s7 + $0x190] sm:$0xff] }
 0x60a   : > { %v2149_v14 = vld [vmem:[%s5565_s7 + $0x198] sm:$0xff] }
 0x60c   : > { %v1012_v30 = vpop.permute.xlu0 %1011 }
 0x60d   : > { %3582 = vmatpush3.msra.mxu1 %v1012_v30  ;;  %v1301_v30 = vld [vmem:[%s5563_s5 + $0x28] sm:$0xff] }
 0x60f   : > { %v4005_v31 = vpop.eup %4004 }
 0x610   : > { %v932_v32 = vmul.f32 %v4005_v31, %v4001_v20  ;;  %v1344_v20 = vld [vmem:[%s5563_s5 + $0x180] sm:$0xff]  ;;  %v1317_v31 = vld [vmem:[%s5563_s5 + $0xa8] sm:$0xff] }
 0x612   : > { %3579 = vmatmul.mubr.msk.f32.vlgmr.msra.gmra.mrb[6].mxu0 %vm580_vm3, %v932_v32  ;;  %v1303_v32 = vld [vmem:[%s5563_s5 + $0x38] sm:$0xff] }
 0x613   : > { %v4007_v33 = vpop.eup %4006  ;;  %3616 = vmatpush3.bf16.msra.mxu0 %v3613_v36 }
 0x614   : > { %v934_v34 = vmul.f32 %v4007_v33, %v4003_v25  ;;  %3618 = vmatprep.subr.bf16.mxu0 %v3617_v39  ;;  %v3627_v25 = vpack.c.bf16 %v1344_v20, %v1328_v19  ;;  %v3637_v33 = vpack.c.bf16 %v1317_v31, %v1301_v30  ;;  %v1337_v19 = vld [vmem:[%s5563_s5 + $0x148] sm:$0xff]  ;;  %v1352_v30 = vld [vmem:[%s5563_s5 + $0x1c0] sm:$0xff]  ;;  %v1338_v31 = vld [vmem:[%s5563_s5 + $0x150] sm:$0xff] }
 0x615   : > { %v1353_v20 = vld [vmem:[%s5563_s5 + $0x1c8] sm:$0xff] }
 0x616   : > { %3584 = vmatmul.mubr.msk.f32.vlgmr.msra.gmra.mrb[8].mxu1 %vm580_vm3, %v934_v34  ;;  %v1319_v34 = vld [vmem:[%s5563_s5 + $0xb8] sm:$0xff] }
 0x617   : > { %1514 = vmatprep.mubr.f32.mxu1 %v4082_v22  ;;  %v3645_v28 = vpack.c.bf16 %v1319_v34, %v1303_v32  ;;  %v1354_v32 = vld [vmem:[%s5563_s5 + $0x1d0] sm:$0xff] }
 0x6e5   : > { %v1007_v40 = vpop.f32.mrb[6].mxu0 }
 0x6e6   : > { %v3580_v41 = vpop.f32.mrb[7].mxu0  ;;  %3590 = vmatprep.mubr.msk.f32.mxu0 %vm426_vm2, %v1007_v40 }
 0x6e7   : > { %v4388_v41 = vsub.s32 3, %v4199_v10 }
 0x6e9   : > { %v1083_v42 = vpop.f32.mrb[8].mxu1 }
 0x6ea   : > { %v3585_v43 = vpop.f32.mrb[9].mxu1  ;;  %3591 = vmatmul.mubr.msk.f32.vlgmr.msra.gmra.mrb[8].mxu0 %vm426_vm2, %v1083_v42  ;;  %v4391_v42 = vsub.s32 4, %v4199_v10 }
 0x6eb   : > { %3597 = vmatprep.mubr.msk.f32.mxu0 %vm426_vm2, %v675_v61  ;;  %3620 = vmatpush3.bf16.msra.mxu0 %v3617_v39 }
 0x6ec   : > { %3630 = vmatprep.subr.bf16.mxu0 %v3629_v5  ;;  %v1323_v5 = vld [vmem:[%s5563_s5 + $0xd8] sm:$0xff] }
 0x6ed   : > { %v3661_v18 = vpack.c.bf16 %v1323_v5, %v1307_v4  ;;  %v2130_v5 = vld [vmem:[%s5565_s7 + $0x100] sm:$0xff] }
 0x6f2   : > { %3598 = vmatmul.mubr.msk.f32.vlgmr.msra.gmra.mrb[8].mxu0 %vm426_vm2, %v751_v63  ;;  %v1313_v63 = vld [vmem:[%s5563_s5 + $0x88] sm:$0xff] }
 0x6f3   : > { %1591 = vmatprep.mubr.f32.mxu0 %v4082_v22  ;;  %v3621_v1 = vpack.c.bf16 %v1313_v63, %v1297_v62  ;;  %3632 = vmatpush1.bf16.msra.mxu0 %v3631_v9  ;;  %v1334_v62 = vld [vmem:[%s5563_s5 + $0x130] sm:$0xff] }
 0x6f4   : > { %3634 = vmatprep.subr.bf16.mxu0 %v3633_v24  ;;  %v1350_v63 = vld [vmem:[%s5563_s5 + $0x1b0] sm:$0xff]  ;;  %v1339_v24 = vld [vmem:[%s5563_s5 + $0x158] sm:$0xff] }
 0x6f5   : > { %3622 = vmatprep.subr.bf16.mxu1 %v3621_v1  ;;  %v3651_v7 = vpack.c.bf16 %v1350_v63, %v1334_v62  ;;  %v2147_v62 = vld [vmem:[%s5565_s7 + $0x188] sm:$0xff] }
 0x6f6   : > { %3624 = vmatpush1.bf16.msra.mxu1 %v3623_v6 }
 0x6f7   : > { %3626 = vmatprep.subr.bf16.mxu1 %v3625_v16  ;;  %3636 = vmatpush1.bf16.msra.mxu0 %v3635_v29  ;;  %v3653_v16 = vpack.c.bf16 %v1321_v3, %v1305_v2  ;;  %v1336_v29 = vld [vmem:[%s5563_s5 + $0x140] sm:$0xff]  ;;  %v2099_v2 = vld [vmem:[%s5565_s7 + $0x8] sm:$0xff] }
 0x6f8   : > { %3646 = vmatprep.subr.bf16.mxu0 %v3645_v28  ;;  %v1309_v28 = vld [vmem:[%s5563_s5 + $0x68] sm:$0xff] }
 0x6fa   : > { %3628 = vmatpush1.bf16.msra.mxu1 %v3627_v25  ;;  %v1355_v25 = vld [vmem:[%s5563_s5 + $0x1d8] sm:$0xff] }
 0x6fb   : > { %3638 = vmatprep.subr.bf16.mxu1 %v3637_v33  ;;  %v3657_v33 = vpack.c.bf16 %v1353_v20, %v1337_v19  ;;  %v3665_v34 = vpack.c.bf16 %v1355_v25, %v1339_v24  ;;  %v2101_v19 = vld [vmem:[%s5565_s7 + $0x18] sm:$0xff]  ;;  %v3721_v24 = vpack.c.bf16 %v2149_v14, %v2148_v13  ;;  %v2132_v25 = vld [vmem:[%s5565_s7 + $0x110] sm:$0xff] }
 0x6fc   : > { %v2140_v14 = vld [vmem:[%s5565_s7 + $0x150] sm:$0xff] }
 0x7c5   : > { %v3599_v46 = vpop.f32.mrb[8].mxu0 }
 0x7c6   : > { %v1254_v47 = vadd.f32 %v3599_v46, %v1252_v45  ;;  %v1240_v48 = vpop.f32.mrb[9].mxu0 }
 0x7c7   : > { %v1253_v49 = vadd.f32 %v1252_v45, %v1240_v48  ;;  %v1287_v45 = vrot.slane %v4207_v12, %v4388_v41  ;;  %v1293_v48 = vrot.slane %v4207_v12, %v4391_v42  ;;  %v1333_v12 = vld [vmem:[%s5563_s5 + $0x128] sm:$0xff] }
 0x7c8   : > { %v1256_v50 = vadd.f32 %v1254_v47, %v4221_v21  ;;  %v1300_v47 = vld [vmem:[%s5563_s5 + $0x20] sm:$0xff] }
 0x7c9   : > { %v1255_v51 = vadd.f32 %v1253_v49, %v4214_v17 }
 0x7ca   : > { %v1260_v52 = vsel %vm337_vm0, %v1256_v50, 0.0 }
 0x7cb   : > { %1261 = vadd.xlane.f32.xlu0 %v1260_v52  ;;  %v1257_v53 = vsel %vm337_vm0, %v1255_v51, 0.0  ;;  %v1302_v52 = vld [vmem:[%s5563_s5 + $0x30] sm:$0xff] }
 0x7cc   : > { %1258 = vadd.xlane.f32.xlu1 %v1257_v53  ;;  %v1318_v53 = vld [vmem:[%s5563_s5 + $0xb0] sm:$0xff] }
 0x858   : > { %v1262_v54 = vpop.xlane.xlu0 %1261 }
 0x859   : > { %v1265_v55 = vmul.f32 0.03125, %v1262_v54  ;;  %v1259_v56 = vpop.xlane.xlu1 %1258 }
 0x85a   : > { %v1264_v57 = vmul.f32 0.03125, %v1259_v56  ;;  %v1335_v56 = vld [vmem:[%s5563_s5 + $0x138] sm:$0xff] }
 0x85b   : > { %v4317_v58 = vsub.f32 %v1256_v50, %v1265_v55  ;;  %v1349_v55 = vld [vmem:[%s5563_s5 + $0x1a8] sm:$0xff] }
 0x85c   : > { %v4319_v59 = vsub.f32 %v1255_v51, %v1264_v57  ;;  %v1316_v51 = vld [vmem:[%s5563_s5 + $0xa0] sm:$0xff]  ;;  %v1351_v57 = vld [vmem:[%s5563_s5 + $0x1b8] sm:$0xff]  ;;  %v3641_v0 = vpack.c.bf16 %v1349_v55, %v1333_v12 }
 0x85d   : > { %v1269_v60 = vmul.f32 %v4317_v58, %v4317_v58  ;;  %v3649_v1 = vpack.c.bf16 %v1351_v57, %v1335_v56  ;;  %v1356_v55 = vld [vmem:[%s5563_s5 + $0x1e0] sm:$0xff]  ;;  %v1342_v56 = vld [vmem:[%s5563_s5 + $0x170] sm:$0xff] }
 0x85e   : > { %v1268_v17 = vmul.f32 %v4319_v59, %v4319_v59  ;;  %v1358_v57 = vld [vmem:[%s5563_s5 + $0x1f0] sm:$0xff] }
 0x85f   : > { %v1273_v21 = vsel %vm337_vm0, %v1269_v60, 0.0  ;;  %v1332_v60 = vld [vmem:[%s5563_s5 + $0x120] sm:$0xff] }
 0x860   : > { %1274 = vadd.xlane.f32.xlu0 %v1273_v21  ;;  %v1270_v61 = vsel %vm337_vm0, %v1268_v17, 0.0 }
 0x861   : > { %1271 = vadd.xlane.f32.xlu1 %v1270_v61  ;;  %v1348_v61 = vld [vmem:[%s5563_s5 + $0x1a0] sm:$0xff] }
 0x862   : > { %v3643_v6 = vpack.c.bf16 %v1348_v61, %v1332_v60  ;;  %v2114_v60 = vld [vmem:[%s5565_s7 + $0x80] sm:$0xff] }
 0x863   : > { %v2146_v61 = vld [vmem:[%s5565_s7 + $0x180] sm:$0xff] }
 0x864   : > { %v3717_v4 = vpack.c.bf16 %v2147_v62, %v2146_v61  ;;  %v2138_v62 = vld [vmem:[%s5565_s7 + $0x140] sm:$0xff] }
 0x8ed   : > { %v1275_v35 = vpop.xlane.xlu0 %1274 }
 0x8ee   : > { %v1277_v36 = vmul.f32 0.03125, %v1275_v35  ;;  %v1272_v37 = vpop.xlane.xlu1 %1271  ;;  %v1325_v35 = vld [vmem:[%s5563_s5 + $0xe8] sm:$0xff] }
 0x8ef   : > { %v1276_v38 = vmul.f32 0.03125, %v1272_v37  ;;  %v1327_v37 = vld [vmem:[%s5563_s5 + $0xf8] sm:$0xff] }
 0x8f0   : > { %v1279_v39 = vadd.f32 1e-05, %v1277_v36  ;;  %v1311_v36 = vld [vmem:[%s5563_s5 + $0x78] sm:$0xff] }
 0x8f1   : > { %v1278_v40 = vadd.f32 1e-05, %v1276_v38  ;;  %v3659_v38 = vpack.c.bf16 %v1352_v30, %v1336_v29  ;;  %v2119_v29 = vld [vmem:[%s5565_s7 + $0xa8] sm:$0xff]  ;;  %v2150_v30 = vld [vmem:[%s5565_s7 + $0x1a0] sm:$0xff] }
 0x8f2   : > { %4008 = vrsqrt.f32 %v1279_v39  ;;  %v3667_v39 = vpack.c.bf16 %v1354_v32, %v1338_v31  ;;  %v2151_v31 = vld [vmem:[%s5565_s7 + $0x1a8] sm:$0xff] }
 0x8f3   : > { %4010 = vrsqrt.f32 %v1278_v40  ;;  %v1308_v40 = vld [vmem:[%s5563_s5 + $0x60] sm:$0xff] }
 0x8fc   : > { %v4009_v43 = vpop.eup %4008 }
 0x8fd   : > { %v4011_v46 = vpop.eup %4010  ;;  %v1283_v49 = vmul.f32 %v4009_v43, %v4317_v58  ;;  %v3639_v58 = vpack.c.bf16 %v1316_v51, %v1300_v47  ;;  %v1324_v43 = vld [vmem:[%s5563_s5 + $0xe0] sm:$0xff]  ;;  %v3669_v47 = vpack.c.bf16 %v1325_v35, %v1309_v28  ;;  %v1343_v51 = vld [vmem:[%s5563_s5 + $0x178] sm:$0xff]  ;;  %v2103_v28 = vld [vmem:[%s5565_s7 + $0x28] sm:$0xff] }
 0x8fe   : > { %v1282_v50 = vmul.f32 %v4011_v46, %v4319_v59  ;;  %v3647_v59 = vpack.c.bf16 %v1318_v53, %v1302_v52  ;;  %v1326_v46 = vld [vmem:[%s5563_s5 + $0xf0] sm:$0xff]  ;;  %v1359_v52 = vld [vmem:[%s5563_s5 + $0x1f8] sm:$0xff]  ;;  %v3671_v53 = vpack.c.bf16 %v1324_v43, %v1308_v40 }
 0x8ff   : > { %v1289_v17 = vmul.f32 %v1287_v45, %v1283_v49  ;;  %v1341_v49 = vld [vmem:[%s5563_s5 + $0x168] sm:$0xff]  ;;  %v2121_v40 = vld [vmem:[%s5565_s7 + $0xb8] sm:$0xff]  ;;  %v2152_v43 = vld [vmem:[%s5565_s7 + $0x1b0] sm:$0xff] }
 0x900   : > { %v1288_v54 = vmul.f32 %v1287_v45, %v1282_v50  ;;  %v1310_v45 = vld [vmem:[%s5563_s5 + $0x70] sm:$0xff]  ;;  %v1357_v50 = vld [vmem:[%s5563_s5 + $0x1e8] sm:$0xff] }
 0x901   : > { %v4456_v9 = vadd.f32 %v1293_v48, %v1289_v17  ;;  %v3679_v12 = vpack.c.bf16 %v1326_v46, %v1310_v45  ;;  %v2115_v17 = vld [vmem:[%s5565_s7 + $0x88] sm:$0xff]  ;;  %v2153_v45 = vld [vmem:[%s5565_s7 + $0x1b8] sm:$0xff] }
 0x902   : > { %v4426_v21 = vadd.f32 %v1293_v48, %v1288_v54  ;;  %v3677_v48 = vpack.c.bf16 %v1327_v37, %v1311_v36  ;;  %v1340_v54 = vld [vmem:[%s5563_s5 + $0x160] sm:$0xff]  ;;  %v3685_v3 = vpack.c.bf16 %v2115_v17, %v2114_v60  ;;  %v3725_v36 = vpack.c.bf16 %v2151_v31, %v2150_v30  ;;  %v2107_v60 = vld [vmem:[%s5565_s7 + $0x48] sm:$0xff] }
 0x903   : > { %v3675_v63 = vpack.c.bf16 %v1356_v55, %v1340_v54  ;;  %v2134_v37 = vld [vmem:[%s5565_s7 + $0x120] sm:$0xff]  ;;  %v2123_v54 = vld [vmem:[%s5565_s7 + $0xc8] sm:$0xff] }
 0x904   : > { %3178 = vmatmul.mubr.msk.f32.vlgmr.msra.gmra.mrb[10].mxu1 %vm337_vm0, %v4426_v21  ;;  %3180 = vmatmul.mubr.msk.f32.vlgmr.msra.gmra.mrb[10].mxu0 %vm337_vm0, %v4426_v21  ;;  %v2154_v55 = vld [vmem:[%s5565_s7 + $0x1c0] sm:$0xff]  ;;  %v2111_v30 = vld [vmem:[%s5565_s7 + $0x68] sm:$0xff] }
 0x905   : > { %3640 = vmatpush1.bf16.msra.mxu1 %v3639_v58  ;;  %3648 = vmatpush1.bf16.msra.mxu0 %v3647_v59  ;;  %v3673_v58 = vpack.c.bf16 %v1357_v50, %v1341_v49  ;;  %v3681_v59 = vpack.c.bf16 %v1359_v52, %v1343_v51  ;;  %v2105_v49 = vld [vmem:[%s5565_s7 + $0x38] sm:$0xff]  ;;  %v3729_v51 = vpack.c.bf16 %v2153_v45, %v2152_v43  ;;  %v2136_v52 = vld [vmem:[%s5565_s7 + $0x130] sm:$0xff]  ;;  %v2142_v31 = vld [vmem:[%s5565_s7 + $0x160] sm:$0xff] }
 0x906   : > { %1520 = vmatprep.mubr.f32.mxu1 %v4082_v22  ;;  %1597 = vmatprep.mubr.f32.mxu0 %v4082_v22 }
 0x907   : > { %3642 = vmatprep.subr.bf16.mxu1 %v3641_v0  ;;  %3650 = vmatprep.subr.bf16.mxu0 %v3649_v1  ;;  %v3683_v0 = vpack.c.bf16 %v1358_v57, %v1342_v56  ;;  %v2098_v1 = vld [vmem:[%s5565_s7] sm:$0xff]  ;;  %v2155_v56 = vld [vmem:[%s5565_s7 + $0x1c8] sm:$0xff] }
 0x908   : > { %3179 = vmatmul.mubr.msk.f32.gmra.mrb[12].mxu1 %vm337_vm0, %v4456_v9  ;;  %3181 = vmatmul.mubr.msk.f32.gmra.mrb[12].mxu0 %vm337_vm0, %v4456_v9  ;;  %v3687_v15 = vpack.c.bf16 %v2099_v2, %v2098_v1  ;;  %v3733_v61 = vpack.c.bf16 %v2155_v56, %v2154_v55  ;;  %v2125_v1 = vld [vmem:[%s5565_s7 + $0xd8] sm:$0xff]  ;;  %v2156_v2 = vld [vmem:[%s5565_s7 + $0x1d0] sm:$0xff] }
 0x909   : > { %3644 = vmatpush1.bf16.msra.mxu1 %v3643_v6  ;;  %3652 = vmatpush1.bf16.msra.mxu0 %v3651_v7  ;;  %v2131_v6 = vld [vmem:[%s5565_s7 + $0x108] sm:$0xff]  ;;  %v2116_v7 = vld [vmem:[%s5565_s7 + $0x90] sm:$0xff] }
 0x90a   : > { %1668 = vmatprep.mubr.f32.mxu1 %v4082_v22  ;;  %1745 = vmatprep.mubr.f32.mxu0 %v4082_v22  ;;  %v3689_v20 = vpack.c.bf16 %v2117_v8, %v2116_v7  ;;  %v2109_v7 = vld [vmem:[%s5565_s7 + $0x58] sm:$0xff] }
 0x90b   : > { %3654 = vmatprep.subr.bf16.mxu1 %v3653_v16  ;;  %3662 = vmatprep.subr.bf16.mxu0 %v3661_v18  ;;  %v3719_v16 = vpack.c.bf16 %v2131_v6, %v2130_v5  ;;  %v2100_v18 = vld [vmem:[%s5565_s7 + $0x10] sm:$0xff] }
 0x90c   : > { %3182 = vmatmul.mubr.msk.f32.vlgmr.msra.gmra.mrb[14].mxu1 %vm337_vm0, %v4426_v21  ;;  %3184 = vmatmul.mubr.msk.f32.vlgmr.msra.gmra.mrb[14].mxu0 %vm337_vm0, %v4426_v21  ;;  %v3691_v32 = vpack.c.bf16 %v2101_v19, %v2100_v18  ;;  %v2108_v6 = vld [vmem:[%s5565_s7 + $0x50] sm:$0xff]  ;;  %v2127_v18 = vld [vmem:[%s5565_s7 + $0xe8] sm:$0xff]  ;;  %v2158_v19 = vld [vmem:[%s5565_s7 + $0x1e0] sm:$0xff] }
 0x90d   : > { %3656 = vmatpush1.bf16.msra.mxu1 %v3655_v26  ;;  %3664 = vmatpush1.bf16.msra.mxu0 %v3663_v27  ;;  %v2133_v26 = vld [vmem:[%s5565_s7 + $0x118] sm:$0xff]  ;;  %v2118_v27 = vld [vmem:[%s5565_s7 + $0xa0] sm:$0xff] }
 0x90e   : > { %1674 = vmatprep.mubr.f32.mxu1 %v4082_v22  ;;  %1751 = vmatprep.mubr.f32.mxu0 %v4082_v22  ;;  %v3693_v35 = vpack.c.bf16 %v2119_v29, %v2118_v27 }
 0x90f   : > { %3658 = vmatprep.subr.bf16.mxu1 %v3657_v33  ;;  %3666 = vmatprep.subr.bf16.mxu0 %v3665_v34  ;;  %v3723_v33 = vpack.c.bf16 %v2133_v26, %v2132_v25  ;;  %v2102_v34 = vld [vmem:[%s5565_s7 + $0x20] sm:$0xff] }
 0x910   : > { %3183 = vmatmul.mubr.msk.f32.gmra.mrb[16].mxu1 %vm337_vm0, %v4456_v9  ;;  %3185 = vmatmul.mubr.msk.f32.gmra.mrb[16].mxu0 %vm337_vm0, %v4456_v9  ;;  %v3695_v46 = vpack.c.bf16 %v2103_v28, %v2102_v34  ;;  %v2110_v26 = vld [vmem:[%s5565_s7 + $0x60] sm:$0xff]  ;;  %v2128_v28 = vld [vmem:[%s5565_s7 + $0xf0] sm:$0xff] }
 0x911   : > { %3660 = vmatpush1.bf16.msra.mxu1 %v3659_v38  ;;  %3668 = vmatpush1.bf16.msra.mxu0 %v3667_v39  ;;  %v2135_v38 = vld [vmem:[%s5565_s7 + $0x128] sm:$0xff]  ;;  %v2120_v39 = vld [vmem:[%s5565_s7 + $0xb0] sm:$0xff] }
 0x912   : > { %1822 = vmatprep.mubr.f32.mxu1 %v4082_v22  ;;  %1899 = vmatprep.mubr.f32.mxu0 %v4082_v22  ;;  %v3697_v50 = vpack.c.bf16 %v2121_v40, %v2120_v39  ;;  %v2112_v39 = vld [vmem:[%s5565_s7 + $0x70] sm:$0xff]  ;;  %v2113_v40 = vld [vmem:[%s5565_s7 + $0x78] sm:$0xff] }
 0x913   : > { %3670 = vmatprep.subr.bf16.mxu1 %v3669_v47  ;;  %3678 = vmatprep.subr.bf16.mxu0 %v3677_v48  ;;  %v3727_v47 = vpack.c.bf16 %v2135_v38, %v2134_v37  ;;  %v2104_v48 = vld [vmem:[%s5565_s7 + $0x30] sm:$0xff]  ;;  %v2161_v38 = vld [vmem:[%s5565_s7 + $0x1f8] sm:$0xff]  ;;  %v3715_v45 = vpack.c.bf16 %v2113_v40, %v2112_v39  ;;  %v2182_v39 = vld [vmem:[%s5565_s7 + $0x2a0] sm:$0xff] }
 0x914   : > { %3186 = vmatmul.mubr.msk.f32.vlgmr.msra.gmra.mrb[18].mxu1 %vm337_vm0, %v4426_v21  ;;  %3188 = vmatmul.mubr.msk.f32.vlgmr.msra.gmra.mrb[18].mxu0 %vm337_vm0, %v4426_v21  ;;  %v3699_v57 = vpack.c.bf16 %v2105_v49, %v2104_v48  ;;  %v2178_v49 = vld [vmem:[%s5565_s7 + $0x280] sm:$0xff] }
 0x915   : > { %3672 = vmatpush1.bf16.msra.mxu1 %v3671_v53  ;;  %3680 = vmatpush1.bf16.msra.mxu0 %v3679_v12  ;;  %v2137_v53 = vld [vmem:[%s5565_s7 + $0x138] sm:$0xff]  ;;  %v2122_v12 = vld [vmem:[%s5565_s7 + $0xc0] sm:$0xff] }
 0x916   : > { %1828 = vmatprep.mubr.f32.mxu1 %v4082_v22  ;;  %1905 = vmatprep.mubr.f32.mxu0 %v4082_v22  ;;  %v3701_v17 = vpack.c.bf16 %v2123_v54, %v2122_v12  ;;  %v4788_v54 = vld [vmem:[%s5564_s6] sm:$0xff] }
 0x917   : > { %3674 = vmatprep.subr.bf16.mxu1 %v3673_v58  ;;  %3682 = vmatprep.subr.bf16.mxu0 %v3681_v59  ;;  %v3731_v58 = vpack.c.bf16 %v2137_v53, %v2136_v52  ;;  %v2106_v59 = vld [vmem:[%s5565_s7 + $0x40] sm:$0xff]  ;;  %v2211_v53 = vld [vmem:[%s5565_s7 + $0x388] sm:$0xff]  ;;  %v1367_v55 = vrot.slane %v4788_v54, %v4202_v11  ;;  %v1375_v56 = vrot.slane %v4788_v54, %v4309_v44 }
 0x918   : > { %3187 = vmatmul.mubr.msk.f32.gmra.mrb[20].mxu1 %vm337_vm0, %v4456_v9  ;;  %3189 = vmatmul.mubr.msk.f32.gmra.mrb[20].mxu0 %vm337_vm0, %v4456_v9 }
 0x919   : > { %3676 = vmatpush1.bf16.msra.mxu1 %v3675_v63  ;;  %3684 = vmatpush1.bf16.msra.mxu0 %v3683_v0  ;;  %v2139_v63 = vld [vmem:[%s5565_s7 + $0x148] sm:$0xff]  ;;  %v2124_v0 = vld [vmem:[%s5565_s7 + $0xd0] sm:$0xff] }
 0x91a   : > { %1976 = vmatprep.mubr.f32.mxu1 %v4082_v22  ;;  %2053 = vmatprep.mubr.f32.mxu0 %v4082_v22  ;;  %v3735_v5 = vpack.c.bf16 %v2139_v63, %v2138_v62  ;;  %v3705_v8 = vpack.c.bf16 %v2125_v1, %v2124_v0  ;;  %v2194_v63 = vld [vmem:[%s5565_s7 + $0x300] sm:$0xff]  ;;  %v2195_v0 = vld [vmem:[%s5565_s7 + $0x308] sm:$0xff]  ;;  %v2180_v1 = vld [vmem:[%s5565_s7 + $0x290] sm:$0xff] }
 0x91b   : > { %3686 = vmatprep.subr.bf16.mxu1 %v3685_v3  ;;  %3718 = vmatprep.subr.bf16.mxu0 %v3717_v4  ;;  %v2157_v3 = vld [vmem:[%s5565_s7 + $0x1d8] sm:$0xff]  ;;  %v3703_v4 = vpack.c.bf16 %v2107_v60, %v2106_v59  ;;  %v2162_v59 = vld [vmem:[%s5565_s7 + $0x200] sm:$0xff]  ;;  %v2163_v60 = vld [vmem:[%s5565_s7 + $0x208] sm:$0xff] }
 0x91c   : > { %3190 = vmatmul.mubr.msk.f32.vlgmr.msra.gmra.mrb[22].mxu1 %vm337_vm0, %v4426_v21  ;;  %3192 = vmatmul.mubr.msk.f32.vlgmr.msra.gmra.mrb[22].mxu0 %vm337_vm0, %v4426_v21  ;;  %v3737_v13 = vpack.c.bf16 %v2157_v3, %v2156_v2 }
 0x91d   : > { %1982 = vmatprep.mubr.f32.mxu1 %v4082_v22  ;;  %2059 = vmatprep.mubr.f32.mxu0 %v4082_v22 }
 0x91e   : > { %3688 = vmatpush3.bf16.msra.mxu1 %v3687_v15  ;;  %3720 = vmatpush3.bf16.msra.mxu0 %v3719_v16  ;;  %v2141_v15 = vld [vmem:[%s5565_s7 + $0x158] sm:$0xff]  ;;  %v2126_v16 = vld [vmem:[%s5565_s7 + $0xe0] sm:$0xff] }
 0x91f   : > { %3690 = vmatprep.subr.bf16.mxu1 %v3689_v20  ;;  %3722 = vmatprep.subr.bf16.mxu0 %v3721_v24  ;;  %v2159_v20 = vld [vmem:[%s5565_s7 + $0x1e8] sm:$0xff]  ;;  %v3707_v24 = vpack.c.bf16 %v2109_v7, %v2108_v6  ;;  %v3739_v25 = vpack.c.bf16 %v2141_v15, %v2140_v14  ;;  %v3709_v27 = vpack.c.bf16 %v2127_v18, %v2126_v16  ;;  %v2181_v6 = vld [vmem:[%s5565_s7 + $0x298] sm:$0xff]  ;;  %v2212_v7 = vld [vmem:[%s5565_s7 + $0x390] sm:$0xff]  ;;  %v4826_v15 = vsub.s32 7, %v4199_v10 }
 0x920   : > { %3191 = vmatmul.mubr.msk.f32.gmra.mrb[24].mxu1 %vm337_vm0, %v4456_v9  ;;  %3193 = vmatmul.mubr.msk.f32.gmra.mrb[24].mxu0 %vm337_vm0, %v4456_v9  ;;  %v3741_v29 = vpack.c.bf16 %v2159_v20, %v2158_v19  ;;  %v3751_v16 = vpack.c.bf16 %v2163_v60, %v2162_v59  ;;  %v3783_v18 = vpack.c.bf16 %v2195_v0, %v2194_v63  ;;  %v2164_v20 = vld [vmem:[%s5565_s7 + $0x210] sm:$0xff]  ;;  %v2199_v0 = vld [vmem:[%s5565_s7 + $0x328] sm:$0xff] }
 0x922   : > { %3692 = vmatpush3.bf16.msra.mxu1 %v3691_v32  ;;  %3724 = vmatpush3.bf16.msra.mxu0 %v3723_v33  ;;  %v2143_v32 = vld [vmem:[%s5565_s7 + $0x168] sm:$0xff]  ;;  %v3711_v33 = vpack.c.bf16 %v2111_v30, %v2110_v26 }
 0x923   : > { %3694 = vmatprep.subr.bf16.mxu1 %v3693_v35  ;;  %3726 = vmatprep.subr.bf16.mxu0 %v3725_v36  ;;  %v3743_v34 = vpack.c.bf16 %v2143_v32, %v2142_v31  ;;  %v2129_v35 = vld [vmem:[%s5565_s7 + $0xf8] sm:$0xff]  ;;  %v2160_v36 = vld [vmem:[%s5565_s7 + $0x1f0] sm:$0xff] }
 0x924   : > { %v3713_v37 = vpack.c.bf16 %v2129_v35, %v2128_v28  ;;  %v3745_v43 = vpack.c.bf16 %v2161_v38, %v2160_v36  ;;  %v2165_v31 = vld [vmem:[%s5565_s7 + $0x218] sm:$0xff]  ;;  %v2196_v32 = vld [vmem:[%s5565_s7 + $0x310] sm:$0xff] }
 0x925   : > { %v2197_v38 = vld [vmem:[%s5565_s7 + $0x318] sm:$0xff] }
 0x926   : > { %3696 = vmatpush3.bf16.msra.mxu1 %v3695_v46  ;;  %3728 = vmatpush3.bf16.msra.mxu0 %v3727_v47  ;;  %v2144_v46 = vld [vmem:[%s5565_s7 + $0x170] sm:$0xff]  ;;  %v2145_v47 = vld [vmem:[%s5565_s7 + $0x178] sm:$0xff] }
 0x927   : > { %3698 = vmatprep.subr.bf16.mxu1 %v3697_v50  ;;  %3730 = vmatprep.subr.bf16.mxu0 %v3729_v51  ;;  %v3747_v48 = vpack.c.bf16 %v2145_v47, %v2144_v46  ;;  %v2179_v50 = vld [vmem:[%s5565_s7 + $0x288] sm:$0xff]  ;;  %v2210_v51 = vld [vmem:[%s5565_s7 + $0x380] sm:$0xff] }
 0x928   : > { %v3749_v52 = vpack.c.bf16 %v2179_v50, %v2178_v49  ;;  %v3781_v12 = vpack.c.bf16 %v2211_v53, %v2210_v51  ;;  %v2183_v46 = vld [vmem:[%s5565_s7 + $0x2a8] sm:$0xff]  ;;  %v2214_v47 = vld [vmem:[%s5565_s7 + $0x3a0] sm:$0xff] }
 0x929   : > { %v2166_v49 = vld [vmem:[%s5565_s7 + $0x220] sm:$0xff] }
 0x92a   : > { %3700 = vmatpush3.bf16.msra.mxu1 %v3699_v57  ;;  %3732 = vmatpush3.bf16.msra.mxu0 %v3731_v58  ;;  %v1371_v57 = vrot.slane %v4788_v54, %v4232_v23  ;;  %v1379_v58 = vrot.slane %v4788_v54, %v4388_v41 }
 0x92b   : > { %3702 = vmatprep.subr.bf16.mxu1 %v3701_v17  ;;  %3734 = vmatprep.subr.bf16.mxu0 %v3733_v61  ;;  %v4805_v17 = vsub.s32 5, %v4199_v10 }
 0x92d   : > { %v4830_v19 = vrot.slane %v4788_v54, %v4805_v17 }
 0x92e   : > { %3704 = vmatpush3.bf16.msra.mxu1 %v3703_v4  ;;  %3736 = vmatpush3.bf16.msra.mxu0 %v3735_v5 }
 0x92f   : > { %3706 = vmatprep.subr.bf16.mxu1 %v3705_v8  ;;  %3738 = vmatprep.subr.bf16.mxu0 %v3737_v13  ;;  %v2213_v8 = vld [vmem:[%s5565_s7 + $0x398] sm:$0xff] }
 0x930   : > { %v3785_v30 = vpack.c.bf16 %v2213_v8, %v2212_v7 }
 0x932   : > { %3708 = vmatpush3.bf16.msra.mxu1 %v3707_v24  ;;  %3740 = vmatpush3.bf16.msra.mxu0 %v3739_v25 }
 0x933   : > { %3710 = vmatprep.subr.bf16.mxu1 %v3709_v27  ;;  %3742 = vmatprep.subr.bf16.mxu0 %v3741_v29  ;;  %v3753_v29 = vpack.c.bf16 %v2181_v6, %v2180_v1  ;;  %v2184_v1 = vld [vmem:[%s5565_s7 + $0x2b0] sm:$0xff]  ;;  %v2217_v6 = vld [vmem:[%s5565_s7 + $0x3b8] sm:$0xff] }
 0x936   : > { %3712 = vmatpush3.bf16.msra.mxu1 %v3711_v33  ;;  %3744 = vmatpush3.bf16.msra.mxu0 %v3743_v34 }
 0x937   : > { %3714 = vmatprep.subr.bf16.mxu1 %v3713_v37  ;;  %3746 = vmatprep.subr.bf16.mxu0 %v3745_v43 }
 0x93a   : > { %3716 = vmatpush3.bf16.msra.mxu1 %v3715_v45  ;;  %3748 = vmatpush3.bf16.msra.mxu0 %v3747_v48  ;;  %v4849_v45 = vrot.slane %v4788_v54, %v4826_v15  ;;  %v2215_v48 = vld [vmem:[%s5565_s7 + $0x3a8] sm:$0xff] }
 0x93b   : > { %3750 = vmatprep.subr.bf16.mxu1 %v3749_v52  ;;  %3782 = vmatprep.subr.bf16.mxu0 %v3781_v12  ;;  %v3755_v12 = vpack.c.bf16 %v2165_v31, %v2164_v20  ;;  %v3789_v63 = vpack.c.bf16 %v2215_v48, %v2214_v47  ;;  %v2168_v20 = vld [vmem:[%s5565_s7 + $0x230] sm:$0xff]  ;;  %v2201_v31 = vld [vmem:[%s5565_s7 + $0x338] sm:$0xff] }
 0x9d7   : > { %v1516_v61 = vpop.f32.mrb[10].mxu1  ;;  %v1593_v62 = vpop.f32.mrb[10].mxu0 }
 0x9d8   : > { %v1517_v2 = vadd.f32 %v1516_v61, %v1367_v55  ;;  %v1594_v3 = vadd.f32 %v1593_v62, %v1375_v56  ;;  %v1518_v4 = vpop.f32.mrb[11].mxu1  ;;  %v1595_v5 = vpop.f32.mrb[11].mxu0  ;;  %v3757_v62 = vpack.c.bf16 %v2183_v46, %v2182_v39  ;;  %v2170_v39 = vld [vmem:[%s5565_s7 + $0x240] sm:$0xff] }
 0x9d9   : > { %v1519_v13 = vadd.f32 %v1518_v4, %v1371_v57  ;;  %v1596_v14 = vadd.f32 %v1595_v5, %v1379_v58  ;;  %v2185_v4 = vld [vmem:[%s5565_s7 + $0x2b8] sm:$0xff]  ;;  %v2216_v5 = vld [vmem:[%s5565_s7 + $0x3b0] sm:$0xff] }
 0x9da   : > { %v2066_v33 = vmax.f32 %v1517_v2, 0.0  ;;  %v2068_v34 = vmax.f32 %v1594_v3, 0.0 }
 0x9db   : > { %v2067_v24 = vmax.f32 %v1519_v13, 0.0  ;;  %v2069_v25 = vmax.f32 %v1596_v14, 0.0  ;;  %v1522_v26 = vpop.f32.mrb[12].mxu1  ;;  %v1599_v27 = vpop.f32.mrb[12].mxu0 }
 0x9dc   : > { %v1523_v28 = vadd.f32 %v1522_v26, %v1367_v55  ;;  %v1600_v35 = vadd.f32 %v1599_v27, %v1375_v56  ;;  %v1524_v36 = vpop.f32.mrb[13].mxu1  ;;  %v1601_v37 = vpop.f32.mrb[13].mxu0  ;;  %v3787_v55 = vpack.c.bf16 %v2197_v38, %v2196_v32  ;;  %v2167_v56 = vld [vmem:[%s5565_s7 + $0x228] sm:$0xff]  ;;  %v3761_v27 = vpack.c.bf16 %v2185_v4, %v2184_v1  ;;  %v2186_v32 = vld [vmem:[%s5565_s7 + $0x2c0] sm:$0xff] }
 0x9dd   : > { %v1525_v40 = vadd.f32 %v1524_v36, %v1371_v57  ;;  %v1602_v43 = vadd.f32 %v1601_v37, %v1379_v58  ;;  %2422 = vmatprep.mubr.f32.mxu1 %v2067_v24  ;;  %2497 = vmatprep.mubr.f32.mxu0 %v2069_v25  ;;  %v2198_v57 = vld [vmem:[%s5565_s7 + $0x320] sm:$0xff]  ;;  %v2169_v24 = vld [vmem:[%s5565_s7 + $0x238] sm:$0xff] }
 0x9de   : > { %2423 = vmatmul.mubr.f32.vlgmr.msra.gmra.mrb[26].mxu1 %v2066_v33  ;;  %2498 = vmatmul.mubr.f32.vlgmr.msra.gmra.mrb[26].mxu0 %v2068_v34  ;;  %v2082_v58 = vmax.f32 %v1523_v28, 0.0  ;;  %v2084_v59 = vmax.f32 %v1600_v35, 0.0  ;;  %v2187_v33 = vld [vmem:[%s5565_s7 + $0x2c8] sm:$0xff]  ;;  %v2218_v34 = vld [vmem:[%s5565_s7 + $0x3c0] sm:$0xff]  ;;  %v3763_v37 = vpack.c.bf16 %v2169_v24, %v2168_v20 }
 0x9df   : > { %v2083_v50 = vmax.f32 %v1525_v40, 0.0  ;;  %v2085_v51 = vmax.f32 %v1602_v43, 0.0  ;;  %3752 = vmatpush3.bf16.msra.mxu1 %v3751_v16  ;;  %3784 = vmatpush3.bf16.msra.mxu0 %v3783_v18  ;;  %v4863_v52 = vpop.f32.mrb[14].mxu1  ;;  %v4865_v53 = vpop.f32.mrb[14].mxu0  ;;  %v3759_v16 = vpack.c.bf16 %v2167_v56, %v2166_v49  ;;  %v3791_v18 = vpack.c.bf16 %v2199_v0, %v2198_v57  ;;  %v2219_v28 = vld [vmem:[%s5565_s7 + $0x3c8] sm:$0xff]  ;;  %v2202_v49 = vld [vmem:[%s5565_s7 + $0x340] sm:$0xff] }
 0x9e0   : > { %v1672_v60 = vpop.f32.mrb[15].mxu1  ;;  %v1749_v61 = vpop.f32.mrb[15].mxu0  ;;  %3754 = vmatprep.subr.bf16.mxu1 %v3753_v29  ;;  %3786 = vmatprep.subr.bf16.mxu0 %v3785_v30  ;;  %v3793_v29 = vpack.c.bf16 %v2217_v6, %v2216_v5  ;;  %v2200_v30 = vld [vmem:[%s5565_s7 + $0x330] sm:$0xff]  ;;  %v2171_v40 = vld [vmem:[%s5565_s7 + $0x248] sm:$0xff]  ;;  %v3765_v47 = vpack.c.bf16 %v2187_v33, %v2186_v32  ;;  %v3797_v48 = vpack.c.bf16 %v2219_v28, %v2218_v34  ;;  %v2221_v56 = vld [vmem:[%s5565_s7 + $0x3d8] sm:$0xff]  ;;  %v4955_v57 = vsub.s32 6, %v4199_v10 }
 0x9e1   : > { %v1673_v2 = vadd.f32 %v1672_v60, %v4830_v19  ;;  %v1750_v3 = vadd.f32 %v1749_v61, %v4849_v45  ;;  %2427 = vmatprep.mubr.f32.mxu1 %v2083_v50  ;;  %2502 = vmatprep.mubr.f32.mxu0 %v2085_v51  ;;  %v3795_v38 = vpack.c.bf16 %v2201_v31, %v2200_v30  ;;  %v2203_v50 = vld [vmem:[%s5565_s7 + $0x348] sm:$0xff]  ;;  %v2188_v51 = vld [vmem:[%s5565_s7 + $0x2d0] sm:$0xff]  ;;  %v2173_v10 = vld [vmem:[%s5565_s7 + $0x258] sm:$0xff] }
 0x9e2   : > { %2428 = vmatmul.mubr.f32.gmra.mrb[28].mxu1 %v2082_v58  ;;  %2503 = vmatmul.mubr.f32.gmra.mrb[28].mxu0 %v2084_v59  ;;  %v4960_v58 = vld [vmem:[%s5564_s6 + $0x8] sm:$0xff]  ;;  %v3767_v61 = vpack.c.bf16 %v2171_v40, %v2170_v39  ;;  %v2204_v5 = vld [vmem:[%s5565_s7 + $0x350] sm:$0xff]  ;;  %v2205_v6 = vld [vmem:[%s5565_s7 + $0x358] sm:$0xff] }
 0x9e3   : > { %v2071_v7 = vmax.f32 %v1673_v2, 0.0  ;;  %v2073_v8 = vmax.f32 %v1750_v3, 0.0  ;;  %3756 = vmatpush3.bf16.msra.mxu1 %v3755_v12  ;;  %3788 = vmatpush3.bf16.msra.mxu0 %v3787_v55  ;;  %v4890_v13 = vpop.f32.mrb[16].mxu1  ;;  %v4892_v14 = vpop.f32.mrb[16].mxu0  ;;  %v2189_v12 = vld [vmem:[%s5565_s7 + $0x2d8] sm:$0xff]  ;;  %v2220_v55 = vld [vmem:[%s5565_s7 + $0x3d0] sm:$0xff]  ;;  %v1423_v2 = vrot.slane %v4960_v58, %v4955_v57  ;;  %v3803_v30 = vpack.c.bf16 %v2205_v6, %v2204_v5 }
 0x9e4   : > { %v4900_v25 = vpop.f32.mrb[17].mxu1  ;;  %v4902_v26 = vpop.f32.mrb[17].mxu0  ;;  %3758 = vmatprep.subr.bf16.mxu1 %v3757_v62  ;;  %3790 = vmatprep.subr.bf16.mxu0 %v3789_v63  ;;  %v3799_v62 = vpack.c.bf16 %v2203_v50, %v2202_v49  ;;  %v2172_v63 = vld [vmem:[%s5565_s7 + $0x250] sm:$0xff]  ;;  %v3769_v3 = vpack.c.bf16 %v2189_v12, %v2188_v51  ;;  %v3801_v4 = vpack.c.bf16 %v2221_v56, %v2220_v55  ;;  %v2223_v20 = vld [vmem:[%s5565_s7 + $0x3e8] sm:$0xff]  ;;  %v2174_v31 = vld [vmem:[%s5565_s7 + $0x260] sm:$0xff] }
 0x9e5   : > { %2572 = vmatprep.mubr.f32.mxu1 %v2071_v7  ;;  %2647 = vmatprep.mubr.f32.mxu0 %v2073_v8  ;;  %v2190_v7 = vld [vmem:[%s5565_s7 + $0x2e0] sm:$0xff]  ;;  %v1427_v8 = vrot.slane %v4960_v58, %v4826_v15  ;;  %v2175_v32 = vld [vmem:[%s5565_s7 + $0x268] sm:$0xff]  ;;  %v2193_v49 = vld [vmem:[%s5565_s7 + $0x2f8] sm:$0xff]  ;;  %v1383_v12 = vrot.slane %v4788_v54, %v4391_v42  ;;  %v1391_v55 = vrot.slane %v4788_v54, %v4955_v57 }
 0x9e6   : > { %v2206_v39 = vld [vmem:[%s5565_s7 + $0x360] sm:$0xff]  ;;  %v2207_v40 = vld [vmem:[%s5565_s7 + $0x368] sm:$0xff]  ;;  %v2224_v50 = vld [vmem:[%s5565_s7 + $0x3f0] sm:$0xff] }
 0x9e7   : > { %3760 = vmatpush3.bf16.msra.mxu1 %v3759_v16  ;;  %3792 = vmatpush3.bf16.msra.mxu0 %v3791_v18  ;;  %v4922_v35 = vpop.f32.mrb[18].mxu1  ;;  %v4924_v36 = vpop.f32.mrb[18].mxu0  ;;  %v2191_v16 = vld [vmem:[%s5565_s7 + $0x2e8] sm:$0xff]  ;;  %v2222_v18 = vld [vmem:[%s5565_s7 + $0x3e0] sm:$0xff]  ;;  %v2225_v51 = vld [vmem:[%s5565_s7 + $0x3f8] sm:$0xff] }
 0x9e8   : > { %v4932_v43 = vpop.f32.mrb[19].mxu1  ;;  %v4934_v46 = vpop.f32.mrb[19].mxu0  ;;  %3762 = vmatprep.subr.bf16.mxu1 %v3761_v27  ;;  %3794 = vmatprep.subr.bf16.mxu0 %v3793_v29  ;;  %v3771_v29 = vpack.c.bf16 %v2173_v10, %v2172_v63  ;;  %v3807_v63 = vpack.c.bf16 %v2207_v40, %v2206_v39  ;;  %v2176_v10 = vld [vmem:[%s5565_s7 + $0x270] sm:$0xff]  ;;  %v2259_v39 = vld [vmem:[%s5565_s7 + $0x508] sm:$0xff] }
 0x9e9   : > { %v2244_v40 = vld [vmem:[%s5565_s7 + $0x490] sm:$0xff] }
 0x9eb   : > { %3764 = vmatpush3.bf16.msra.mxu1 %v3763_v37  ;;  %3796 = vmatpush3.bf16.msra.mxu0 %v3795_v38  ;;  %v4962_v59 = vpop.f32.mrb[20].mxu1  ;;  %v4964_v60 = vpop.f32.mrb[20].mxu0  ;;  %v3773_v37 = vpack.c.bf16 %v2191_v16, %v2190_v7  ;;  %v3805_v38 = vpack.c.bf16 %v2223_v20, %v2222_v18  ;;  %v3809_v16 = vpack.c.bf16 %v2225_v51, %v2224_v50  ;;  %v2209_v18 = vld [vmem:[%s5565_s7 + $0x378] sm:$0xff]  ;;  %v2242_v20 = vld [vmem:[%s5565_s7 + $0x480] sm:$0xff] }
 0x9ec   : > { %v4972_v0 = vpop.f32.mrb[21].mxu1  ;;  %v4974_v1 = vpop.f32.mrb[21].mxu0  ;;  %3766 = vmatprep.subr.bf16.mxu1 %v3765_v47  ;;  %3798 = vmatprep.subr.bf16.mxu0 %v3797_v48  ;;  %v2192_v47 = vld [vmem:[%s5565_s7 + $0x2f0] sm:$0xff]  ;;  %v2245_v51 = vld [vmem:[%s5565_s7 + $0x498] sm:$0xff] }
 0x9ed   : > { %v3777_v7 = vpack.c.bf16 %v2193_v49, %v2192_v47  ;;  %v1671_v47 = vadd.f32 %v4863_v52, %v1383_v12  ;;  %v1748_v49 = vadd.f32 %v4865_v53, %v1391_v55  ;;  %v1679_v52 = vadd.f32 %v4900_v25, %v4830_v19 }
 0x9ee   : > { %v1756_v53 = vadd.f32 %v4902_v26, %v4849_v45  ;;  %v1677_v19 = vadd.f32 %v4890_v13, %v1383_v12  ;;  %v1754_v45 = vadd.f32 %v4892_v14, %v1391_v55  ;;  %v2260_v14 = vld [vmem:[%s5565_s7 + $0x510] sm:$0xff]  ;;  %v2261_v12 = vld [vmem:[%s5565_s7 + $0x518] sm:$0xff]  ;;  %v2246_v55 = vld [vmem:[%s5565_s7 + $0x4a0] sm:$0xff] }
 0x9ef   : > { %3768 = vmatpush3.bf16.msra.mxu1 %v3767_v61  ;;  %3800 = vmatpush3.bf16.msra.mxu0 %v3799_v62  ;;  %v4998_v24 = vpop.f32.mrb[22].mxu1  ;;  %v2055_v27 = vpop.f32.mrb[22].mxu0  ;;  %v3775_v62 = vpack.c.bf16 %v2175_v32, %v2174_v31  ;;  %v2226_v31 = vld [vmem:[%s5565_s7 + $0x400] sm:$0xff]  ;;  %v2227_v32 = vld [vmem:[%s5565_s7 + $0x408] sm:$0xff]  ;;  %v2087_v25 = vmax.f32 %v1679_v52, 0.0 }
 0x9f0   : > { %v5006_v33 = vadd.f32 %v2055_v27, %v1423_v2  ;;  %v5008_v34 = vpop.f32.mrb[23].mxu1  ;;  %v2057_v28 = vpop.f32.mrb[23].mxu0  ;;  %3770 = vmatprep.subr.bf16.mxu1 %v3769_v3  ;;  %3802 = vmatprep.subr.bf16.mxu0 %v3801_v4  ;;  %v2177_v3 = vld [vmem:[%s5565_s7 + $0x278] sm:$0xff]  ;;  %v2208_v4 = vld [vmem:[%s5565_s7 + $0x370] sm:$0xff]  ;;  %v2089_v26 = vmax.f32 %v1756_v53, 0.0 }
 0x9f1   : > { %v5019_v48 = vadd.f32 %v2057_v28, %v1427_v8  ;;  %v3811_v28 = vpack.c.bf16 %v2209_v18, %v2208_v4  ;;  %v2072_v18 = vmax.f32 %v1748_v49, 0.0  ;;  %v2263_v49 = vld [vmem:[%s5565_s7 + $0x528] sm:$0xff] }
 0x9f3   : > { %3772 = vmatpush3.bf16.msra.mxu1 %v3771_v29  ;;  %3804 = vmatpush3.bf16.msra.mxu0 %v3803_v30  ;;  %v5034_v56 = vpop.f32.mrb[24].mxu1  ;;  %v2061_v61 = vpop.f32.mrb[24].mxu0  ;;  %v2274_v29 = vld [vmem:[%s5565_s7 + $0x580] sm:$0xff]  ;;  %v2275_v30 = vld [vmem:[%s5565_s7 + $0x588] sm:$0xff] }
 0x9f4   : > { %v5045_v54 = vadd.f32 %v2061_v61, %v1423_v2  ;;  %v5047_v5 = vpop.f32.mrb[25].mxu1  ;;  %v2063_v6 = vpop.f32.mrb[25].mxu0  ;;  %3774 = vmatprep.subr.bf16.mxu1 %v3773_v37  ;;  %3806 = vmatprep.subr.bf16.mxu0 %v3805_v38  ;;  %v2243_v2 = vld [vmem:[%s5565_s7 + $0x488] sm:$0xff]  ;;  %v2258_v38 = vld [vmem:[%s5565_s7 + $0x500] sm:$0xff]  ;;  %v3845_v50 = vpack.c.bf16 %v2275_v30, %v2274_v29  ;;  %v2276_v61 = vld [vmem:[%s5565_s7 + $0x590] sm:$0xff]  ;;  %v2086_v29 = vmax.f32 %v1677_v19, 0.0 }
 0x9f5   : > { %v5058_v27 = vadd.f32 %v2063_v6, %v1427_v8  ;;  %v3779_v8 = vpack.c.bf16 %v2177_v3, %v2176_v10  ;;  %v3813_v37 = vpack.c.bf16 %v2243_v2, %v2242_v20  ;;  %v5102_v10 = vrot.slane %v4960_v58, %v4388_v41  ;;  %v2229_v41 = vld [vmem:[%s5565_s7 + $0x418] sm:$0xff]  ;;  %v2279_v2 = vld [vmem:[%s5565_s7 + $0x5a8] sm:$0xff]  ;;  %v2250_v19 = vld [vmem:[%s5565_s7 + $0x4c0] sm:$0xff] }
 0x9f6   : > { %v3815_v3 = vpack.c.bf16 %v2227_v32, %v2226_v31  ;;  %v3847_v4 = vpack.c.bf16 %v2259_v39, %v2258_v38  ;;  %v3817_v6 = vpack.c.bf16 %v2245_v51, %v2244_v40  ;;  %v2088_v30 = vmax.f32 %v1754_v45, 0.0  ;;  %v2249_v51 = vld [vmem:[%s5565_s7 + $0x4b8] sm:$0xff]  ;;  %v2251_v45 = vld [vmem:[%s5565_s7 + $0x4c8] sm:$0xff] }
 0x9f7   : > { %3776 = vmatpush3.bf16.msra.mxu1 %v3775_v62  ;;  %3808 = vmatpush3.bf16.msra.mxu0 %v3807_v63  ;;  %v2277_v62 = vld [vmem:[%s5565_s7 + $0x598] sm:$0xff]  ;;  %v5098_v63 = vrot.slane %v4960_v58, %v4232_v23  ;;  %v2228_v23 = vld [vmem:[%s5565_s7 + $0x410] sm:$0xff]  ;;  %v1904_v13 = vadd.f32 %v4934_v46, %v5102_v10  ;;  %v2278_v46 = vld [vmem:[%s5565_s7 + $0x5a0] sm:$0xff]  ;;  %v3851_v32 = vpack.c.bf16 %v2261_v12, %v2260_v14 }
 0x9f8   : > { %3778 = vmatprep.subr.bf16.mxu1 %v3777_v7  ;;  %3810 = vmatprep.subr.bf16.mxu0 %v3809_v16  ;;  %v3849_v7 = vpack.c.bf16 %v2277_v62, %v2276_v61  ;;  %v2070_v16 = vmax.f32 %v1671_v47, 0.0  ;;  %v3819_v31 = vpack.c.bf16 %v2229_v41, %v2228_v23  ;;  %v3853_v40 = vpack.c.bf16 %v2279_v2, %v2278_v46  ;;  %v2262_v47 = vld [vmem:[%s5565_s7 + $0x520] sm:$0xff]  ;;  %v2280_v61 = vld [vmem:[%s5565_s7 + $0x5b0] sm:$0xff]  ;;  %v2281_v62 = vld [vmem:[%s5565_s7 + $0x5b8] sm:$0xff] }
 0x9f9   : > { %v1827_v20 = vadd.f32 %v4932_v43, %v5098_v63  ;;  %v2247_v43 = vld [vmem:[%s5565_s7 + $0x4a8] sm:$0xff]  ;;  %v2077_v38 = vmax.f32 %v1904_v13, 0.0  ;;  %v3855_v53 = vpack.c.bf16 %v2263_v49, %v2262_v47  ;;  %v2282_v23 = vld [vmem:[%s5565_s7 + $0x5c0] sm:$0xff]  ;;  %v3829_v14 = vpack.c.bf16 %v2251_v45, %v2250_v19  ;;  %v2252_v46 = vld [vmem:[%s5565_s7 + $0x4d0] sm:$0xff] }
 0x9fa   : > { %v3821_v39 = vpack.c.bf16 %v2247_v43, %v2246_v55  ;;  %v2283_v41 = vld [vmem:[%s5565_s7 + $0x5c8] sm:$0xff]  ;;  %v2266_v55 = vld [vmem:[%s5565_s7 + $0x540] sm:$0xff]  ;;  %v2253_v2 = vld [vmem:[%s5565_s7 + $0x4d8] sm:$0xff] }
 0x9fb   : > { %3780 = vmatpush3.bf16.msra.mxu1 %v3779_v8  ;;  %3812 = vmatpush3.bf16.msra.mxu0 %v3811_v28  ;;  %v2230_v8 = vld [vmem:[%s5565_s7 + $0x420] sm:$0xff]  ;;  %v2231_v28 = vld [vmem:[%s5565_s7 + $0x428] sm:$0xff]  ;;  %v3861_v12 = vpack.c.bf16 %v2283_v41, %v2282_v23  ;;  %v2288_v19 = vld [vmem:[%s5565_s7 + $0x5f0] sm:$0xff]  ;;  %v1399_v23 = vrot.slane %v4960_v58, %v4202_v11 }
 0x9fc   : > { %3814 = vmatprep.subr.bf16.mxu1 %v3813_v37  ;;  %3846 = vmatprep.subr.bf16.mxu0 %v3845_v50  ;;  %v2075_v37 = vmax.f32 %v1827_v20, 0.0  ;;  %v2248_v50 = vld [vmem:[%s5565_s7 + $0x4b0] sm:$0xff]  ;;  %v3823_v52 = vpack.c.bf16 %v2231_v28, %v2230_v8  ;;  %v2234_v20 = vld [vmem:[%s5565_s7 + $0x440] sm:$0xff]  ;;  %v2235_v13 = vld [vmem:[%s5565_s7 + $0x448] sm:$0xff] }
 0x9fd   : > { %v2267_v43 = vld [vmem:[%s5565_s7 + $0x548] sm:$0xff]  ;;  %v2236_v8 = vld [vmem:[%s5565_s7 + $0x450] sm:$0xff]  ;;  %v2237_v28 = vld [vmem:[%s5565_s7 + $0x458] sm:$0xff] }
 0x9fe   : > { %2573 = vmatmul.mubr.f32.vlgmr.msra.gmra.mrb[30].mxu1 %v2070_v16  ;;  %2648 = vmatmul.mubr.f32.vlgmr.msra.gmra.mrb[30].mxu0 %v2072_v18  ;;  %v2264_v16 = vld [vmem:[%s5565_s7 + $0x530] sm:$0xff]  ;;  %v2265_v18 = vld [vmem:[%s5565_s7 + $0x538] sm:$0xff]  ;;  %v2254_v47 = vld [vmem:[%s5565_s7 + $0x4e0] sm:$0xff] }
 0x9ff   : > { %2577 = vmatprep.mubr.f32.mxu1 %v2087_v25  ;;  %2652 = vmatprep.mubr.f32.mxu0 %v2089_v26  ;;  %v3859_v26 = vpack.c.bf16 %v2265_v18, %v2264_v16  ;;  %v2255_v49 = vld [vmem:[%s5565_s7 + $0x4e8] sm:$0xff]  ;;  %v2256_v16 = vld [vmem:[%s5565_s7 + $0x4f0] sm:$0xff]  ;;  %v2257_v18 = vld [vmem:[%s5565_s7 + $0x4f8] sm:$0xff] }
 0xa00   : > { %3816 = vmatpush3.bf16.msra.mxu1 %v3815_v3  ;;  %3848 = vmatpush3.bf16.msra.mxu0 %v3847_v4  ;;  %v2232_v3 = vld [vmem:[%s5565_s7 + $0x430] sm:$0xff]  ;;  %v2233_v4 = vld [vmem:[%s5565_s7 + $0x438] sm:$0xff]  ;;  %v3841_v11 = vpack.c.bf16 %v2257_v18, %v2256_v16 }
 0xa01   : > { %3818 = vmatprep.subr.bf16.mxu1 %v3817_v6  ;;  %3850 = vmatprep.subr.bf16.mxu0 %v3849_v7  ;;  %v3825_v6 = vpack.c.bf16 %v2249_v51, %v2248_v50  ;;  %v3857_v7 = vpack.c.bf16 %v2281_v62, %v2280_v61  ;;  %v3827_v25 = vpack.c.bf16 %v2233_v4, %v2232_v3  ;;  %v2286_v50 = vld [vmem:[%s5565_s7 + $0x5e0] sm:$0xff]  ;;  %v2287_v51 = vld [vmem:[%s5565_s7 + $0x5e8] sm:$0xff]  ;;  %v2289_v45 = vld [vmem:[%s5565_s7 + $0x5f8] sm:$0xff] }
 0xa02   : > { %2578 = vmatmul.mubr.f32.gmra.mrb[32].mxu1 %v2086_v29  ;;  %2653 = vmatmul.mubr.f32.gmra.mrb[32].mxu0 %v2088_v30  ;;  %v2284_v29 = vld [vmem:[%s5565_s7 + $0x5d0] sm:$0xff]  ;;  %v2285_v30 = vld [vmem:[%s5565_s7 + $0x5d8] sm:$0xff]  ;;  %v3835_v61 = vpack.c.bf16 %v2237_v28, %v2236_v8  ;;  %v3837_v3 = vpack.c.bf16 %v2255_v49, %v2254_v47  ;;  %v3869_v4 = vpack.c.bf16 %v2287_v51, %v2286_v50  ;;  %v2291_v8 = vld [vmem:[%s5565_s7 + $0x608] sm:$0xff] }
 0xa03   : > { %2722 = vmatprep.mubr.f32.mxu1 %v2075_v37  ;;  %2797 = vmatprep.mubr.f32.mxu0 %v2077_v38  ;;  %v3833_v37 = vpack.c.bf16 %v2253_v2, %v2252_v46  ;;  %v3865_v38 = vpack.c.bf16 %v2285_v30, %v2284_v29  ;;  %v2307_v46 = vld [vmem:[%s5565_s7 + $0x688] sm:$0xff]  ;;  %v2322_v28 = vld [vmem:[%s5565_s7 + $0x700] sm:$0xff]  ;;  %v2308_v47 = vld [vmem:[%s5565_s7 + $0x690] sm:$0xff]  ;;  %v5308_v50 = vrot.slane %v4960_v58, %v4805_v17 }
 0xa04   : > { %3820 = vmatpush3.bf16.msra.mxu1 %v3819_v31  ;;  %3852 = vmatpush3.bf16.msra.mxu0 %v3851_v32  ;;  %v3831_v31 = vpack.c.bf16 %v2235_v13, %v2234_v20  ;;  %v3863_v32 = vpack.c.bf16 %v2267_v43, %v2266_v55  ;;  %v2241_v20 = vld [vmem:[%s5565_s7 + $0x478] sm:$0xff]  ;;  %v2272_v13 = vld [vmem:[%s5565_s7 + $0x570] sm:$0xff]  ;;  %v2306_v43 = vld [vmem:[%s5565_s7 + $0x680] sm:$0xff] }
 0xa05   : > { %3822 = vmatprep.subr.bf16.mxu1 %v3821_v39  ;;  %3854 = vmatprep.subr.bf16.mxu0 %v3853_v40  ;;  %v2268_v39 = vld [vmem:[%s5565_s7 + $0x550] sm:$0xff]  ;;  %v2269_v40 = vld [vmem:[%s5565_s7 + $0x558] sm:$0xff]  ;;  %v2339_v2 = vld [vmem:[%s5565_s7 + $0x788] sm:$0xff]  ;;  %v1981_v16 = vadd.f32 %v5008_v34, %v5308_v50 }
 0xa06   : > { %v3867_v62 = vpack.c.bf16 %v2269_v40, %v2268_v39  ;;  %v2273_v55 = vld [vmem:[%s5565_s7 + $0x578] sm:$0xff]  ;;  %v2323_v40 = vld [vmem:[%s5565_s7 + $0x708] sm:$0xff]  ;;  %v2340_v51 = vld [vmem:[%s5565_s7 + $0x790] sm:$0xff] }
 0xa07   : > { %v3875_v30 = vpack.c.bf16 %v2273_v55, %v2272_v13  ;;  %v2309_v49 = vld [vmem:[%s5565_s7 + $0x698] sm:$0xff]  ;;  %v2342_v34 = vld [vmem:[%s5565_s7 + $0x7a0] sm:$0xff] }
 0xa08   : > { %3824 = vmatpush3.bf16.msra.mxu1 %v3823_v52  ;;  %3856 = vmatpush3.bf16.msra.mxu0 %v3855_v53  ;;  %v2238_v52 = vld [vmem:[%s5565_s7 + $0x460] sm:$0xff]  ;;  %v2239_v53 = vld [vmem:[%s5565_s7 + $0x468] sm:$0xff] }
 0xa09   : > { %3826 = vmatprep.subr.bf16.mxu1 %v3825_v6  ;;  %3858 = vmatprep.subr.bf16.mxu0 %v3857_v7  ;;  %v2270_v6 = vld [vmem:[%s5565_s7 + $0x560] sm:$0xff]  ;;  %v2271_v7 = vld [vmem:[%s5565_s7 + $0x568] sm:$0xff]  ;;  %v3839_v41 = vpack.c.bf16 %v2239_v53, %v2238_v52  ;;  %v3911_v52 = vpack.c.bf16 %v2323_v40, %v2322_v28  ;;  %v2297_v28 = vld [vmem:[%s5565_s7 + $0x638] sm:$0xff] }
 0xa0a   : > { %v2294_v13 = vld [vmem:[%s5565_s7 + $0x620] sm:$0xff]  ;;  %v2329_v40 = vld [vmem:[%s5565_s7 + $0x738] sm:$0xff] }
 0xa0c   : > { %3828 = vmatpush3.bf16.msra.mxu1 %v3827_v25  ;;  %3860 = vmatpush3.bf16.msra.mxu0 %v3859_v26  ;;  %v3871_v25 = vpack.c.bf16 %v2271_v7, %v2270_v6  ;;  %v2240_v26 = vld [vmem:[%s5565_s7 + $0x470] sm:$0xff] }
 0xa0d   : > { %3830 = vmatprep.subr.bf16.mxu1 %v3829_v14  ;;  %3862 = vmatprep.subr.bf16.mxu0 %v3861_v12  ;;  %v1407_v14 = vrot.slane %v4960_v58, %v4309_v44  ;;  %v3873_v12 = vpack.c.bf16 %v2289_v45, %v2288_v19  ;;  %v2338_v44 = vld [vmem:[%s5565_s7 + $0x780] sm:$0xff]  ;;  %v3843_v29 = vpack.c.bf16 %v2241_v20, %v2240_v26  ;;  %v2311_v45 = vld [vmem:[%s5565_s7 + $0x6a8] sm:$0xff] }
 0xa0e   : > { %v3909_v39 = vpack.c.bf16 %v2339_v2, %v2338_v44  ;;  %v2310_v19 = vld [vmem:[%s5565_s7 + $0x6a0] sm:$0xff]  ;;  %v2327_v44 = vld [vmem:[%s5565_s7 + $0x728] sm:$0xff]  ;;  %v2312_v2 = vld [vmem:[%s5565_s7 + $0x6b0] sm:$0xff] }
 0xa0f   : > { %v3885_v55 = vpack.c.bf16 %v2311_v45, %v2310_v19  ;;  %v2332_v45 = vld [vmem:[%s5565_s7 + $0x750] sm:$0xff] }
 0xa10   : > { %3832 = vmatpush3.bf16.msra.mxu1 %v3831_v31  ;;  %3864 = vmatpush3.bf16.msra.mxu0 %v3863_v32  ;;  %v3877_v31 = vpack.c.bf16 %v2307_v46, %v2306_v43  ;;  %v2290_v32 = vld [vmem:[%s5565_s7 + $0x600] sm:$0xff] }
 0xa11   : > { %3834 = vmatprep.subr.bf16.mxu1 %v3833_v37  ;;  %3866 = vmatprep.subr.bf16.mxu0 %v3865_v38  ;;  %v1825_v37 = vadd.f32 %v4922_v35, %v1399_v23  ;;  %v1902_v38 = vadd.f32 %v4924_v36, %v1407_v14  ;;  %v1833_v35 = vadd.f32 %v4972_v0, %v5098_v63  ;;  %v2326_v46 = vld [vmem:[%s5565_s7 + $0x720] sm:$0xff] }
 0xa12   : > { %v1910_v36 = vadd.f32 %v4974_v1, %v5102_v10  ;;  %v3881_v0 = vpack.c.bf16 %v2309_v49, %v2308_v47  ;;  %v1831_v1 = vadd.f32 %v4962_v59, %v1399_v23  ;;  %v1908_v10 = vadd.f32 %v4964_v60, %v1407_v14  ;;  %v2324_v59 = vld [vmem:[%s5565_s7 + $0x710] sm:$0xff]  ;;  %v2325_v60 = vld [vmem:[%s5565_s7 + $0x718] sm:$0xff]  ;;  %v2343_v23 = vld [vmem:[%s5565_s7 + $0x7a8] sm:$0xff] }
 0xa13   : > { %v2074_v63 = vmax.f32 %v1825_v37, 0.0  ;;  %v2076_v53 = vmax.f32 %v1902_v38, 0.0  ;;  %v2091_v6 = vmax.f32 %v1833_v35, 0.0  ;;  %v3915_v20 = vpack.c.bf16 %v2325_v60, %v2324_v59  ;;  %v2295_v14 = vld [vmem:[%s5565_s7 + $0x628] sm:$0xff]  ;;  %v2314_v47 = vld [vmem:[%s5565_s7 + $0x6c0] sm:$0xff]  ;;  %v2301_v59 = vld [vmem:[%s5565_s7 + $0x658] sm:$0xff] }
 0xa14   : > { %3836 = vmatpush3.bf16.msra.mxu1 %v3835_v61  ;;  %3868 = vmatpush3.bf16.msra.mxu0 %v3867_v62  ;;  %v2341_v61 = vld [vmem:[%s5565_s7 + $0x798] sm:$0xff]  ;;  %v3879_v62 = vpack.c.bf16 %v2291_v8, %v2290_v32  ;;  %v2093_v7 = vmax.f32 %v1910_v36, 0.0  ;;  %v3917_v43 = vpack.c.bf16 %v2343_v23, %v2342_v34  ;;  %v3919_v32 = vpack.c.bf16 %v2327_v44, %v2326_v46  ;;  %v2296_v8 = vld [vmem:[%s5565_s7 + $0x630] sm:$0xff]  ;;  %v2315_v49 = vld [vmem:[%s5565_s7 + $0x6c8] sm:$0xff] }
 0xa15   : > { %3838 = vmatprep.subr.bf16.mxu1 %v3837_v3  ;;  %3870 = vmatprep.subr.bf16.mxu0 %v3869_v4  ;;  %v2292_v3 = vld [vmem:[%s5565_s7 + $0x610] sm:$0xff]  ;;  %v2293_v4 = vld [vmem:[%s5565_s7 + $0x618] sm:$0xff]  ;;  %v3913_v18 = vpack.c.bf16 %v2341_v61, %v2340_v51  ;;  %v2346_v35 = vld [vmem:[%s5565_s7 + $0x7c0] sm:$0xff]  ;;  %v3891_v51 = vpack.c.bf16 %v2297_v28, %v2296_v8  ;;  %v1415_v8 = vrot.slane %v4960_v58, %v4391_v42 }
 0xa16   : > { %v3883_v26 = vpack.c.bf16 %v2293_v4, %v2292_v3  ;;  %v2347_v36 = vld [vmem:[%s5565_s7 + $0x7c8] sm:$0xff]  ;;  %v2317_v3 = vld [vmem:[%s5565_s7 + $0x6d8] sm:$0xff]  ;;  %v2348_v4 = vld [vmem:[%s5565_s7 + $0x7d0] sm:$0xff] }
 0xa17   : > { %v2333_v34 = vld [vmem:[%s5565_s7 + $0x758] sm:$0xff]  ;;  %v2318_v23 = vld [vmem:[%s5565_s7 + $0x6e0] sm:$0xff]  ;;  %v2335_v46 = vld [vmem:[%s5565_s7 + $0x768] sm:$0xff]  ;;  %v1979_v58 = vadd.f32 %v4998_v24, %v1415_v8 }
 0xa18   : > { %3840 = vmatpush3.bf16.msra.mxu1 %v3839_v41  ;;  %3872 = vmatpush3.bf16.msra.mxu0 %v3871_v25  ;;  %v2090_v41 = vmax.f32 %v1831_v1, 0.0  ;;  %v2092_v25 = vmax.f32 %v1908_v10, 0.0  ;;  %v2331_v1 = vld [vmem:[%s5565_s7 + $0x748] sm:$0xff]  ;;  %v2316_v10 = vld [vmem:[%s5565_s7 + $0x6d0] sm:$0xff] }
 0xa19   : > { %3842 = vmatprep.subr.bf16.mxu1 %v3841_v11  ;;  %3874 = vmatprep.subr.bf16.mxu0 %v3873_v12  ;;  %v2079_v11 = vmax.f32 %v1981_v16, 0.0  ;;  %v2081_v12 = vmax.f32 %v5019_v48, 0.0  ;;  %v2313_v48 = vld [vmem:[%s5565_s7 + $0x6b8] sm:$0xff]  ;;  %v3897_v60 = vpack.c.bf16 %v2317_v3, %v2316_v10  ;;  %v2320_v44 = vld [vmem:[%s5565_s7 + $0x6f0] sm:$0xff] }
 0xa1a   : > { %v3889_v37 = vpack.c.bf16 %v2313_v48, %v2312_v2  ;;  %v2321_v2 = vld [vmem:[%s5565_s7 + $0x6f8] sm:$0xff]  ;;  %v2352_v48 = vld [vmem:[%s5565_s7 + $0x7f0] sm:$0xff] }
 0xa1b   : > { %v3905_v28 = vpack.c.bf16 %v2321_v2, %v2320_v44 }
 0xa1c   : > { %3844 = vmatpush3.bf16.msra.mxu1 %v3843_v29  ;;  %3876 = vmatpush3.bf16.msra.mxu0 %v3875_v30  ;;  %v2344_v29 = vld [vmem:[%s5565_s7 + $0x7b0] sm:$0xff]  ;;  %v2345_v30 = vld [vmem:[%s5565_s7 + $0x7b8] sm:$0xff] }
 0xa1d   : > { %3878 = vmatprep.subr.bf16.mxu1 %v3877_v31  ;;  %3910 = vmatprep.subr.bf16.mxu0 %v3909_v39  ;;  %v3887_v31 = vpack.c.bf16 %v2295_v14, %v2294_v13  ;;  %v3921_v38 = vpack.c.bf16 %v2345_v30, %v2344_v29  ;;  %v2328_v39 = vld [vmem:[%s5565_s7 + $0x730] sm:$0xff]  ;;  %v3931_v13 = vpack.c.bf16 %v2333_v34, %v2332_v45  ;;  %v2302_v14 = vld [vmem:[%s5565_s7 + $0x660] sm:$0xff]  ;;  %v2353_v29 = vld [vmem:[%s5565_s7 + $0x7f8] sm:$0xff] }
 0xa1e   : > { %v3923_v61 = vpack.c.bf16 %v2329_v40, %v2328_v39  ;;  %v2336_v39 = vld [vmem:[%s5565_s7 + $0x770] sm:$0xff]  ;;  %v2337_v40 = vld [vmem:[%s5565_s7 + $0x778] sm:$0xff] }
 0xa1f   : > { %2723 = vmatmul.mubr.f32.vlgmr.msra.gmra.mrb[34].mxu1 %v2074_v63  ;;  %2798 = vmatmul.mubr.f32.vlgmr.msra.gmra.mrb[34].mxu0 %v2076_v53  ;;  %v3925_v63 = vpack.c.bf16 %v2347_v36, %v2346_v35  ;;  %v2330_v53 = vld [vmem:[%s5565_s7 + $0x740] sm:$0xff]  ;;  %v3939_v42 = vpack.c.bf16 %v2337_v40, %v2336_v39  ;;  %v2078_v35 = vmax.f32 %v1979_v58, 0.0  ;;  %v2080_v36 = vmax.f32 %v5006_v33, 0.0 }
 0xa20   : > { %2727 = vmatprep.mubr.f32.mxu1 %v2091_v6  ;;  %2802 = vmatprep.mubr.f32.mxu0 %v2093_v7  ;;  %v2349_v6 = vld [vmem:[%s5565_s7 + $0x7d8] sm:$0xff]  ;;  %v3927_v16 = vpack.c.bf16 %v2331_v1, %v2330_v53 }
 0xa21   : > { %3880 = vmatpush3.bf16.msra.mxu1 %v3879_v62  ;;  %3912 = vmatpush3.bf16.msra.mxu0 %v3911_v52  ;;  %v2298_v62 = vld [vmem:[%s5565_s7 + $0x640] sm:$0xff]  ;;  %v2299_v52 = vld [vmem:[%s5565_s7 + $0x648] sm:$0xff]  ;;  %v3929_v19 = vpack.c.bf16 %v2349_v6, %v2348_v4 }
 0xa22   : > { %3882 = vmatprep.subr.bf16.mxu1 %v3881_v0  ;;  %3914 = vmatprep.subr.bf16.mxu0 %v3913_v18  ;;  %v3893_v0 = vpack.c.bf16 %v2315_v49, %v2314_v47  ;;  %v3895_v7 = vpack.c.bf16 %v2299_v52, %v2298_v62  ;;  %v2300_v18 = vld [vmem:[%s5565_s7 + $0x650] sm:$0xff]  ;;  %v1987_v49 = vadd.f32 %v5047_v5, %v5308_v50  ;;  %v2097_v62 = vmax.f32 %v5058_v27, 0.0 }
 0xa23   : > { %2728 = vmatmul.mubr.f32.gmra.mrb[36].mxu1 %v2090_v41  ;;  %2803 = vmatmul.mubr.f32.gmra.mrb[36].mxu0 %v2092_v25  ;;  %v2319_v41 = vld [vmem:[%s5565_s7 + $0x6e8] sm:$0xff]  ;;  %v2350_v25 = vld [vmem:[%s5565_s7 + $0x7e0] sm:$0xff]  ;;  %v2096_v52 = vmax.f32 %v5045_v54, 0.0 }
 0xa24   : > { %2872 = vmatprep.mubr.f32.mxu1 %v2079_v11  ;;  %2947 = vmatprep.mubr.f32.mxu0 %v2081_v12  ;;  %v2303_v11 = vld [vmem:[%s5565_s7 + $0x668] sm:$0xff]  ;;  %v3901_v12 = vpack.c.bf16 %v2319_v41, %v2318_v23 }
 0xa25   : > { %3884 = vmatpush3.bf16.msra.mxu1 %v3883_v26  ;;  %3916 = vmatpush3.bf16.msra.mxu0 %v3915_v20  ;;  %v2351_v26 = vld [vmem:[%s5565_s7 + $0x7e8] sm:$0xff]  ;;  %v3899_v20 = vpack.c.bf16 %v2301_v59, %v2300_v18  ;;  %v3903_v30 = vpack.c.bf16 %v2303_v11, %v2302_v14 }
 0xa26   : > { %3886 = vmatprep.subr.bf16.mxu1 %v3885_v55  ;;  %3918 = vmatprep.subr.bf16.mxu0 %v3917_v43  ;;  %v3933_v55 = vpack.c.bf16 %v2351_v26, %v2350_v25  ;;  %v2334_v43 = vld [vmem:[%s5565_s7 + $0x760] sm:$0xff] }
 0xa29   : > { %3888 = vmatpush3.bf16.msra.mxu1 %v3887_v31  ;;  %3920 = vmatpush3.bf16.msra.mxu0 %v3919_v32  ;;  %v3935_v31 = vpack.c.bf16 %v2335_v46, %v2334_v43  ;;  %v2304_v32 = vld [vmem:[%s5565_s7 + $0x670] sm:$0xff] }
 0xa2a   : > { %3890 = vmatprep.subr.bf16.mxu1 %v3889_v37  ;;  %3922 = vmatprep.subr.bf16.mxu0 %v3921_v38  ;;  %v3937_v37 = vpack.c.bf16 %v2353_v29, %v2352_v48  ;;  %v2305_v38 = vld [vmem:[%s5565_s7 + $0x678] sm:$0xff] }
 0xa2b   : > { %v3907_v47 = vpack.c.bf16 %v2305_v38, %v2304_v32 }
 0xa2d   : > { %3892 = vmatpush3.bf16.msra.mxu1 %v3891_v51  ;;  %3924 = vmatpush3.bf16.msra.mxu0 %v3923_v61  ;;  %v1985_v51 = vadd.f32 %v5034_v56, %v1415_v8  ;;  %v2095_v61 = vmax.f32 %v1987_v49, 0.0  ;;  %v5492_v56 = vld [vmem:[%s5560_s2] sm:$0xff] }
 0xa2e   : > { %3894 = vmatprep.subr.bf16.mxu1 %v3893_v0  ;;  %3926 = vmatprep.subr.bf16.mxu0 %v3925_v63  ;;  %v2357_v27 = vrot.slane %v5492_v56, %v4805_v17 }
 0xa2f   : > { %v2094_v24 = vmax.f32 %v1985_v51, 0.0 }
 0xa31   : > { %3896 = vmatpush3.bf16.msra.mxu1 %v3895_v7  ;;  %3928 = vmatpush3.bf16.msra.mxu0 %v3927_v16 }
 0xa32   : > { %3898 = vmatprep.subr.bf16.mxu1 %v3897_v60  ;;  %3930 = vmatprep.subr.bf16.mxu0 %v3929_v19 }
 0xa35   : > { %3900 = vmatpush3.bf16.msra.mxu1 %v3899_v20  ;;  %3932 = vmatpush3.bf16.msra.mxu0 %v3931_v13 }
 0xa36   : > { %3902 = vmatprep.subr.bf16.mxu1 %v3901_v12  ;;  %3934 = vmatprep.subr.bf16.mxu0 %v3933_v55 }
 0xa39   : > { %3904 = vmatpush3.bf16.msra.mxu1 %v3903_v30  ;;  %3936 = vmatpush3.bf16.msra.mxu0 %v3935_v31 }
 0xa3a   : > { %3906 = vmatprep.subr.bf16.mxu1 %v3905_v28  ;;  %3938 = vmatprep.subr.bf16.mxu0 %v3937_v37 }
 0xa3d   : > { %3908 = vmatpush3.bf16.msra.mxu1 %v3907_v47  ;;  %3940 = vmatpush3.bf16.msra.mxu0 %v3939_v42 }
 0xa3e   : > { %3600 = vmatprep.subr.mxu1 %v4082_v22 }
 0xa40   : > { %2873 = vmatmul.mubr.f32.vlgmr.msra.gmra.mrb[38].mxu1 %v2078_v35  ;;  %2948 = vmatmul.mubr.f32.vlgmr.msra.gmra.mrb[38].mxu0 %v2080_v36 }
 0xa41   : > { %2877 = vmatprep.mubr.f32.mxu1 %v2095_v61  ;;  %2952 = vmatprep.mubr.f32.mxu0 %v2097_v62 }
 0xa44   : > { %2878 = vmatmul.mubr.f32.gmra.mrb[40].mxu1 %v2094_v24  ;;  %2953 = vmatmul.mubr.f32.gmra.mrb[40].mxu0 %v2096_v52 }
 0xa45   : > { %3602 = vmatprep.mubr.msk.f32.mxu1 %vm4083_vm1, %v4082_v22 }
 0xab1   : > { %v3261_v33 = vpop.f32.mrb[26].mxu1  ;;  %v3299_v5 = vpop.f32.mrb[26].mxu0 }
 0xab2   : > { %v3262_v50 = vpop.f32.mrb[27].mxu1  ;;  %v3300_v0 = vpop.f32.mrb[27].mxu0 }
 0xab3   : > { %v3263_v63 = vadd.f32 %v3262_v50, %v3261_v33  ;;  %v3301_v53 = vadd.f32 %v3300_v0, %v3299_v5 }
 0xab5   : > { %v2425_v54 = vadd.f32 %v3263_v63, %v2357_v27  ;;  %v3264_v1 = vpop.f32.mrb[28].mxu1  ;;  %v3302_v10 = vpop.f32.mrb[28].mxu0 }
 0xab6   : > { %v3265_v3 = vpop.f32.mrb[29].mxu1  ;;  %v3303_v4 = vpop.f32.mrb[29].mxu0 }
 0xab7   : > { %v2500_v22 = vadd.f32 %v3301_v53, %v2425_v54  ;;  %v3266_v6 = vadd.f32 %v3265_v3, %v3264_v1  ;;  %v3304_v7 = vadd.f32 %v3303_v4, %v3302_v10 }
 0xab9   : > { %v2430_v16 = vadd.f32 %v3266_v6, %v2357_v27 }
 0xabb   : > { %v2505_v18 = vadd.f32 %v3304_v7, %v2430_v16 }
 0xad1   : > { %v3337_v59 = vpop.f32.mrb[30].mxu1  ;;  %v3375_v60 = vpop.f32.mrb[30].mxu0 }
 0xad2   : > { %v3338_v19 = vpop.f32.mrb[31].mxu1  ;;  %v3376_v45 = vpop.f32.mrb[31].mxu0 }
 0xad3   : > { %v3339_v34 = vadd.f32 %v3338_v19, %v3337_v59  ;;  %v3377_v17 = vadd.f32 %v3376_v45, %v3375_v60 }
 0xad5   : > { %v2575_v23 = vadd.f32 %v3339_v34, %v2500_v22  ;;  %v3340_v41 = vpop.f32.mrb[32].mxu1  ;;  %v3378_v25 = vpop.f32.mrb[32].mxu0 }
 0xad6   : > { %v3341_v26 = vpop.f32.mrb[33].mxu1  ;;  %v3379_v20 = vpop.f32.mrb[33].mxu0 }
 0xad7   : > { %v2650_v13 = vadd.f32 %v3377_v17, %v2575_v23  ;;  %v3342_v14 = vadd.f32 %v3341_v26, %v3340_v41  ;;  %v3380_v11 = vadd.f32 %v3379_v20, %v3378_v25  ;;  %v2989_v25 = vrot.slane %v5492_v56, %v4955_v57 }
 0xad8   : > { %v2995_v20 = vrot.slane %v5492_v56, %v4826_v15 }
 0xad9   : > { %v2580_v12 = vadd.f32 %v3342_v14, %v2505_v18 }
 0xadb   : > { %v2655_v55 = vadd.f32 %v3380_v11, %v2580_v12 }
 0xaf2   : > { %v3413_v43 = vpop.f32.mrb[34].mxu1  ;;  %v3451_v46 = vpop.f32.mrb[34].mxu0 }
 0xaf3   : > { %v3414_v44 = vpop.f32.mrb[35].mxu1  ;;  %v3452_v2 = vpop.f32.mrb[35].mxu0 }
 0xaf4   : > { %v3415_v48 = vadd.f32 %v3414_v44, %v3413_v43  ;;  %v3453_v29 = vadd.f32 %v3452_v2, %v3451_v46 }
 0xaf6   : > { %v2725_v30 = vadd.f32 %v3415_v48, %v2650_v13  ;;  %v3416_v31 = vpop.f32.mrb[36].mxu1  ;;  %v3454_v32 = vpop.f32.mrb[36].mxu0 }
 0xaf7   : > { %v3417_v8 = vpop.f32.mrb[37].mxu1  ;;  %v3455_v28 = vpop.f32.mrb[37].mxu0 }
 0xaf8   : > { %v2800_v37 = vadd.f32 %v3453_v29, %v2725_v30  ;;  %v3418_v38 = vadd.f32 %v3417_v8, %v3416_v31  ;;  %v3456_v39 = vadd.f32 %v3455_v28, %v3454_v32 }
 0xafa   : > { %v2730_v40 = vadd.f32 %v3418_v38, %v2655_v55 }
 0xafc   : > { %v2805_v47 = vadd.f32 %v3456_v39, %v2730_v40 }
 0xb13   : > { %v3489_v42 = vpop.f32.mrb[38].mxu1  ;;  %v3527_v58 = vpop.f32.mrb[38].mxu0 }
 0xb14   : > { %v3490_v49 = vpop.f32.mrb[39].mxu1  ;;  %v3528_v35 = vpop.f32.mrb[39].mxu0 }
 0xb15   : > { %v3491_v36 = vadd.f32 %v3490_v49, %v3489_v42  ;;  %v3529_v51 = vadd.f32 %v3528_v35, %v3527_v58 }
 0xb17   : > { %v2875_v61 = vadd.f32 %v3491_v36, %v2800_v37  ;;  %v3492_v62 = vpop.f32.mrb[40].mxu1  ;;  %v3530_v24 = vpop.f32.mrb[40].mxu0 }
 0xb18   : > { %v3493_v52 = vpop.f32.mrb[41].mxu1  ;;  %v3531_v33 = vpop.f32.mrb[41].mxu0 }
 0xb19   : > { %v2950_v5 = vadd.f32 %v3529_v51, %v2875_v61  ;;  %v3494_v27 = vadd.f32 %v3493_v52, %v3492_v62  ;;  %v3532_v50 = vadd.f32 %v3531_v33, %v3530_v24 }
 0xb1b   : > { %v2880_v0 = vadd.f32 %v3494_v27, %v2805_v47  ;;  %v2958_v63 = vadd.f32 %v2950_v5, %v4426_v21 }
 0xb1d   : > { %v2955_v53 = vadd.f32 %v3532_v50, %v2880_v0  ;;  %v2960_v54 = vsel %vm337_vm0, %v2958_v63, 0.0 }
 0xb1e   : > { %2961 = vadd.xlane.f32.xlu1 %v2960_v54 }
 0xb1f   : > { %v2959_v1 = vadd.f32 %v2955_v53, %v4456_v9  ;;  %v306_v9 = vld [vmem:[%s5560_s2 + $0x8] sm:$0xff] }
 0xb21   : > { %v2963_v10 = vsel %vm337_vm0, %v2959_v1, 0.0 }
 0xb22   : > { %2964 = vadd.xlane.f32.xlu0 %v2963_v10 }
 0xbab   : > { %v2962_v3 = vpop.xlane.xlu1 %2961 }
 0xbac   : > { %v2966_v4 = vmul.f32 0.03125, %v2962_v3 }
 0xbae   : > { %v2968_v22 = vsub.f32 %v2958_v63, %v2966_v4 }
 0xbaf   : > { %v2965_v6 = vpop.xlane.xlu0 %2964 }
 0xbb0   : > { %v2967_v7 = vmul.f32 0.03125, %v2965_v6  ;;  %v2970_v16 = vmul.f32 %v2968_v22, %v2968_v22 }
 0xbb2   : > { %v2969_v18 = vsub.f32 %v2959_v1, %v2967_v7  ;;  %v2972_v59 = vsel %vm337_vm0, %v2970_v16, 0.0 }
 0xbb3   : > { %2973 = vadd.xlane.f32.xlu1 %v2972_v59 }
 0xbb4   : > { %v2971_v21 = vmul.f32 %v2969_v18, %v2969_v18 }
 0xbb6   : > { %v2975_v60 = vsel %vm337_vm0, %v2971_v21, 0.0 }
 0xbb7   : > { %2976 = vadd.xlane.f32.xlu0 %v2975_v60 }
 0xbc4   : > { %3000 = vperm.xlu1 %3991, %v306_v9  }
 0xc40   : > { %v2974_v19 = vpop.xlane.xlu1 %2973 }
 0xc41   : > { %v2978_v45 = vmul.f32 0.03125, %v2974_v19 }
 0xc43   : > { %v2980_v34 = vadd.f32 1e-05, %v2978_v45 }
 0xc44   : > { %v2977_v17 = vpop.xlane.xlu0 %2976  ;;  %v3001_v57 = vpop.permute.xlu1 %3000 }
 0xc45   : > { %4012 = vrsqrt.f32 %v2980_v34  ;;  %v2979_v23 = vmul.f32 0.03125, %v2977_v17  ;;  %v3008_v15 = vrot.slane %v3001_v57, 1 }
 0xc47   : > { %v2981_v41 = vadd.f32 1e-05, %v2979_v23 }
 0xc49   : > { %4014 = vrsqrt.f32 %v2981_v41 }
 0xc4f   : > { %v4013_v26 = vpop.eup %4012 }
 0xc50   : > { %v2984_v13 = vmul.f32 %v4013_v26, %v2968_v22 }
 0xc52   : > { %v2990_v14 = vmul.f32 %v2989_v25, %v2984_v13 }
 0xc53   : > { %v4015_v11 = vpop.eup %4014 }
 0xc54   : > { %v2985_v12 = vmul.f32 %v4015_v11, %v2969_v18  ;;  %v2996_v55 = vadd.f32 %v2995_v20, %v2990_v14 }
 0xc56   : > { %v2991_v43 = vmul.f32 %v2989_v25, %v2985_v12  ;;  %v3004_v44 = vrot.slane %v2996_v55, 7 }
 0xc58   : > { %v2997_v46 = vadd.f32 %v2995_v20, %v2991_v43 }
 0xc5a   : > { %v3005_v2 = vrot.slane %v2997_v46, 6 }
 0xc5c   : > { %v3007_v48 = vsel %vm3006_vm4, %v3005_v2, %v3004_v44 }
 0xc5d   : > { %3601 = vmatpush3.xpose.msk.msra.mxu1 %vm337_vm0, %v3007_v48 }
 0xc60   : > { %3603 = vmatmul.mubr.msk.f32.vlgmr.msra.gmra.mrb[42].mxu1 %vm337_vm0, %v306_v9 }
 0xd33   : > { %v3080_v56 = vpop.f32.mrb[42].mxu1 }
 0xd34   : > { %v3081_v29 = vadd.f32 %v3080_v56, %v3008_v15  ;;  %v3604_v30 = vpop.f32.mrb[43].mxu1 }
 0xd36   : > { %3085 = vst.msk [vmem:[%s298_s23] sm:$0x1] %vm3084_vm5, %v3081_v29 }
 0xd37   : > { %4030 = shalt.err (!%p4027_p3)
}
 0xd38   : > { %s4031_s19 = scalar_lea.hbm %s5516_s10, 16  ;;  %s4035_s22 = scalar_lea.hbm %s5566_s8, 32 }
 0xd39   : > { %p4032_p4 = scmp.ne.s32.totalorder %s5516_s10, %s4031_s19  ;;  %p4036_p9 = scmp.lt.u32.totalorder %s5516_s10, %s5566_s8 }
 0xd3a   : > { %p4037_p10 = scmp.lt.u32.totalorder %s4035_s22, %s4031_s19  ;;  %p4039_p12 = scmp.lt.u32.totalorder %s4031_s19, %s5516_s10 }
 0xd3b   : > { %p4033_p7 = pnand %p4032_p4, %p4173_p5 }
 0xd3c   : > { %p4038_p11 = por %p4037_p10, %p4036_p9 }
 0xd3d   : > { %p4034_p8 = pneg %p4033_p7 }
 0xd3e   : > { %p4040_p13 = por %p4039_p12, %p4038_p11 }
 0xd40   : > { %p4041_p0 = pnand %p4040_p13, %p4034_p8 }
 0xd42   : > { %4044 = shalt.err (!%p4041_p0)
}
 0xd43   : > { %3943 = dma.vmem_to_hbm [thread:$0]  (%p4173_p5), %s5518_s24, 16, %s5516_s10, %s3087_s12  }
 0xd44 PF: > { %p3949_p1 = scmp.ge.s32.totalorder %s4079_s30, 2  ;;  %s3111_s26 = sand.u32 1, %s4067_s27  }
 0xd45   : > { %s3112_s13 = scalar_lea.sflag [#allocation3], %s3111_s26 }
 0xd46   : > { %p3946_p2 = pnand %p3949_p1, %p4177_p6 }
 0xd48   : > { %4062 = dma.done.wait (!%p3946_p2), %s3112_s13, 16  }
 0xd49   : > { %4064 = vsyncadd (!%p3946_p2), %s3112_s13, 4294967280  ;;  %p18_p3 = scmp.ge.s32.totalorder %s4160_s11, 4   ;;  %s5569_s27 = smov %s4071_s28 }
 0xd4a   : > { %s5570_s28 = smov %s4075_s29  ;;  %s5571_s29 = smov %s4171_s14 }
 0xd4b   : > { %s5572_s30 = smov %s4160_s11  ;;  %20 = sbr.rel (!%p18_p3) target bundleno = 3 (0x3), region = 87 }
 0xd52   :  { %3116 = vsyncpa [#allocation3], 1 }
 0xd53   :  { %3118 = vsyncpa [#allocation3 + $0x1], 1 }

</bundles_post_ra>
